<compile_context>
chip_gen: v5e
topology: v5e:2x2
jax: 0.10.0
libtpu: 0.0.40
codegen_flags: <defaults>
</compile_context>

<pallas_src>
import jax
import jax.numpy as jnp
from jax.experimental import pallas as pl
from jax.experimental.pallas import tpu as pltpu


def _head_kernel(x_ref, w1_ref, b1_ref, w2_ref, b2_ref, w3_ref, b3_ref, o_ref):
    # Linear(2048, 512) + bias + ReLU   (Dropout(0.3) = identity at inference)
    h1 = jnp.dot(x_ref[...], w1_ref[...],
                 preferred_element_type=jnp.float32) + b1_ref[...]
    h1 = jnp.maximum(h1, 0.0)
    # Linear(512, 128) + bias + ReLU    (Dropout(0.3) = identity at inference)
    h2 = jnp.dot(h1.astype(w2_ref.dtype), w2_ref[...],
                 preferred_element_type=jnp.float32) + b2_ref[...]
    h2 = jnp.maximum(h2, 0.0)
    # Linear(128, num_classes)
    out = jnp.dot(h2.astype(w3_ref.dtype), w3_ref[...],
                  preferred_element_type=jnp.float32) + b3_ref[...]
    o_ref[...] = out.astype(o_ref.dtype)


def make_model_head(feats_nchw, params):
    """feats_nchw: [B, C, H, W] backbone features (f32). Returns [B, num_classes] f32."""
    B, C, H, W = feats_nchw.shape
    w1, b1, w2, b2, w3, b3 = params
    num_classes = w3.shape[1]
    assert C == w1.shape[0]

    # AdaptiveAvgPool2d(1) + x.view(B, -1) as a plain-XLA reduction over a
    # lane-contiguous last axis (H*W on lanes), keeping the prologue near the
    # HBM roofline instead of XLU-heavy (7,7)-tile reduce codegen.
    pooled = (feats_nchw.reshape(B * C, H * W).mean(axis=-1)
              .reshape(B, C).astype(w1.dtype))                      # [B, C] bf16

    flops = 2 * B * (C * w1.shape[1] + w2.shape[0] * w2.shape[1]
                     + w3.shape[0] * w3.shape[1])
    bytes_accessed = (
        pooled.size * pooled.dtype.itemsize
        + sum(a.size * a.dtype.itemsize for a in (w1, b1, w2, b2, w3, b3))
        + B * num_classes * 4)

    vmem_full = pl.BlockSpec(memory_space=pltpu.MemorySpace.VMEM)
    return pl.pallas_call(
        _head_kernel,
        out_shape=jax.ShapeDtypeStruct((B, num_classes), jnp.float32),
        in_specs=[vmem_full] * 7,
        out_specs=vmem_full,
        cost_estimate=pl.CostEstimate(flops=flops, transcendentals=0,
                                      bytes_accessed=bytes_accessed),
    )(pooled, w1, b1, w2, b2, w3, b3)


def init_params(key, num_features=2048, num_classes=10):
    """PyTorch nn.Linear-style init (U[-1/sqrt(fan_in), +1/sqrt(fan_in)]).

    Weights stored as bf16 [in, out] (so kernel does x @ W == x @ W_torch.T);
    biases kept f32 [1, out].
    """
    def linear(k, fan_in, fan_out):
        kw, kb = jax.random.split(k)
        bound = 1.0 / jnp.sqrt(fan_in)
        w = jax.random.uniform(kw, (fan_in, fan_out), jnp.float32, -bound, bound)
        b = jax.random.uniform(kb, (1, fan_out), jnp.float32, -bound, bound)
        return w.astype(jnp.bfloat16), b

    k1, k2, k3 = jax.random.split(key, 3)
    w1, b1 = linear(k1, num_features, 512)
    w2, b2 = linear(k2, 512, 128)
    w3, b3 = linear(k3, 128, num_classes)
    return (w1, b1, w2, b2, w3, b3)


if __name__ == "__main__":
    key = jax.random.PRNGKey(0)
    k_x, k_p = jax.random.split(key)

    # resnet50 backbone output on a 224x224 image: [B, 2048, 7, 7]
    B, C, H, W = 2, 2048, 7, 7
    feats = jax.random.normal(k_x, (B, C, H, W), jnp.float32)
    params = init_params(k_p, num_features=C, num_classes=10)

    out = jax.block_until_ready(make_model_head(feats, params))

    # Pure-JAX reference of the same math (same bf16 weights / activations).
    w1, b1, w2, b2, w3, b3 = params
    pooled = jnp.mean(feats, axis=(2, 3)).astype(jnp.bfloat16)
    h1 = jnp.maximum(jnp.dot(pooled, w1, preferred_element_type=jnp.float32) + b1, 0.0)
    h2 = jnp.maximum(jnp.dot(h1.astype(jnp.bfloat16), w2,
                             preferred_element_type=jnp.float32) + b2, 0.0)
    ref = jnp.dot(h2.astype(jnp.bfloat16), w3,
                  preferred_element_type=jnp.float32) + b3

    assert out.shape == (B, 10)
    assert jnp.allclose(out, ref, atol=1e-2, rtol=1e-2), \
        float(jnp.max(jnp.abs(out - ref)))

    print("KERNEL_OK")
</pallas_src>

<mosaic_0001>
module attributes {stable_mosaic.version = 11 : i64} {
  func.func @_head_kernel(%arg0: memref<2x2048xbf16, #tpu.memory_space<vmem>>, %arg1: memref<2048x512xbf16, #tpu.memory_space<vmem>>, %arg2: memref<1x512xf32, #tpu.memory_space<vmem>>, %arg3: memref<512x128xbf16, #tpu.memory_space<vmem>>, %arg4: memref<1x128xf32, #tpu.memory_space<vmem>>, %arg5: memref<128x10xbf16, #tpu.memory_space<vmem>>, %arg6: memref<1x10xf32, #tpu.memory_space<vmem>>, %arg7: memref<2x10xf32, #tpu.memory_space<vmem>>) attributes {dimension_semantics = [], scalar_prefetch = 0 : i64, scratch_operands = 0 : i64, tpu.core_type = #tpu.core_type<tc>} {
    %c0 = arith.constant 0 : index
    %c0_0 = arith.constant 0 : index
    %0 = vector.load %arg0[%c0, %c0_0] : memref<2x2048xbf16, #tpu.memory_space<vmem>>, vector<2x2048xbf16>
    %c0_1 = arith.constant 0 : index
    %c0_2 = arith.constant 0 : index
    %1 = vector.load %arg1[%c0_1, %c0_2] : memref<2048x512xbf16, #tpu.memory_space<vmem>>, vector<2048x512xbf16>
    %cst = arith.constant dense<0.000000e+00> : vector<2x512xf32>
    %2 = tpu.matmul %0, %1, %cst {dimension_numbers = #tpu.dot_dimension_numbers<[1], [0], [0], [1], [0, 0, 1, 1], [], []>} : vector<2x2048xbf16>, vector<2048x512xbf16>, vector<2x512xf32> -> vector<2x512xf32>
    %c0_3 = arith.constant 0 : index
    %c0_4 = arith.constant 0 : index
    %3 = vector.load %arg2[%c0_3, %c0_4] : memref<1x512xf32, #tpu.memory_space<vmem>>, vector<1x512xf32>
    %4 = vector.broadcast %3 : vector<1x512xf32> to vector<2x512xf32>
    %5 = arith.addf %2, %4 : vector<2x512xf32>
    %cst_5 = arith.constant 0.000000e+00 : f32
    %6 = vector.broadcast %cst_5 : f32 to vector<2x512xf32>
    %7 = arith.maximumf %5, %6 : vector<2x512xf32>
    %8 = arith.truncf %7 : vector<2x512xf32> to vector<2x512xbf16>
    %c0_6 = arith.constant 0 : index
    %c0_7 = arith.constant 0 : index
    %9 = vector.load %arg3[%c0_6, %c0_7] : memref<512x128xbf16, #tpu.memory_space<vmem>>, vector<512x128xbf16>
    %cst_8 = arith.constant dense<0.000000e+00> : vector<2x128xf32>
    %10 = tpu.matmul %8, %9, %cst_8 {dimension_numbers = #tpu.dot_dimension_numbers<[1], [0], [0], [1], [0, 0, 1, 1], [], []>} : vector<2x512xbf16>, vector<512x128xbf16>, vector<2x128xf32> -> vector<2x128xf32>
    %c0_9 = arith.constant 0 : index
    %c0_10 = arith.constant 0 : index
    %11 = vector.load %arg4[%c0_9, %c0_10] : memref<1x128xf32, #tpu.memory_space<vmem>>, vector<1x128xf32>
    %12 = vector.broadcast %11 : vector<1x128xf32> to vector<2x128xf32>
    %13 = arith.addf %10, %12 : vector<2x128xf32>
    %cst_11 = arith.constant 0.000000e+00 : f32
    %14 = vector.broadcast %cst_11 : f32 to vector<2x128xf32>
    %15 = arith.maximumf %13, %14 : vector<2x128xf32>
    %16 = arith.truncf %15 : vector<2x128xf32> to vector<2x128xbf16>
    %c0_12 = arith.constant 0 : index
    %c0_13 = arith.constant 0 : index
    %17 = vector.load %arg5[%c0_12, %c0_13] : memref<128x10xbf16, #tpu.memory_space<vmem>>, vector<128x10xbf16>
    %cst_14 = arith.constant dense<0.000000e+00> : vector<2x10xf32>
    %18 = tpu.matmul %16, %17, %cst_14 {dimension_numbers = #tpu.dot_dimension_numbers<[1], [0], [0], [1], [0, 0, 1, 1], [], []>} : vector<2x128xbf16>, vector<128x10xbf16>, vector<2x10xf32> -> vector<2x10xf32>
    %c0_15 = arith.constant 0 : index
    %c0_16 = arith.constant 0 : index
    %19 = vector.load %arg6[%c0_15, %c0_16] : memref<1x10xf32, #tpu.memory_space<vmem>>, vector<1x10xf32>
    %20 = vector.broadcast %19 : vector<1x10xf32> to vector<2x10xf32>
    %21 = arith.addf %18, %20 : vector<2x10xf32>
    %c0_17 = arith.constant 0 : index
    %c0_18 = arith.constant 0 : index
    %22 = vector.load %arg7[%c0_17, %c0_18] : memref<2x10xf32, #tpu.memory_space<vmem>>, vector<2x10xf32>
    tpu.vector_store %arg7[%c0_17, %c0_18], %21 {strides = array<i32>} : memref<2x10xf32, #tpu.memory_space<vmem>>, vector<2x10xf32>,
    return
  }
}

</mosaic_0001>

<bundles_post_ra>
// kernel: tpu_custom_call.1
= control target key start
LH: loop header
LB: loop body
LE: loop exit
PB: predicated region body
PF: predicated region fallthrough
CT: control target
= control target key end

     0   :  { %12 = vsyncpa [#allocation3], 0  ;;  %s7663_s0 = inlined_call_operand.hbm [shape: bf16[2,2048], index: 0, kind: input, shape index: {}]   ;;  %s7664_s1 = inlined_call_operand.hbm [shape: bf16[2048,512], index: 1, kind: input, shape index: {}]   ;;  %s7665_s2 = inlined_call_operand.hbm [shape: f32[1,512], index: 2, kind: input, shape index: {}]   ;;  %s7666_s3 = inlined_call_operand.hbm [shape: bf16[512,128], index: 3, kind: input, shape index: {}]   ;;  %s7667_s4 = inlined_call_operand.hbm [shape: f32[1,128], index: 4, kind: input, shape index: {}]   ;;  %s7668_s5 = inlined_call_operand.vmem [shape: bf16[128,10], index: 5, kind: input, shape index: {}]   ;;  %s7669_s6 = inlined_call_operand.hbm [shape: f32[1,10], index: 6, kind: input, shape index: {}]   ;;  %s7670_s7 = inlined_call_operand.hbm [shape: f32[2,10], index: 7, kind: output, shape index: {}]  }
   0x1   :  { %13 = vsyncpa [#allocation6], 0 }
   0x2   :  { %14 = vsyncpa [#allocation9], 0 }
   0x3   :  { %15 = vsyncpa [#allocation12], 0  ;;  %s32_s26 = sshll.u32 %s7664_s1, 4  ;;  %s33_s26 = int_to_ptr.hbm [resolvable:$true] %s32_s26 }
   0x4   :  { %16 = vsyncpa [#allocation4], 0  ;;  %s7467_s27 = smov [#allocation5]   ;;  %s56_s8 = sshll.u32 %s7666_s3, 4  ;;  %s57_s8 = int_to_ptr.hbm [resolvable:$true] %s56_s8 }
   0x5   :  { %s34_s28 = sshll.u32 %s7467_s27, 4  ;;  %s7468_s9 = smov 256   ;;  %s35_s28 = int_to_ptr.vmem [resolvable:$true] %s34_s28 }
   0x6   :  { %s7469_s10 = smov 16   ;;  %s7470_s11 = smov [#allocation8]  }
   0x7   :  { %40 = dma.hbm_to_vmem [thread:$0]  %s33_s26, 65536, %s35_s28, [#allocation6], %s7468_s9, %s7468_s9, %s7469_s10  }
   0x8   :  { %s58_s12 = sshll.u32 %s7470_s11, 4  ;;  %s7471_s13 = smov 64   ;;  %s59_s12 = int_to_ptr.vmem [resolvable:$true] %s58_s12 }
   0x9   :  { %s7472_s14 = smov 4   ;;  %s22_s16 = sshll.u32 %s7663_s0, 4  ;;  %s23_s16 = int_to_ptr.hbm [resolvable:$true] %s22_s16 }
   0xa   :  { %64 = dma.hbm_to_vmem [thread:$0]  %s57_s8, 4096, %s59_s12, [#allocation9], %s7471_s13, %s7471_s13, %s7472_s14  }
   0xb   :  { %s7473_s17 = smov [#allocation2]   ;;  %s46_s20 = sshll.u32 %s7665_s2, 4  ;;  %s47_s20 = int_to_ptr.hbm [resolvable:$true] %s46_s20 }
   0xc   :  { %s24_s18 = sshll.u32 %s7473_s17, 4  ;;  %s7474_s21 = smov [#allocation7]   ;;  %s25_s18 = int_to_ptr.vmem [resolvable:$true] %s24_s18 }
   0xd   :  { %27 = dma.hbm_to_vmem [thread:$0]  %s23_s16, 256, %s25_s18, [#allocation3]  }
   0xe   :  { %s48_s22 = sshll.u32 %s7474_s21, 4  ;;  %s70_s25 = sshll.u32 %s7667_s4, 4  ;;  %s49_s22 = int_to_ptr.vmem [resolvable:$true] %s48_s22  ;;  %s71_s25 = int_to_ptr.hbm [resolvable:$true] %s70_s25 }
   0xf   :  { %51 = dma.hbm_to_vmem [thread:$0]  %s47_s20, 64, %s49_s22, [#allocation6]  }
  0x10   :  { %s83_s27 = sshll.u32 %s7669_s6, 4  ;;  %s7475_s28 = smov [#allocation10]   ;;  %s84_s27 = int_to_ptr.hbm [resolvable:$true] %s83_s27 }
  0x11   :  { %s72_s29 = sshll.u32 %s7475_s28, 4  ;;  %s7476_s2 = smov [#allocation11]   ;;  %s73_s29 = int_to_ptr.vmem [resolvable:$true] %s72_s29 }
  0x12   :  { %75 = dma.hbm_to_vmem [thread:$0]  %s71_s25, 16, %s73_s29, [#allocation9]  }
  0x13   :  { %s85_s30 = sshll.u32 %s7476_s2, 4  ;;  %s86_s30 = int_to_ptr.vmem [resolvable:$true] %s85_s30 }
  0x14   :  { %88 = dma.hbm_to_vmem [thread:$0]  %s84_s27, 16, %s86_s30, [#allocation12]  }
  0x15   :  { %7457 = dma.done.wait [#allocation3], 256  }
  0x16   :  { %7458 = vsyncadd [#allocation3], 4294967040 }
  0x17   :  { %7459 = dma.done.wait [#allocation6], 65600  }
  0x18   :  { %7460 = vsyncadd [#allocation6], 4294901696 }
  0x19   :  { %7461 = dma.done.wait [#allocation9], 4112  }
  0x1a   :  { %7462 = vsyncadd [#allocation9], 4294963184 }
  0x1b   :  { %7463 = dma.done.wait [#allocation12], 16  }
  0x1c   :  { %7464 = vsyncadd [#allocation12], 4294967280  ;;  %v4604_v0 = vld [vmem:[#allocation5 + $0xe0] sm:$0xf]  ;;  %v6728_v1 = vld [vmem:[#allocation5 + $0xec] sm:$0xf0] }
  0x1d   :  { %v4732_v2 = vld [vmem:[#allocation5 + $0x1e0] sm:$0xf]  ;;  %v4605_v3 = vor.u32 %v6728_v1, %v4604_v0  ;;  %v6760_v4 = vld [vmem:[#allocation5 + $0x1ec] sm:$0xf0]  ;;  %s7477_s20 = smov [#allocation13]   ;;  %s4477_s24 = sshll.u32 %s7670_s7, 4  ;;  %s4478_s24 = int_to_ptr.hbm [resolvable:$true] %s4477_s24 }
  0x1e   :  { %v4860_v5 = vld [vmem:[#allocation5 + $0x2e0] sm:$0xf]  ;;  %v6792_v6 = vld [vmem:[#allocation5 + $0x2ec] sm:$0xf0]  ;;  %v4733_v7 = vor.u32 %v6760_v4, %v4732_v2  ;;  %s4475_s21 = sshll.u32 %s7477_s20, 4  ;;  %vm4468_vm0 = vcmask 74752   ;;  %s4476_s21 = int_to_ptr.vmem [resolvable:$true] %s4475_s21 }
  0x1f   :  { %v4861_v8 = vor.u32 %v6792_v6, %v4860_v5  ;;  %v4988_v9 = vld [vmem:[#allocation5 + $0x3e0] sm:$0xf]  ;;  %v6824_v10 = vld [vmem:[#allocation5 + $0x3ec] sm:$0xf0]  ;;  %3233 = vmatpush.bf16.msra.mxu0 %v4605_v3 }
  0x20   :  { %v4588_v11 = vld [vmem:[#allocation5 + $0xc0] sm:$0xf]  ;;  %v4989_v12 = vor.u32 %v6824_v10, %v4988_v9  ;;  %v6724_v13 = vld [vmem:[#allocation5 + $0xcc] sm:$0xf0]  ;;  %3246 = vmatpush.bf16.msra.mxu1 %v4733_v7 }
  0x21   :  { %v4716_v14 = vld [vmem:[#allocation5 + $0x1c0] sm:$0xf]  ;;  %v6756_v15 = vld [vmem:[#allocation5 + $0x1cc] sm:$0xf0]  ;;  %3259 = vmatpush.bf16.msra.mxu2 %v4861_v8  ;;  %v4589_v16 = vor.u32 %v6724_v13, %v4588_v11 }
  0x22   :  { %v4717_v17 = vor.u32 %v6756_v15, %v4716_v14  ;;  %v4844_v18 = vld [vmem:[#allocation5 + $0x2c0] sm:$0xf]  ;;  %v6788_v19 = vld [vmem:[#allocation5 + $0x2cc] sm:$0xf0]  ;;  %3272 = vmatpush.bf16.msra.mxu3 %v4989_v12 }
  0x23   :  { %v4972_v20 = vld [vmem:[#allocation5 + $0x3c0] sm:$0xf]  ;;  %v4845_v21 = vor.u32 %v6788_v19, %v4844_v18  ;;  %v6820_v22 = vld [vmem:[#allocation5 + $0x3cc] sm:$0xf0]  ;;  %3234 = vmatpush.bf16.msra.mxu0 %v4589_v16 }
  0x24   :  { %v4572_v23 = vld [vmem:[#allocation5 + $0xa0] sm:$0xf]  ;;  %v6720_v24 = vld [vmem:[#allocation5 + $0xac] sm:$0xf0]  ;;  %v4973_v25 = vor.u32 %v6820_v22, %v4972_v20  ;;  %3247 = vmatpush.bf16.msra.mxu1 %v4717_v17 }
  0x25   :  { %v4700_v26 = vld [vmem:[#allocation5 + $0x1a0] sm:$0xf]  ;;  %v6752_v27 = vld [vmem:[#allocation5 + $0x1ac] sm:$0xf0]  ;;  %v4573_v29 = vor.u32 %v6720_v24, %v4572_v23  ;;  %3260 = vmatpush.bf16.msra.mxu2 %v4845_v21 }
  0x26   :  { %v4828_v28 = vld [vmem:[#allocation5 + $0x2a0] sm:$0xf]  ;;  %v6784_v30 = vld [vmem:[#allocation5 + $0x2ac] sm:$0xf0]  ;;  %v4701_v33 = vor.u32 %v6752_v27, %v4700_v26  ;;  %3273 = vmatpush.bf16.msra.mxu3 %v4973_v25 }
  0x27   :  { %v4956_v31 = vld [vmem:[#allocation5 + $0x3a0] sm:$0xf]  ;;  %v6816_v32 = vld [vmem:[#allocation5 + $0x3ac] sm:$0xf0]  ;;  %v4829_v34 = vor.u32 %v6784_v30, %v4828_v28  ;;  %3235 = vmatpush.bf16.msra.mxu0 %v4573_v29 }
  0x28   :  { %v4556_v35 = vld [vmem:[#allocation5 + $0x80] sm:$0xf]  ;;  %v6716_v36 = vld [vmem:[#allocation5 + $0x8c] sm:$0xf0]  ;;  %v4957_v38 = vor.u32 %v6816_v32, %v4956_v31  ;;  %3248 = vmatpush.bf16.msra.mxu1 %v4701_v33 }
  0x29   :  { %v4684_v37 = vld [vmem:[#allocation5 + $0x180] sm:$0xf]  ;;  %v6748_v39 = vld [vmem:[#allocation5 + $0x18c] sm:$0xf0]  ;;  %v4557_v44 = vor.u32 %v6716_v36, %v4556_v35  ;;  %3261 = vmatpush.bf16.msra.mxu2 %v4829_v34 }
  0x2a   :  { %v4812_v40 = vld [vmem:[#allocation5 + $0x280] sm:$0xf]  ;;  %v6780_v41 = vld [vmem:[#allocation5 + $0x28c] sm:$0xf0]  ;;  %v4685_v45 = vor.u32 %v6748_v39, %v4684_v37  ;;  %3274 = vmatpush.bf16.msra.mxu3 %v4957_v38 }
  0x2b   :  { %v4940_v42 = vld [vmem:[#allocation5 + $0x380] sm:$0xf]  ;;  %v6812_v43 = vld [vmem:[#allocation5 + $0x38c] sm:$0xf0]  ;;  %v4813_v46 = vor.u32 %v6780_v41, %v4812_v40  ;;  %3236 = vmatpush.bf16.msra.mxu0 %v4557_v44 }
  0x2c   :  { %v4540_v47 = vld [vmem:[#allocation5 + $0x60] sm:$0xf]  ;;  %v6712_v48 = vld [vmem:[#allocation5 + $0x6c] sm:$0xf0]  ;;  %v4941_v50 = vor.u32 %v6812_v43, %v4940_v42  ;;  %3249 = vmatpush.bf16.msra.mxu1 %v4685_v45 }
  0x2d   :  { %v4668_v49 = vld [vmem:[#allocation5 + $0x160] sm:$0xf]  ;;  %v6744_v51 = vld [vmem:[#allocation5 + $0x16c] sm:$0xf0]  ;;  %v4541_v56 = vor.u32 %v6712_v48, %v4540_v47  ;;  %3262 = vmatpush.bf16.msra.mxu2 %v4813_v46 }
  0x2e   :  { %v4796_v52 = vld [vmem:[#allocation5 + $0x260] sm:$0xf]  ;;  %v6776_v53 = vld [vmem:[#allocation5 + $0x26c] sm:$0xf0]  ;;  %v4669_v57 = vor.u32 %v6744_v51, %v4668_v49  ;;  %3275 = vmatpush.bf16.msra.mxu3 %v4941_v50 }
  0x2f   :  { %v4924_v54 = vld [vmem:[#allocation5 + $0x360] sm:$0xf]  ;;  %v6808_v55 = vld [vmem:[#allocation5 + $0x36c] sm:$0xf0]  ;;  %v4797_v58 = vor.u32 %v6776_v53, %v4796_v52  ;;  %3237 = vmatpush.bf16.msra.mxu0 %v4541_v56 }
  0x30   :  { %v4524_v59 = vld [vmem:[#allocation5 + $0x40] sm:$0xf]  ;;  %v6708_v60 = vld [vmem:[#allocation5 + $0x4c] sm:$0xf0]  ;;  %v4925_v62 = vor.u32 %v6808_v55, %v4924_v54  ;;  %3250 = vmatpush.bf16.msra.mxu1 %v4669_v57 }
  0x31   :  { %v4652_v61 = vld [vmem:[#allocation5 + $0x140] sm:$0xf]  ;;  %v6740_v63 = vld [vmem:[#allocation5 + $0x14c] sm:$0xf0]  ;;  %v4525_v4 = vor.u32 %v6708_v60, %v4524_v59  ;;  %3263 = vmatpush.bf16.msra.mxu2 %v4797_v58 }
  0x32   :  { %v4780_v0 = vld [vmem:[#allocation5 + $0x240] sm:$0xf]  ;;  %v6772_v1 = vld [vmem:[#allocation5 + $0x24c] sm:$0xf0]  ;;  %v4653_v5 = vor.u32 %v6740_v63, %v4652_v61  ;;  %3276 = vmatpush.bf16.msra.mxu3 %v4925_v62 }
  0x33   :  { %v4908_v2 = vld [vmem:[#allocation5 + $0x340] sm:$0xf]  ;;  %v6804_v3 = vld [vmem:[#allocation5 + $0x34c] sm:$0xf0]  ;;  %v4781_v6 = vor.u32 %v6772_v1, %v4780_v0  ;;  %3238 = vmatpush.bf16.msra.mxu0 %v4525_v4 }
  0x34   :  { %v4508_v7 = vld [vmem:[#allocation5 + $0x20] sm:$0xf]  ;;  %v6704_v8 = vld [vmem:[#allocation5 + $0x2c] sm:$0xf0]  ;;  %v4909_v10 = vor.u32 %v6804_v3, %v4908_v2  ;;  %3251 = vmatpush.bf16.msra.mxu1 %v4653_v5 }
  0x35   :  { %v4636_v9 = vld [vmem:[#allocation5 + $0x120] sm:$0xf]  ;;  %v6736_v11 = vld [vmem:[#allocation5 + $0x12c] sm:$0xf0]  ;;  %v4509_v16 = vor.u32 %v6704_v8, %v4508_v7  ;;  %3264 = vmatpush.bf16.msra.mxu2 %v4781_v6 }
  0x36   :  { %v4764_v12 = vld [vmem:[#allocation5 + $0x220] sm:$0xf]  ;;  %v6768_v13 = vld [vmem:[#allocation5 + $0x22c] sm:$0xf0]  ;;  %v4637_v19 = vor.u32 %v6736_v11, %v4636_v9  ;;  %3277 = vmatpush.bf16.msra.mxu3 %v4909_v10 }
  0x37   :  { %v4892_v14 = vld [vmem:[#allocation5 + $0x320] sm:$0xf]  ;;  %v6800_v15 = vld [vmem:[#allocation5 + $0x32c] sm:$0xf0]  ;;  %v4765_v20 = vor.u32 %v6768_v13, %v4764_v12  ;;  %3239 = vmatpush.bf16.msra.mxu0 %v4509_v16 }
  0x38   :  { %v4492_v17 = vld [vmem:[#allocation5] sm:$0xf]  ;;  %v6700_v18 = vld [vmem:[#allocation5 + $0xc] sm:$0xf0]  ;;  %v4893_v24 = vor.u32 %v6800_v15, %v4892_v14  ;;  %3252 = vmatpush.bf16.msra.mxu1 %v4637_v19 }
  0x39   :  { %v4620_v21 = vld [vmem:[#allocation5 + $0x100] sm:$0xf]  ;;  %v6732_v22 = vld [vmem:[#allocation5 + $0x10c] sm:$0xf0]  ;;  %v4493_v31 = vor.u32 %v6700_v18, %v4492_v17  ;;  %3265 = vmatpush.bf16.msra.mxu2 %v4765_v20 }
  0x3a   :  { %v4748_v23 = vld [vmem:[#allocation5 + $0x200] sm:$0xf]  ;;  %v6764_v25 = vld [vmem:[#allocation5 + $0x20c] sm:$0xf0]  ;;  %v4621_v35 = vor.u32 %v6732_v22, %v4620_v21  ;;  %3278 = vmatpush.bf16.msra.mxu3 %v4893_v24 }
  0x3b   :  { %v4876_v26 = vld [vmem:[#allocation5 + $0x300] sm:$0xf]  ;;  %v6796_v27 = vld [vmem:[#allocation5 + $0x30c] sm:$0xf0]  ;;  %v4749_v36 = vor.u32 %v6764_v25, %v4748_v23  ;;  %3240 = vmatpush.bf16.msra.mxu0 %v4493_v31 }
  0x3c   :  { %v5116_v28 = vld [vmem:[#allocation5 + $0x4e0] sm:$0xf]  ;;  %v6856_v29 = vld [vmem:[#allocation5 + $0x4ec] sm:$0xf0]  ;;  %v4877_v39 = vor.u32 %v6796_v27, %v4876_v26  ;;  %3253 = vmatpush.bf16.msra.mxu1 %v4621_v35 }
  0x3d   :  { %v5244_v30 = vld [vmem:[#allocation5 + $0x5e0] sm:$0xf]  ;;  %v6888_v32 = vld [vmem:[#allocation5 + $0x5ec] sm:$0xf0]  ;;  %v5117_v40 = vor.u32 %v6856_v29, %v5116_v28  ;;  %3266 = vmatpush.bf16.msra.mxu2 %v4749_v36 }
  0x3e   :  { %v5372_v33 = vld [vmem:[#allocation5 + $0x6e0] sm:$0xf]  ;;  %v6920_v34 = vld [vmem:[#allocation5 + $0x6ec] sm:$0xf0]  ;;  %v5245_v41 = vor.u32 %v6888_v32, %v5244_v30  ;;  %3279 = vmatpush.bf16.msra.mxu3 %v4877_v39 }
  0x3f   :  { %v5500_v37 = vld [vmem:[#allocation5 + $0x7e0] sm:$0xf]  ;;  %v6952_v38 = vld [vmem:[#allocation5 + $0x7ec] sm:$0xf0]  ;;  %v5373_v42 = vor.u32 %v6920_v34, %v5372_v33  ;;  %3285 = vmatpush.bf16.msrb.mxu0 %v5117_v40 }
  0x40   :  { %v5100_v43 = vld [vmem:[#allocation5 + $0x4c0] sm:$0xf]  ;;  %v6852_v44 = vld [vmem:[#allocation5 + $0x4cc] sm:$0xf0]  ;;  %v5501_v46 = vor.u32 %v6952_v38, %v5500_v37  ;;  %3298 = vmatpush.bf16.msrb.mxu1 %v5245_v41 }
  0x41   :  { %v5228_v45 = vld [vmem:[#allocation5 + $0x5c0] sm:$0xf]  ;;  %v6884_v47 = vld [vmem:[#allocation5 + $0x5cc] sm:$0xf0]  ;;  %v5101_v52 = vor.u32 %v6852_v44, %v5100_v43  ;;  %3311 = vmatpush.bf16.msrb.mxu2 %v5373_v42 }
  0x42   :  { %v5356_v48 = vld [vmem:[#allocation5 + $0x6c0] sm:$0xf]  ;;  %v6916_v49 = vld [vmem:[#allocation5 + $0x6cc] sm:$0xf0]  ;;  %v5229_v53 = vor.u32 %v6884_v47, %v5228_v45  ;;  %3324 = vmatpush.bf16.msrb.mxu3 %v5501_v46 }
  0x43   :  { %v5484_v50 = vld [vmem:[#allocation5 + $0x7c0] sm:$0xf]  ;;  %v6948_v51 = vld [vmem:[#allocation5 + $0x7cc] sm:$0xf0]  ;;  %v5357_v54 = vor.u32 %v6916_v49, %v5356_v48  ;;  %3286 = vmatpush.bf16.msrb.mxu0 %v5101_v52 }
  0x44   :  { %v5084_v55 = vld [vmem:[#allocation5 + $0x4a0] sm:$0xf]  ;;  %v6848_v56 = vld [vmem:[#allocation5 + $0x4ac] sm:$0xf0]  ;;  %v5485_v58 = vor.u32 %v6948_v51, %v5484_v50  ;;  %3299 = vmatpush.bf16.msrb.mxu1 %v5229_v53 }
  0x45   :  { %v5212_v57 = vld [vmem:[#allocation5 + $0x5a0] sm:$0xf]  ;;  %v6880_v59 = vld [vmem:[#allocation5 + $0x5ac] sm:$0xf0]  ;;  %v5085_v0 = vor.u32 %v6848_v56, %v5084_v55  ;;  %3312 = vmatpush.bf16.msrb.mxu2 %v5357_v54 }
  0x46   :  { %v5340_v60 = vld [vmem:[#allocation5 + $0x6a0] sm:$0xf]  ;;  %v6912_v61 = vld [vmem:[#allocation5 + $0x6ac] sm:$0xf0]  ;;  %v5213_v3 = vor.u32 %v6880_v59, %v5212_v57  ;;  %3325 = vmatpush.bf16.msrb.mxu3 %v5485_v58 }
  0x47   :  { %v5468_v62 = vld [vmem:[#allocation5 + $0x7a0] sm:$0xf]  ;;  %v6944_v63 = vld [vmem:[#allocation5 + $0x7ac] sm:$0xf0]  ;;  %v5341_v4 = vor.u32 %v6912_v61, %v5340_v60  ;;  %3287 = vmatpush.bf16.msrb.mxu0 %v5085_v0 }
  0x48   :  { %v5068_v1 = vld [vmem:[#allocation5 + $0x480] sm:$0xf]  ;;  %v113_v2 = vld [vmem:[#allocation2] sm:$0xff]  ;;  %v5469_v7 = vor.u32 %v6944_v63, %v5468_v62  ;;  %3300 = vmatpush.bf16.msrb.mxu1 %v5213_v3 }
  0x49   :  { %v6844_v5 = vld [vmem:[#allocation5 + $0x48c] sm:$0xf0]  ;;  %v5196_v6 = vld [vmem:[#allocation5 + $0x580] sm:$0xf]  ;;  %638 = vst [vmem:[#allocation1] ss:$9 sm:$0xff] %v113_v2  ;;  %3313 = vmatpush.bf16.msrb.mxu2 %v5341_v4 }
  0x4a   :  { %v6876_v8 = vld [vmem:[#allocation5 + $0x58c] sm:$0xf0]  ;;  %v5324_v9 = vld [vmem:[#allocation5 + $0x680] sm:$0xf]  ;;  %v5069_v13 = vor.u32 %v6844_v5, %v5068_v1  ;;  %3326 = vmatpush.bf16.msrb.mxu3 %v5469_v7 }
  0x4b   :  { %v6908_v10 = vld [vmem:[#allocation5 + $0x68c] sm:$0xf0]  ;;  %v5452_v11 = vld [vmem:[#allocation5 + $0x780] sm:$0xf]  ;;  %v5197_v14 = vor.u32 %v6876_v8, %v5196_v6 }
  0x4c   :  { %v6940_v12 = vld [vmem:[#allocation5 + $0x78c] sm:$0xf0]  ;;  %v5325_v15 = vor.u32 %v6908_v10, %v5324_v9  ;;  %v5052_v16 = vld [vmem:[#allocation5 + $0x460] sm:$0xf]  ;;  %3288 = vmatpush.bf16.msrb.mxu0 %v5069_v13 }
  0x4d   :  { %v6840_v17 = vld [vmem:[#allocation5 + $0x46c] sm:$0xf0]  ;;  %v5180_v18 = vld [vmem:[#allocation5 + $0x560] sm:$0xf]  ;;  %v5453_v19 = vor.u32 %v6940_v12, %v5452_v11  ;;  %3301 = vmatpush.bf16.msrb.mxu1 %v5197_v14 }
  0x4e   :  { %v6872_v20 = vld [vmem:[#allocation5 + $0x56c] sm:$0xf0]  ;;  %v5308_v21 = vld [vmem:[#allocation5 + $0x660] sm:$0xf]  ;;  %v5053_v26 = vor.u32 %v6840_v17, %v5052_v16  ;;  %3314 = vmatpush.bf16.msrb.mxu2 %v5325_v15 }
  0x4f   :  { %v6904_v22 = vld [vmem:[#allocation5 + $0x66c] sm:$0xf0]  ;;  %v5436_v23 = vld [vmem:[#allocation5 + $0x760] sm:$0xf]  ;;  %v5181_v30 = vor.u32 %v6872_v20, %v5180_v18  ;;  %3327 = vmatpush.bf16.msrb.mxu3 %v5453_v19 }
  0x50   :  { %v6936_v24 = vld [vmem:[#allocation5 + $0x76c] sm:$0xf0]  ;;  %v5036_v25 = vld [vmem:[#allocation5 + $0x440] sm:$0xf]  ;;  %v7538_v28 = vld [vmem:[#allocation1] sm:$0xff]  ;;  %v5309_v31 = vor.u32 %v6904_v22, %v5308_v21  ;;  %3289 = vmatpush.bf16.msrb.mxu0 %v5053_v26 }
  0x51   :  { %v7536_v27 = vld [vmem:[#allocation1 + $0x12] sm:$0xff]  ;;  %v7540_v29 = vld [vmem:[#allocation1 + $0x1b] sm:$0xff]  ;;  %v6836_v32 = vld [vmem:[#allocation5 + $0x44c] sm:$0xf0]  ;;  %v5437_v35 = vor.u32 %v6936_v24, %v5436_v23  ;;  %3241 = vmatmul.bf16.vlgmr.msra.gmra.mxu0 %v7538_v28  ;;  %3302 = vmatpush.bf16.msrb.mxu1 %v5181_v30 }
  0x52   :  { %v5164_v33 = vld [vmem:[#allocation5 + $0x540] sm:$0xf]  ;;  %v7542_v34 = vld [vmem:[#allocation1 + $0x9] sm:$0xff]  ;;  %3267 = vmatmul.bf16.vlgmr.msra.gmra.mxu2 %v7536_v27  ;;  %3280 = vmatmul.bf16.vlgmr.msra.gmra.mxu3 %v7540_v29  ;;  %v5037_v41 = vor.u32 %v6836_v32, %v5036_v25  ;;  %v7552_v32 = vld [vmem:[#allocation1 + $0x3f] sm:$0xff] }
  0x53   :  { %v6868_v36 = vld [vmem:[#allocation5 + $0x54c] sm:$0xf0]  ;;  %v5292_v37 = vld [vmem:[#allocation5 + $0x640] sm:$0xf]  ;;  %3254 = vmatmul.bf16.vlgmr.msra.gmra.mxu1 %v7542_v34  ;;  %3315 = vmatpush.bf16.msrb.mxu2 %v5309_v31 }
  0x54   :  { %v6900_v38 = vld [vmem:[#allocation5 + $0x64c] sm:$0xf0]  ;;  %v5420_v39 = vld [vmem:[#allocation5 + $0x740] sm:$0xf]  ;;  %v5165_v42 = vor.u32 %v6868_v36, %v5164_v33  ;;  %3328 = vmatpush.bf16.msrb.mxu3 %v5437_v35  ;;  %3290 = vmatpush.bf16.msrb.mxu0 %v5037_v41 }
  0x55   :  { %v6932_v40 = vld [vmem:[#allocation5 + $0x74c] sm:$0xf0]  ;;  %v5293_v43 = vor.u32 %v6900_v38, %v5292_v37  ;;  %v5020_v44 = vld [vmem:[#allocation5 + $0x420] sm:$0xf]  ;;  %v7554_v38 = vld [vmem:[#allocation1 + $0x2d] sm:$0xff] }
  0x56   :  { %v6832_v45 = vld [vmem:[#allocation5 + $0x42c] sm:$0xf0]  ;;  %v5148_v46 = vld [vmem:[#allocation5 + $0x520] sm:$0xf]  ;;  %v5421_v47 = vor.u32 %v6932_v40, %v5420_v39  ;;  %3303 = vmatpush.bf16.msrb.mxu1 %v5165_v42 }
  0x57   :  { %v6864_v48 = vld [vmem:[#allocation5 + $0x52c] sm:$0xf0]  ;;  %v5276_v49 = vld [vmem:[#allocation5 + $0x620] sm:$0xf]  ;;  %v5021_v53 = vor.u32 %v6832_v45, %v5020_v44  ;;  %3316 = vmatpush.bf16.msrb.mxu2 %v5293_v43 }
  0x58   :  { %v6896_v50 = vld [vmem:[#allocation5 + $0x62c] sm:$0xf0]  ;;  %v5404_v51 = vld [vmem:[#allocation5 + $0x720] sm:$0xf]  ;;  %v5149_v56 = vor.u32 %v6864_v48, %v5148_v46  ;;  %3329 = vmatpush.bf16.msrb.mxu3 %v5421_v47 }
  0x59   :  { %v6928_v52 = vld [vmem:[#allocation5 + $0x72c] sm:$0xf0]  ;;  %v5004_v54 = vld [vmem:[#allocation5 + $0x400] sm:$0xf]  ;;  %v5277_v57 = vor.u32 %v6896_v50, %v5276_v49  ;;  %3291 = vmatpush.bf16.msrb.mxu0 %v5021_v53 }
  0x5a   :  { %v6828_v55 = vld [vmem:[#allocation5 + $0x40c] sm:$0xf0]  ;;  %v5132_v58 = vld [vmem:[#allocation5 + $0x500] sm:$0xf]  ;;  %v5405_v61 = vor.u32 %v6928_v52, %v5404_v51  ;;  %3304 = vmatpush.bf16.msrb.mxu1 %v5149_v56 }
  0x5b   :  { %v6860_v59 = vld [vmem:[#allocation5 + $0x50c] sm:$0xf0]  ;;  %v5260_v60 = vld [vmem:[#allocation5 + $0x600] sm:$0xf]  ;;  %v5005_v4 = vor.u32 %v6828_v55, %v5004_v54  ;;  %3317 = vmatpush.bf16.msrb.mxu2 %v5277_v57  ;;  %v114_v57 = vld [vmem:[#allocation2 + $0x8] sm:$0xff] }
  0x5c   :  { %v6892_v62 = vld [vmem:[#allocation5 + $0x60c] sm:$0xf0]  ;;  %v5388_v63 = vld [vmem:[#allocation5 + $0x700] sm:$0xf]  ;;  %v5133_v8 = vor.u32 %v6860_v59, %v5132_v58  ;;  %3330 = vmatpush.bf16.msrb.mxu3 %v5405_v61 }
  0x5d   :  { %v6924_v0 = vld [vmem:[#allocation5 + $0x70c] sm:$0xf0]  ;;  %v5628_v1 = vld [vmem:[#allocation5 + $0x8e0] sm:$0xf]  ;;  %v5261_v9 = vor.u32 %v6892_v62, %v5260_v60  ;;  %3292 = vmatpush.bf16.msrb.mxu0 %v5005_v4 }
  0x5e   :  { %v6984_v2 = vld [vmem:[#allocation5 + $0x8ec] sm:$0xf0]  ;;  %v5756_v3 = vld [vmem:[#allocation5 + $0x9e0] sm:$0xf]  ;;  %v5389_v12 = vor.u32 %v6924_v0, %v5388_v63  ;;  %3305 = vmatpush.bf16.msrb.mxu1 %v5133_v8 }
  0x5f   :  { %v7016_v5 = vld [vmem:[#allocation5 + $0x9ec] sm:$0xf0]  ;;  %v5884_v6 = vld [vmem:[#allocation5 + $0xae0] sm:$0xf]  ;;  %v5629_v13 = vor.u32 %v6984_v2, %v5628_v1  ;;  %3318 = vmatpush.bf16.msrb.mxu2 %v5261_v9 }
  0x60   :  { %v7048_v7 = vld [vmem:[#allocation5 + $0xaec] sm:$0xf0]  ;;  %v6012_v10 = vld [vmem:[#allocation5 + $0xbe0] sm:$0xf]  ;;  %v5757_v14 = vor.u32 %v7016_v5, %v5756_v3  ;;  %3331 = vmatpush.bf16.msrb.mxu3 %v5389_v12 }
  0x61   :  { %v7080_v11 = vld [vmem:[#allocation5 + $0xbec] sm:$0xf0]  ;;  %v5885_v15 = vor.u32 %v7048_v7, %v5884_v6  ;;  %v5612_v16 = vld [vmem:[#allocation5 + $0x8c0] sm:$0xf]  ;;  %3337 = vmatpush.bf16.msra.mxu0 %v5629_v13 }
  0x62   :  { %v6980_v17 = vld [vmem:[#allocation5 + $0x8cc] sm:$0xf0]  ;;  %v5740_v18 = vld [vmem:[#allocation5 + $0x9c0] sm:$0xf]  ;;  %v6013_v19 = vor.u32 %v7080_v11, %v6012_v10  ;;  %3350 = vmatpush.bf16.msra.mxu1 %v5757_v14 }
  0x63   :  { %v7012_v20 = vld [vmem:[#allocation5 + $0x9cc] sm:$0xf0]  ;;  %v5868_v21 = vld [vmem:[#allocation5 + $0xac0] sm:$0xf]  ;;  %v5613_v26 = vor.u32 %v6980_v17, %v5612_v16  ;;  %3363 = vmatpush.bf16.msra.mxu2 %v5885_v15  ;;  %3332 = vmatmul.bf16.vlgmr.msrb.gmra.mxu3 %v7552_v32 }
  0x64   :  { %v7044_v22 = vld [vmem:[#allocation5 + $0xacc] sm:$0xf0]  ;;  %v5996_v23 = vld [vmem:[#allocation5 + $0xbc0] sm:$0xf]  ;;  %v5741_v33 = vor.u32 %v7012_v20, %v5740_v18  ;;  %3376 = vmatpush.bf16.msra.mxu3 %v6013_v19  ;;  %3306 = vmatmul.bf16.vlgmr.msrb.gmra.mxu1 %v7554_v38 }
  0x65   :  { %v7076_v24 = vld [vmem:[#allocation5 + $0xbcc] sm:$0xf0]  ;;  %v7548_v25 = vld [vmem:[#allocation1 + $0x36] sm:$0xff]  ;;  %v5869_v35 = vor.u32 %v7044_v22, %v5868_v21  ;;  %3338 = vmatpush.bf16.msra.mxu0 %v5613_v26 }
  0x66   :  { %v5596_v30 = vld [vmem:[#allocation5 + $0x8a0] sm:$0xf]  ;;  %v7550_v31 = vld [vmem:[#allocation1 + $0x24] sm:$0xff]  ;;  %v5997_v39 = vor.u32 %v7076_v24, %v5996_v23  ;;  %3319 = vmatmul.bf16.vlgmr.msrb.gmra.mxu2 %v7548_v25  ;;  %3351 = vmatpush.bf16.msra.mxu1 %v5741_v33 }
  0x67   :  { %v6976_v36 = vld [vmem:[#allocation5 + $0x8ac] sm:$0xf0]  ;;  %v5724_v37 = vld [vmem:[#allocation5 + $0x9a0] sm:$0xf]  ;;  %3293 = vmatmul.bf16.vlgmr.msrb.gmra.mxu0 %v7550_v31  ;;  %3364 = vmatpush.bf16.msra.mxu2 %v5869_v35  ;;  %648 = vst [vmem:[#allocation1] ss:$9 sm:$0xff] %v114_v57 }
  0x68   :  { %v7008_v40 = vld [vmem:[#allocation5 + $0x9ac] sm:$0xf0]  ;;  %v5852_v41 = vld [vmem:[#allocation5 + $0xaa0] sm:$0xf]  ;;  %v5597_v45 = vor.u32 %v6976_v36, %v5596_v30  ;;  %3377 = vmatpush.bf16.msra.mxu3 %v5997_v39 }
  0x69   :  { %v7040_v42 = vld [vmem:[#allocation5 + $0xaac] sm:$0xf0]  ;;  %v5980_v43 = vld [vmem:[#allocation5 + $0xba0] sm:$0xf]  ;;  %v5725_v46 = vor.u32 %v7008_v40, %v5724_v37 }
  0x6a   :  { %v7072_v44 = vld [vmem:[#allocation5 + $0xbac] sm:$0xf0]  ;;  %v5853_v47 = vor.u32 %v7040_v42, %v5852_v41  ;;  %v5580_v48 = vld [vmem:[#allocation5 + $0x880] sm:$0xf]  ;;  %3339 = vmatpush.bf16.msra.mxu0 %v5597_v45 }
  0x6b   :  { %v6972_v49 = vld [vmem:[#allocation5 + $0x88c] sm:$0xf0]  ;;  %v5708_v50 = vld [vmem:[#allocation5 + $0x980] sm:$0xf]  ;;  %v5981_v51 = vor.u32 %v7072_v44, %v5980_v43  ;;  %3352 = vmatpush.bf16.msra.mxu1 %v5725_v46 }
  0x6c   :  { %v7004_v52 = vld [vmem:[#allocation5 + $0x98c] sm:$0xf0]  ;;  %v5836_v53 = vld [vmem:[#allocation5 + $0xa80] sm:$0xf]  ;;  %v5581_v58 = vor.u32 %v6972_v49, %v5580_v48  ;;  %3365 = vmatpush.bf16.msra.mxu2 %v5853_v47 }
  0x6d   :  { %v7036_v54 = vld [vmem:[#allocation5 + $0xa8c] sm:$0xf0]  ;;  %v5964_v55 = vld [vmem:[#allocation5 + $0xb80] sm:$0xf]  ;;  %v5709_v59 = vor.u32 %v7004_v52, %v5708_v50  ;;  %3378 = vmatpush.bf16.msra.mxu3 %v5981_v51 }
  0x6e   :  { %v7068_v56 = vld [vmem:[#allocation5 + $0xb8c] sm:$0xf0]  ;;  %v5837_v60 = vor.u32 %v7036_v54, %v5836_v53  ;;  %v5564_v61 = vld [vmem:[#allocation5 + $0x860] sm:$0xf]  ;;  %3340 = vmatpush.bf16.msra.mxu0 %v5581_v58 }
  0x6f   :  { %v6968_v62 = vld [vmem:[#allocation5 + $0x86c] sm:$0xf0]  ;;  %v5692_v63 = vld [vmem:[#allocation5 + $0x960] sm:$0xf]  ;;  %v5965_v0 = vor.u32 %v7068_v56, %v5964_v55  ;;  %3353 = vmatpush.bf16.msra.mxu1 %v5709_v59 }
  0x70   :  { %v7000_v1 = vld [vmem:[#allocation5 + $0x96c] sm:$0xf0]  ;;  %v5820_v2 = vld [vmem:[#allocation5 + $0xa60] sm:$0xf]  ;;  %v5565_v6 = vor.u32 %v6968_v62, %v5564_v61  ;;  %3366 = vmatpush.bf16.msra.mxu2 %v5837_v60 }
  0x71   :  { %v7032_v3 = vld [vmem:[#allocation5 + $0xa6c] sm:$0xf0]  ;;  %v5948_v4 = vld [vmem:[#allocation5 + $0xb60] sm:$0xf]  ;;  %v5693_v7 = vor.u32 %v7000_v1, %v5692_v63  ;;  %3379 = vmatpush.bf16.msra.mxu3 %v5965_v0 }
  0x72   :  { %v7064_v5 = vld [vmem:[#allocation5 + $0xb6c] sm:$0xf0]  ;;  %v5821_v8 = vor.u32 %v7032_v3, %v5820_v2  ;;  %v5548_v9 = vld [vmem:[#allocation5 + $0x840] sm:$0xf]  ;;  %3341 = vmatpush.bf16.msra.mxu0 %v5565_v6 }
  0x73   :  { %v6964_v10 = vld [vmem:[#allocation5 + $0x84c] sm:$0xf0]  ;;  %v5676_v11 = vld [vmem:[#allocation5 + $0x940] sm:$0xf]  ;;  %v5949_v12 = vor.u32 %v7064_v5, %v5948_v4  ;;  %3354 = vmatpush.bf16.msra.mxu1 %v5693_v7 }
  0x74   :  { %v6996_v13 = vld [vmem:[#allocation5 + $0x94c] sm:$0xf0]  ;;  %v5804_v14 = vld [vmem:[#allocation5 + $0xa40] sm:$0xf]  ;;  %v5549_v18 = vor.u32 %v6964_v10, %v5548_v9  ;;  %3367 = vmatpush.bf16.msra.mxu2 %v5821_v8  ;;  %v649_v8 = vld [vmem:[#allocation1] sm:$0xff] }
  0x75   :  { %v7028_v15 = vld [vmem:[#allocation5 + $0xa4c] sm:$0xf0]  ;;  %v5932_v16 = vld [vmem:[#allocation5 + $0xb40] sm:$0xf]  ;;  %v5677_v19 = vor.u32 %v6996_v13, %v5676_v11  ;;  %3380 = vmatpush.bf16.msra.mxu3 %v5949_v12 }
  0x76   :  { %v7060_v17 = vld [vmem:[#allocation5 + $0xb4c] sm:$0xf0]  ;;  %v5805_v20 = vor.u32 %v7028_v15, %v5804_v14  ;;  %v5532_v21 = vld [vmem:[#allocation5 + $0x820] sm:$0xf]  ;;  %3342 = vmatpush.bf16.msra.mxu0 %v5549_v18 }
  0x77   :  { %v6960_v22 = vld [vmem:[#allocation5 + $0x82c] sm:$0xf0]  ;;  %v5660_v23 = vld [vmem:[#allocation5 + $0x920] sm:$0xf]  ;;  %v5933_v24 = vor.u32 %v7060_v17, %v5932_v16  ;;  %3355 = vmatpush.bf16.msra.mxu1 %v5677_v19 }
  0x78   :  { %v6992_v26 = vld [vmem:[#allocation5 + $0x92c] sm:$0xf0]  ;;  %v5788_v30 = vld [vmem:[#allocation5 + $0xa20] sm:$0xf]  ;;  %v5533_v37 = vor.u32 %v6960_v22, %v5532_v21  ;;  %3368 = vmatpush.bf16.msra.mxu2 %v5805_v20 }
  0x79   :  { %v7024_v33 = vld [vmem:[#allocation5 + $0xa2c] sm:$0xf0]  ;;  %v5916_v35 = vld [vmem:[#allocation5 + $0xb20] sm:$0xf]  ;;  %v5661_v41 = vor.u32 %v6992_v26, %v5660_v23  ;;  %3381 = vmatpush.bf16.msra.mxu3 %v5933_v24 }
  0x7a   :  { %v7056_v36 = vld [vmem:[#allocation5 + $0xb2c] sm:$0xf0]  ;;  %v5516_v39 = vld [vmem:[#allocation5 + $0x800] sm:$0xf]  ;;  %v5789_v42 = vor.u32 %v7024_v33, %v5788_v30  ;;  %3343 = vmatpush.bf16.msra.mxu0 %v5533_v37 }
  0x7b   :  { %v6956_v40 = vld [vmem:[#allocation5 + $0x80c] sm:$0xf0]  ;;  %v5644_v43 = vld [vmem:[#allocation5 + $0x900] sm:$0xf]  ;;  %v5917_v46 = vor.u32 %v7056_v36, %v5916_v35  ;;  %3356 = vmatpush.bf16.msra.mxu1 %v5661_v41 }
  0x7c   :  { %v6988_v44 = vld [vmem:[#allocation5 + $0x90c] sm:$0xf0]  ;;  %v5772_v45 = vld [vmem:[#allocation5 + $0xa00] sm:$0xf]  ;;  %v5517_v53 = vor.u32 %v6956_v40, %v5516_v39  ;;  %3369 = vmatpush.bf16.msra.mxu2 %v5789_v42 }
  0x7d   :  { %v7020_v47 = vld [vmem:[#allocation5 + $0xa0c] sm:$0xf0]  ;;  %v5900_v48 = vld [vmem:[#allocation5 + $0xb00] sm:$0xf]  ;;  %v5645_v57 = vor.u32 %v6988_v44, %v5644_v43  ;;  %3382 = vmatpush.bf16.msra.mxu3 %v5917_v46 }
  0x7e   :  { %v7052_v49 = vld [vmem:[#allocation5 + $0xb0c] sm:$0xf0]  ;;  %v6140_v50 = vld [vmem:[#allocation5 + $0xce0] sm:$0xf]  ;;  %v5773_v58 = vor.u32 %v7020_v47, %v5772_v45  ;;  %3344 = vmatpush.bf16.msra.mxu0 %v5517_v53 }
  0x7f   :  { %v7112_v51 = vld [vmem:[#allocation5 + $0xcec] sm:$0xf0]  ;;  %v6268_v52 = vld [vmem:[#allocation5 + $0xde0] sm:$0xf]  ;;  %v5901_v61 = vor.u32 %v7052_v49, %v5900_v48  ;;  %3357 = vmatpush.bf16.msra.mxu1 %v5645_v57 }
  0x80   :  { %v7144_v54 = vld [vmem:[#allocation5 + $0xdec] sm:$0xf0]  ;;  %v6396_v55 = vld [vmem:[#allocation5 + $0xee0] sm:$0xf]  ;;  %v6141_v62 = vor.u32 %v7112_v51, %v6140_v50  ;;  %3370 = vmatpush.bf16.msra.mxu2 %v5773_v58 }
  0x81   :  { %v7176_v56 = vld [vmem:[#allocation5 + $0xeec] sm:$0xf0]  ;;  %v6524_v59 = vld [vmem:[#allocation5 + $0xfe0] sm:$0xf]  ;;  %v6269_v63 = vor.u32 %v7144_v54, %v6268_v52  ;;  %3383 = vmatpush.bf16.msra.mxu3 %v5901_v61  ;;  %3345 = vmatmul.bf16.vlgmr.msra.gmra.mxu0 %v649_v8 }
  0x82   :  { %v7208_v60 = vld [vmem:[#allocation5 + $0xfec] sm:$0xf0]  ;;  %v6397_v0 = vor.u32 %v7176_v56, %v6396_v55  ;;  %v6124_v1 = vld [vmem:[#allocation5 + $0xcc0] sm:$0xf]  ;;  %3389 = vmatpush.bf16.msrb.mxu0 %v6141_v62 }
  0x83   :  { %v7108_v2 = vld [vmem:[#allocation5 + $0xccc] sm:$0xf0]  ;;  %v6252_v3 = vld [vmem:[#allocation5 + $0xdc0] sm:$0xf]  ;;  %v6525_v4 = vor.u32 %v7208_v60, %v6524_v59  ;;  %3402 = vmatpush.bf16.msrb.mxu1 %v6269_v63 }
  0x84   :  { %v7140_v5 = vld [vmem:[#allocation5 + $0xdcc] sm:$0xf0]  ;;  %v6380_v6 = vld [vmem:[#allocation5 + $0xec0] sm:$0xf]  ;;  %v6125_v13 = vor.u32 %v7108_v2, %v6124_v1  ;;  %3415 = vmatpush.bf16.msrb.mxu2 %v6397_v0 }
  0x85   :  { %v7172_v7 = vld [vmem:[#allocation5 + $0xecc] sm:$0xf0]  ;;  %v6508_v9 = vld [vmem:[#allocation5 + $0xfc0] sm:$0xf]  ;;  %v6253_v16 = vor.u32 %v7140_v5, %v6252_v3  ;;  %3428 = vmatpush.bf16.msrb.mxu3 %v6525_v4 }
  0x86   :  { %v7204_v10 = vld [vmem:[#allocation5 + $0xfcc] sm:$0xf0]  ;;  %v651_v11 = vld [vmem:[#allocation1 + $0x12] sm:$0xff]  ;;  %v652_v15 = vld [vmem:[#allocation1 + $0x1b] sm:$0xff]  ;;  %v6381_v17 = vor.u32 %v7172_v7, %v6380_v6  ;;  %3390 = vmatpush.bf16.msrb.mxu0 %v6125_v13 }
  0x87   :  { %v650_v12 = vld [vmem:[#allocation1 + $0x9] sm:$0xff]  ;;  %v6108_v14 = vld [vmem:[#allocation5 + $0xca0] sm:$0xf]  ;;  %v6509_v20 = vor.u32 %v7204_v10, %v6508_v9  ;;  %3371 = vmatmul.bf16.vlgmr.msra.gmra.mxu2 %v651_v11  ;;  %3384 = vmatmul.bf16.vlgmr.msra.gmra.mxu3 %v652_v15 }
  0x88   :  { %v7104_v18 = vld [vmem:[#allocation5 + $0xcac] sm:$0xf0]  ;;  %v6236_v19 = vld [vmem:[#allocation5 + $0xda0] sm:$0xf]  ;;  %3358 = vmatmul.bf16.vlgmr.msra.gmra.mxu1 %v650_v12  ;;  %3416 = vmatpush.bf16.msrb.mxu2 %v6381_v17 }
  0x89   :  { %v7136_v21 = vld [vmem:[#allocation5 + $0xdac] sm:$0xf0]  ;;  %v6364_v22 = vld [vmem:[#allocation5 + $0xea0] sm:$0xf]  ;;  %v6109_v30 = vor.u32 %v7104_v18, %v6108_v14  ;;  %3403 = vmatpush.bf16.msrb.mxu1 %v6253_v16  ;;  %3429 = vmatpush.bf16.msrb.mxu3 %v6509_v20 }
  0x8a   :  { %v7168_v23 = vld [vmem:[#allocation5 + $0xeac] sm:$0xf0]  ;;  %v6492_v24 = vld [vmem:[#allocation5 + $0xfa0] sm:$0xf]  ;;  %v6237_v35 = vor.u32 %v7136_v21, %v6236_v19 }
  0x8b   :  { %v7200_v26 = vld [vmem:[#allocation5 + $0xfac] sm:$0xf0]  ;;  %v6092_v33 = vld [vmem:[#allocation5 + $0xc80] sm:$0xf]  ;;  %v6365_v36 = vor.u32 %v7168_v23, %v6364_v22  ;;  %3391 = vmatpush.bf16.msrb.mxu0 %v6109_v30 }
  0x8c   :  { %v7100_v37 = vld [vmem:[#allocation5 + $0xc8c] sm:$0xf0]  ;;  %v6220_v39 = vld [vmem:[#allocation5 + $0xd80] sm:$0xf]  ;;  %v6493_v41 = vor.u32 %v7200_v26, %v6492_v24 }
  0x8d   :  { %v7132_v40 = vld [vmem:[#allocation5 + $0xd8c] sm:$0xf0]  ;;  %v6348_v42 = vld [vmem:[#allocation5 + $0xe80] sm:$0xf]  ;;  %v6093_v46 = vor.u32 %v7100_v37, %v6092_v33  ;;  %3404 = vmatpush.bf16.msrb.mxu1 %v6237_v35  ;;  %3417 = vmatpush.bf16.msrb.mxu2 %v6365_v36  ;;  %v6726_v37 = vld [vmem:[#allocation5 + $0xe4] sm:$0xf] }
  0x8e   :  { %v7164_v43 = vld [vmem:[#allocation5 + $0xe8c] sm:$0xf0]  ;;  %v6476_v44 = vld [vmem:[#allocation5 + $0xf80] sm:$0xf]  ;;  %v6221_v47 = vor.u32 %v7132_v40, %v6220_v39  ;;  %3430 = vmatpush.bf16.msrb.mxu3 %v6493_v41  ;;  %v4606_v39 = vld [vmem:[#allocation5 + $0xf0] sm:$0xf0] }
  0x8f   :  { %v7196_v45 = vld [vmem:[#allocation5 + $0xf8c] sm:$0xf0]  ;;  %v6349_v48 = vor.u32 %v7164_v43, %v6348_v42  ;;  %v6076_v49 = vld [vmem:[#allocation5 + $0xc60] sm:$0xf]  ;;  %3392 = vmatpush.bf16.msrb.mxu0 %v6093_v46  ;;  %v6758_v40 = vld [vmem:[#allocation5 + $0x1e4] sm:$0xf] }
  0x90   :  { %v7096_v50 = vld [vmem:[#allocation5 + $0xc6c] sm:$0xf0]  ;;  %v6204_v51 = vld [vmem:[#allocation5 + $0xd60] sm:$0xf]  ;;  %v6477_v52 = vor.u32 %v7196_v45, %v6476_v44  ;;  %v4734_v42 = vld [vmem:[#allocation5 + $0x1f0] sm:$0xf0] }
  0x91   :  { %v7128_v53 = vld [vmem:[#allocation5 + $0xd6c] sm:$0xf0]  ;;  %v6332_v54 = vld [vmem:[#allocation5 + $0xe60] sm:$0xf]  ;;  %v6077_v58 = vor.u32 %v7096_v50, %v6076_v49  ;;  %3405 = vmatpush.bf16.msrb.mxu1 %v6221_v47  ;;  %3418 = vmatpush.bf16.msrb.mxu2 %v6349_v48  ;;  %v6790_v43 = vld [vmem:[#allocation5 + $0x2e4] sm:$0xf]  ;;  %v4609_v50 = vor.u32 %v6726_v37, %v4606_v39 }
  0x92   :  { %v7160_v55 = vld [vmem:[#allocation5 + $0xe6c] sm:$0xf0]  ;;  %v6460_v56 = vld [vmem:[#allocation5 + $0xf60] sm:$0xf]  ;;  %v6205_v59 = vor.u32 %v7128_v53, %v6204_v51  ;;  %3431 = vmatpush.bf16.msrb.mxu3 %v6477_v52  ;;  %v4862_v44 = vld [vmem:[#allocation5 + $0x2f0] sm:$0xf0]  ;;  %v4737_v51 = vor.u32 %v6758_v40, %v4734_v42 }
  0x93   :  { %v7192_v57 = vld [vmem:[#allocation5 + $0xf6c] sm:$0xf0]  ;;  %v6333_v60 = vor.u32 %v7160_v55, %v6332_v54  ;;  %v6060_v61 = vld [vmem:[#allocation5 + $0xc40] sm:$0xf]  ;;  %3393 = vmatpush.bf16.msrb.mxu0 %v6077_v58  ;;  %v6822_v47 = vld [vmem:[#allocation5 + $0x3e4] sm:$0xf]  ;;  %v4865_v52 = vor.u32 %v6790_v43, %v4862_v44 }
  0x94   :  { %v7092_v62 = vld [vmem:[#allocation5 + $0xc4c] sm:$0xf0]  ;;  %v6188_v63 = vld [vmem:[#allocation5 + $0xd40] sm:$0xf]  ;;  %v6461_v0 = vor.u32 %v7192_v57, %v6460_v56  ;;  %v4990_v48 = vld [vmem:[#allocation5 + $0x3f0] sm:$0xf0] }
  0x95   :  { %v7124_v1 = vld [vmem:[#allocation5 + $0xd4c] sm:$0xf0]  ;;  %v6316_v2 = vld [vmem:[#allocation5 + $0xe40] sm:$0xf]  ;;  %v6061_v6 = vor.u32 %v7092_v62, %v6060_v61  ;;  %3406 = vmatpush.bf16.msrb.mxu1 %v6205_v59  ;;  %3419 = vmatpush.bf16.msrb.mxu2 %v6333_v60  ;;  %v6722_v53 = vld [vmem:[#allocation5 + $0xc4] sm:$0xf]  ;;  %v4993_v56 = vor.u32 %v6822_v47, %v4990_v48 }
  0x96   :  { %v7156_v3 = vld [vmem:[#allocation5 + $0xe4c] sm:$0xf0]  ;;  %v6444_v4 = vld [vmem:[#allocation5 + $0xf40] sm:$0xf]  ;;  %v6189_v7 = vor.u32 %v7124_v1, %v6188_v63  ;;  %3432 = vmatpush.bf16.msrb.mxu3 %v6461_v0  ;;  %v4590_v54 = vld [vmem:[#allocation5 + $0xd0] sm:$0xf0] }
  0x97   :  { %v7188_v5 = vld [vmem:[#allocation5 + $0xf4c] sm:$0xf0]  ;;  %v6317_v8 = vor.u32 %v7156_v3, %v6316_v2  ;;  %v6044_v9 = vld [vmem:[#allocation5 + $0xc20] sm:$0xf]  ;;  %3394 = vmatpush.bf16.msrb.mxu0 %v6061_v6  ;;  %v6754_v55 = vld [vmem:[#allocation5 + $0x1c4] sm:$0xf]  ;;  %v4593_v2 = vor.u32 %v6722_v53, %v4590_v54 }
  0x98   :  { %v7088_v10 = vld [vmem:[#allocation5 + $0xc2c] sm:$0xf0]  ;;  %v6172_v11 = vld [vmem:[#allocation5 + $0xd20] sm:$0xf]  ;;  %v6445_v12 = vor.u32 %v7188_v5, %v6444_v4  ;;  %v4718_v57 = vld [vmem:[#allocation5 + $0x1d0] sm:$0xf0] }
  0x99   :  { %v7120_v13 = vld [vmem:[#allocation5 + $0xd2c] sm:$0xf0]  ;;  %v6300_v14 = vld [vmem:[#allocation5 + $0xe20] sm:$0xf]  ;;  %v6045_v18 = vor.u32 %v7088_v10, %v6044_v9  ;;  %3407 = vmatpush.bf16.msrb.mxu1 %v6189_v7  ;;  %3420 = vmatpush.bf16.msrb.mxu2 %v6317_v8  ;;  %v6786_v58 = vld [vmem:[#allocation5 + $0x2c4] sm:$0xf]  ;;  %v4721_v3 = vor.u32 %v6754_v55, %v4718_v57 }
  0x9a   :  { %v7152_v15 = vld [vmem:[#allocation5 + $0xe2c] sm:$0xf0]  ;;  %v6428_v16 = vld [vmem:[#allocation5 + $0xf20] sm:$0xf]  ;;  %v6173_v21 = vor.u32 %v7120_v13, %v6172_v11  ;;  %3433 = vmatpush.bf16.msrb.mxu3 %v6445_v12  ;;  %v4846_v59 = vld [vmem:[#allocation5 + $0x2d0] sm:$0xf0] }
  0x9b   :  { %v7184_v17 = vld [vmem:[#allocation5 + $0xf2c] sm:$0xf0]  ;;  %v6028_v19 = vld [vmem:[#allocation5 + $0xc00] sm:$0xf]  ;;  %v6301_v22 = vor.u32 %v7152_v15, %v6300_v14  ;;  %3395 = vmatpush.bf16.msrb.mxu0 %v6045_v18  ;;  %v6818_v61 = vld [vmem:[#allocation5 + $0x3c4] sm:$0xf]  ;;  %v4849_v4 = vor.u32 %v6786_v58, %v4846_v59 }
  0x9c   :  { %v7084_v20 = vld [vmem:[#allocation5 + $0xc0c] sm:$0xf0]  ;;  %v6156_v23 = vld [vmem:[#allocation5 + $0xd00] sm:$0xf]  ;;  %v6429_v30 = vor.u32 %v7184_v17, %v6428_v16  ;;  %v4974_v62 = vld [vmem:[#allocation5 + $0x3d0] sm:$0xf0] }
  0x9d   :  { %v7116_v24 = vld [vmem:[#allocation5 + $0xd0c] sm:$0xf0]  ;;  %v6284_v26 = vld [vmem:[#allocation5 + $0xe00] sm:$0xf]  ;;  %v6029_v41 = vor.u32 %v7084_v20, %v6028_v19  ;;  %3408 = vmatpush.bf16.msrb.mxu1 %v6173_v21  ;;  %3421 = vmatpush.bf16.msrb.mxu2 %v6301_v22  ;;  %v654_v0 = vld [vmem:[#allocation1 + $0x2d] sm:$0xff]  ;;  %v4977_v8 = vor.u32 %v6818_v61, %v4974_v62 }
  0x9e   :  { %v7148_v33 = vld [vmem:[#allocation5 + $0xe0c] sm:$0xf0]  ;;  %v6412_v35 = vld [vmem:[#allocation5 + $0xf00] sm:$0xf]  ;;  %v6157_v45 = vor.u32 %v7116_v24, %v6156_v23  ;;  %3434 = vmatpush.bf16.msrb.mxu3 %v6429_v30  ;;  %v656_v1 = vld [vmem:[#allocation1 + $0x3f] sm:$0xff] }
  0x9f   :  { %v7180_v36 = vld [vmem:[#allocation5 + $0xf0c] sm:$0xf0]  ;;  %v6285_v46 = vor.u32 %v7148_v33, %v6284_v26  ;;  %3396 = vmatpush.bf16.msrb.mxu0 %v6029_v41  ;;  %v655_v63 = vld [vmem:[#allocation1 + $0x36] sm:$0xff]  ;;  %v4574_v6 = vld [vmem:[#allocation5 + $0xb0] sm:$0xf0] }
  0xa0   :  { %v6413_v49 = vor.u32 %v7180_v36, %v6412_v35  ;;  %v653_v60 = vld [vmem:[#allocation1 + $0x24] sm:$0xff]  ;;  %v6718_v5 = vld [vmem:[#allocation5 + $0xa4] sm:$0xf]  ;;  %v4702_v9 = vld [vmem:[#allocation5 + $0x1b0] sm:$0xf0] }
  0xa1   :  { %3409 = vmatpush.bf16.msrb.mxu1 %v6157_v45  ;;  %3422 = vmatpush.bf16.msrb.mxu2 %v6285_v46  ;;  %v6750_v7 = vld [vmem:[#allocation5 + $0x1a4] sm:$0xf]  ;;  %v4830_v11 = vld [vmem:[#allocation5 + $0x2b0] sm:$0xf0]  ;;  %v4577_v14 = vor.u32 %v6718_v5, %v4574_v6 }
  0xa2   :  { %3435 = vmatpush.bf16.msrb.mxu3 %v6413_v49  ;;  %3397 = vmatmul.bf16.vlgmr.msrb.gmra.mxu0 %v653_v60  ;;  %v6782_v10 = vld [vmem:[#allocation5 + $0x2a4] sm:$0xf]  ;;  %v4958_v13 = vld [vmem:[#allocation5 + $0x3b0] sm:$0xf0]  ;;  %v4705_v15 = vor.u32 %v6750_v7, %v4702_v9 }
  0xa3   :  { %3441 = vmatpush.bf16.msra.mxu0 %v4609_v50  ;;  %v6814_v12 = vld [vmem:[#allocation5 + $0x3a4] sm:$0xf]  ;;  %v4833_v16 = vor.u32 %v6782_v10, %v4830_v11  ;;  %v4558_v18 = vld [vmem:[#allocation5 + $0x90] sm:$0xf0] }
  0xa4   :  { %3423 = vmatmul.bf16.vlgmr.msrb.gmra.mxu2 %v655_v63  ;;  %3410 = vmatmul.bf16.vlgmr.msrb.gmra.mxu1 %v654_v0  ;;  %v6714_v17 = vld [vmem:[#allocation5 + $0x84] sm:$0xf]  ;;  %v4961_v20 = vor.u32 %v6814_v12, %v4958_v13  ;;  %v4686_v21 = vld [vmem:[#allocation5 + $0x190] sm:$0xf0] }
  0xa5   :  { %3454 = vmatpush.bf16.msra.mxu1 %v4737_v51  ;;  %3467 = vmatpush.bf16.msra.mxu2 %v4865_v52  ;;  %v6746_v19 = vld [vmem:[#allocation5 + $0x184] sm:$0xf]  ;;  %v4814_v23 = vld [vmem:[#allocation5 + $0x290] sm:$0xf0]  ;;  %v4561_v30 = vor.u32 %v6714_v17, %v4558_v18 }
  0xa6   :  { %3480 = vmatpush.bf16.msra.mxu3 %v4993_v56  ;;  %v6778_v22 = vld [vmem:[#allocation5 + $0x284] sm:$0xf]  ;;  %v4942_v26 = vld [vmem:[#allocation5 + $0x390] sm:$0xf0]  ;;  %v4689_v33 = vor.u32 %v6746_v19, %v4686_v21 }
  0xa7   :  { %3436 = vmatmul.bf16.vlgmr.msrb.gmra.mxu3 %v656_v1  ;;  %3442 = vmatpush.bf16.msra.mxu0 %v4593_v2  ;;  %v6810_v24 = vld [vmem:[#allocation5 + $0x384] sm:$0xf]  ;;  %v4817_v35 = vor.u32 %v6778_v22, %v4814_v23  ;;  %v4542_v37 = vld [vmem:[#allocation5 + $0x70] sm:$0xf0] }
  0xa8   :  { %v6710_v36 = vld [vmem:[#allocation5 + $0x64] sm:$0xf]  ;;  %v4945_v40 = vor.u32 %v6810_v24, %v4942_v26  ;;  %v4670_v41 = vld [vmem:[#allocation5 + $0x170] sm:$0xf0] }
  0xa9   :  { %3455 = vmatpush.bf16.msra.mxu1 %v4721_v3  ;;  %3468 = vmatpush.bf16.msra.mxu2 %v4849_v4  ;;  %v6742_v39 = vld [vmem:[#allocation5 + $0x164] sm:$0xf]  ;;  %v4798_v43 = vld [vmem:[#allocation5 + $0x270] sm:$0xf0]  ;;  %v4545_v46 = vor.u32 %v6710_v36, %v4542_v37 }
  0xaa   :  { %3481 = vmatpush.bf16.msra.mxu3 %v4977_v8  ;;  %v6774_v42 = vld [vmem:[#allocation5 + $0x264] sm:$0xf]  ;;  %v4926_v45 = vld [vmem:[#allocation5 + $0x370] sm:$0xf0]  ;;  %v4673_v47 = vor.u32 %v6742_v39, %v4670_v41 }
  0xab   :  { %3443 = vmatpush.bf16.msra.mxu0 %v4577_v14  ;;  %v6806_v44 = vld [vmem:[#allocation5 + $0x364] sm:$0xf]  ;;  %v4801_v48 = vor.u32 %v6774_v42, %v4798_v43  ;;  %v4526_v50 = vld [vmem:[#allocation5 + $0x50] sm:$0xf0] }
  0xac   :  { %v6706_v49 = vld [vmem:[#allocation5 + $0x44] sm:$0xf]  ;;  %v4929_v52 = vor.u32 %v6806_v44, %v4926_v45  ;;  %v4654_v53 = vld [vmem:[#allocation5 + $0x150] sm:$0xf0] }
  0xad   :  { %3456 = vmatpush.bf16.msra.mxu1 %v4705_v15  ;;  %3469 = vmatpush.bf16.msra.mxu2 %v4833_v16  ;;  %v6738_v51 = vld [vmem:[#allocation5 + $0x144] sm:$0xf]  ;;  %v4782_v55 = vld [vmem:[#allocation5 + $0x250] sm:$0xf0]  ;;  %v4529_v58 = vor.u32 %v6706_v49, %v4526_v50 }
  0xae   :  { %3482 = vmatpush.bf16.msra.mxu3 %v4961_v20  ;;  %v6770_v54 = vld [vmem:[#allocation5 + $0x244] sm:$0xf]  ;;  %v4910_v57 = vld [vmem:[#allocation5 + $0x350] sm:$0xf0]  ;;  %v4657_v59 = vor.u32 %v6738_v51, %v4654_v53 }
  0xaf   :  { %3444 = vmatpush.bf16.msra.mxu0 %v4561_v30  ;;  %v6802_v56 = vld [vmem:[#allocation5 + $0x344] sm:$0xf]  ;;  %v4785_v60 = vor.u32 %v6770_v54, %v4782_v55  ;;  %v4510_v62 = vld [vmem:[#allocation5 + $0x30] sm:$0xf0] }
  0xb0   :  { %v6702_v61 = vld [vmem:[#allocation5 + $0x24] sm:$0xf]  ;;  %v4913_v0 = vor.u32 %v6802_v56, %v4910_v57  ;;  %v4638_v1 = vld [vmem:[#allocation5 + $0x130] sm:$0xf0] }
  0xb1   :  { %3457 = vmatpush.bf16.msra.mxu1 %v4689_v33  ;;  %3470 = vmatpush.bf16.msra.mxu2 %v4817_v35  ;;  %v6734_v63 = vld [vmem:[#allocation5 + $0x124] sm:$0xf]  ;;  %v4766_v3 = vld [vmem:[#allocation5 + $0x230] sm:$0xf0]  ;;  %v4513_v6 = vor.u32 %v6702_v61, %v4510_v62 }
  0xb2   :  { %3483 = vmatpush.bf16.msra.mxu3 %v4945_v40  ;;  %v6766_v2 = vld [vmem:[#allocation5 + $0x224] sm:$0xf]  ;;  %v4894_v5 = vld [vmem:[#allocation5 + $0x330] sm:$0xf0]  ;;  %v4641_v9 = vor.u32 %v6734_v63, %v4638_v1 }
  0xb3   :  { %3445 = vmatpush.bf16.msra.mxu0 %v4545_v46  ;;  %v6798_v4 = vld [vmem:[#allocation5 + $0x324] sm:$0xf]  ;;  %v4494_v8 = vld [vmem:[#allocation5 + $0x10] sm:$0xf0]  ;;  %v4769_v10 = vor.u32 %v6766_v2, %v4766_v3 }
  0xb4   :  { %v6698_v7 = vld [vmem:[#allocation5 + $0x4] sm:$0xf]  ;;  %v4622_v12 = vld [vmem:[#allocation5 + $0x110] sm:$0xf0]  ;;  %v4897_v14 = vor.u32 %v6798_v4, %v4894_v5 }
  0xb5   :  { %3458 = vmatpush.bf16.msra.mxu1 %v4673_v47  ;;  %3471 = vmatpush.bf16.msra.mxu2 %v4801_v48  ;;  %v6730_v11 = vld [vmem:[#allocation5 + $0x104] sm:$0xf]  ;;  %v4750_v15 = vld [vmem:[#allocation5 + $0x210] sm:$0xf0]  ;;  %v4497_v21 = vor.u32 %v6698_v7, %v4494_v8 }
  0xb6   :  { %3484 = vmatpush.bf16.msra.mxu3 %v4929_v52  ;;  %v6762_v13 = vld [vmem:[#allocation5 + $0x204] sm:$0xf]  ;;  %v4878_v17 = vld [vmem:[#allocation5 + $0x310] sm:$0xf0]  ;;  %v4625_v26 = vor.u32 %v6730_v11, %v4622_v12 }
  0xb7   :  { %3446 = vmatpush.bf16.msra.mxu0 %v4529_v58  ;;  %v6794_v16 = vld [vmem:[#allocation5 + $0x304] sm:$0xf]  ;;  %v5118_v19 = vld [vmem:[#allocation5 + $0x4f0] sm:$0xf0]  ;;  %v4753_v30 = vor.u32 %v6762_v13, %v4750_v15 }
  0xb8   :  { %v6854_v18 = vld [vmem:[#allocation5 + $0x4e4] sm:$0xf]  ;;  %v5246_v22 = vld [vmem:[#allocation5 + $0x5f0] sm:$0xf0]  ;;  %v4881_v36 = vor.u32 %v6794_v16, %v4878_v17 }
  0xb9   :  { %3459 = vmatpush.bf16.msra.mxu1 %v4657_v59  ;;  %3472 = vmatpush.bf16.msra.mxu2 %v4785_v60  ;;  %v6886_v20 = vld [vmem:[#allocation5 + $0x5e4] sm:$0xf]  ;;  %v5374_v24 = vld [vmem:[#allocation5 + $0x6f0] sm:$0xf0]  ;;  %v5121_v37 = vor.u32 %v6854_v18, %v5118_v19 }
  0xba   :  { %3485 = vmatpush.bf16.msra.mxu3 %v4913_v0  ;;  %v6918_v23 = vld [vmem:[#allocation5 + $0x6e4] sm:$0xf]  ;;  %v5502_v35 = vld [vmem:[#allocation5 + $0x7f0] sm:$0xf0]  ;;  %v5249_v39 = vor.u32 %v6886_v20, %v5246_v22 }
  0xbb   :  { %3447 = vmatpush.bf16.msra.mxu0 %v4513_v6  ;;  %v6950_v33 = vld [vmem:[#allocation5 + $0x7e4] sm:$0xf]  ;;  %v5377_v40 = vor.u32 %v6918_v23, %v5374_v24  ;;  %v5102_v42 = vld [vmem:[#allocation5 + $0x4d0] sm:$0xf0] }
  0xbc   :  { %v6850_v41 = vld [vmem:[#allocation5 + $0x4c4] sm:$0xf]  ;;  %v5505_v44 = vor.u32 %v6950_v33, %v5502_v35  ;;  %v5230_v45 = vld [vmem:[#allocation5 + $0x5d0] sm:$0xf0] }
  0xbd   :  { %3460 = vmatpush.bf16.msra.mxu1 %v4641_v9  ;;  %3473 = vmatpush.bf16.msra.mxu2 %v4769_v10  ;;  %v6882_v43 = vld [vmem:[#allocation5 + $0x5c4] sm:$0xf]  ;;  %v5358_v47 = vld [vmem:[#allocation5 + $0x6d0] sm:$0xf0]  ;;  %v5105_v50 = vor.u32 %v6850_v41, %v5102_v42 }
  0xbe   :  { %3486 = vmatpush.bf16.msra.mxu3 %v4897_v14  ;;  %v6914_v46 = vld [vmem:[#allocation5 + $0x6c4] sm:$0xf]  ;;  %v5486_v49 = vld [vmem:[#allocation5 + $0x7d0] sm:$0xf0]  ;;  %v5233_v51 = vor.u32 %v6882_v43, %v5230_v45 }
  0xbf   :  { %3448 = vmatpush.bf16.msra.mxu0 %v4497_v21  ;;  %v6946_v48 = vld [vmem:[#allocation5 + $0x7c4] sm:$0xf]  ;;  %v5361_v52 = vor.u32 %v6914_v46, %v5358_v47  ;;  %v5086_v54 = vld [vmem:[#allocation5 + $0x4b0] sm:$0xf0] }
  0xc0   :  { %v6846_v53 = vld [vmem:[#allocation5 + $0x4a4] sm:$0xf]  ;;  %v5489_v56 = vor.u32 %v6946_v48, %v5486_v49  ;;  %v5214_v57 = vld [vmem:[#allocation5 + $0x5b0] sm:$0xf0] }
  0xc1   :  { %3461 = vmatpush.bf16.msra.mxu1 %v4625_v26  ;;  %3474 = vmatpush.bf16.msra.mxu2 %v4753_v30  ;;  %v6878_v55 = vld [vmem:[#allocation5 + $0x5a4] sm:$0xf]  ;;  %v5342_v59 = vld [vmem:[#allocation5 + $0x6b0] sm:$0xf0]  ;;  %v5089_v62 = vor.u32 %v6846_v53, %v5086_v54 }
  0xc2   :  { %3487 = vmatpush.bf16.msra.mxu3 %v4881_v36  ;;  %v6910_v58 = vld [vmem:[#allocation5 + $0x6a4] sm:$0xf]  ;;  %v5470_v61 = vld [vmem:[#allocation5 + $0x7b0] sm:$0xf0]  ;;  %3449 = vmatmul.bf16.vlgmr.msra.gmra.mxu0 %v7538_v28  ;;  %v5217_v63 = vor.u32 %v6878_v55, %v5214_v57 }
  0xc3   :  { %3493 = vmatpush.bf16.msrb.mxu0 %v5121_v37  ;;  %v6942_v60 = vld [vmem:[#allocation5 + $0x7a4] sm:$0xf]  ;;  %v5345_v0 = vor.u32 %v6910_v58, %v5342_v59  ;;  %v5070_v2 = vld [vmem:[#allocation5 + $0x490] sm:$0xf0] }
  0xc4   :  { %3475 = vmatmul.bf16.vlgmr.msra.gmra.mxu2 %v7536_v27  ;;  %3462 = vmatmul.bf16.vlgmr.msra.gmra.mxu1 %v7542_v34  ;;  %v6842_v1 = vld [vmem:[#allocation5 + $0x484] sm:$0xf]  ;;  %v5473_v4 = vor.u32 %v6942_v60, %v5470_v61  ;;  %v5198_v5 = vld [vmem:[#allocation5 + $0x590] sm:$0xf0] }
  0xc5   :  { %3506 = vmatpush.bf16.msrb.mxu1 %v5249_v39  ;;  %3519 = vmatpush.bf16.msrb.mxu2 %v5377_v40  ;;  %v6874_v3 = vld [vmem:[#allocation5 + $0x584] sm:$0xf]  ;;  %v5326_v7 = vld [vmem:[#allocation5 + $0x690] sm:$0xf0]  ;;  %v5073_v10 = vor.u32 %v6842_v1, %v5070_v2  ;;  %v627_v40 = vld [vmem:[#allocation7] sm:$0xf] }
  0xc6   :  { %3532 = vmatpush.bf16.msrb.mxu3 %v5505_v44  ;;  %v6906_v6 = vld [vmem:[#allocation5 + $0x684] sm:$0xf]  ;;  %v5454_v9 = vld [vmem:[#allocation5 + $0x790] sm:$0xf0]  ;;  %v5201_v11 = vor.u32 %v6874_v3, %v5198_v5  ;;  %v629_v49 = vperm.slane %v627_v40, 0 }
  0xc7   :  { %3488 = vmatmul.bf16.vlgmr.msra.gmra.mxu3 %v7540_v29  ;;  %3494 = vmatpush.bf16.msrb.mxu0 %v5105_v50  ;;  %v6938_v8 = vld [vmem:[#allocation5 + $0x784] sm:$0xf]  ;;  %v5329_v12 = vor.u32 %v6906_v6, %v5326_v7  ;;  %v5054_v14 = vld [vmem:[#allocation5 + $0x470] sm:$0xf0] }
  0xc8   :  { %v6838_v13 = vld [vmem:[#allocation5 + $0x464] sm:$0xf]  ;;  %v5457_v16 = vor.u32 %v6938_v8, %v5454_v9  ;;  %v5182_v17 = vld [vmem:[#allocation5 + $0x570] sm:$0xf0] }
  0xc9   :  { %3507 = vmatpush.bf16.msrb.mxu1 %v5233_v51  ;;  %3520 = vmatpush.bf16.msrb.mxu2 %v5361_v52  ;;  %v6870_v15 = vld [vmem:[#allocation5 + $0x564] sm:$0xf]  ;;  %v5310_v19 = vld [vmem:[#allocation5 + $0x670] sm:$0xf0]  ;;  %v5057_v22 = vor.u32 %v6838_v13, %v5054_v14 }
  0xca   :  { %3533 = vmatpush.bf16.msrb.mxu3 %v5489_v56  ;;  %v6902_v18 = vld [vmem:[#allocation5 + $0x664] sm:$0xf]  ;;  %v5438_v21 = vld [vmem:[#allocation5 + $0x770] sm:$0xf0]  ;;  %v5185_v24 = vor.u32 %v6870_v15, %v5182_v17 }
  0xcb   :  { %3495 = vmatpush.bf16.msrb.mxu0 %v5089_v62  ;;  %v6934_v20 = vld [vmem:[#allocation5 + $0x764] sm:$0xf]  ;;  %v5313_v26 = vor.u32 %v6902_v18, %v5310_v19  ;;  %v5038_v30 = vld [vmem:[#allocation5 + $0x450] sm:$0xf0] }
  0xcc   :  { %v6834_v23 = vld [vmem:[#allocation5 + $0x444] sm:$0xf]  ;;  %v5166_v35 = vld [vmem:[#allocation5 + $0x550] sm:$0xf0]  ;;  %v5441_v36 = vor.u32 %v6934_v20, %v5438_v21 }
  0xcd   :  { %3508 = vmatpush.bf16.msrb.mxu1 %v5217_v63  ;;  %3521 = vmatpush.bf16.msrb.mxu2 %v5345_v0  ;;  %v6866_v33 = vld [vmem:[#allocation5 + $0x544] sm:$0xf]  ;;  %v5294_v39 = vld [vmem:[#allocation5 + $0x650] sm:$0xf0]  ;;  %v5041_v43 = vor.u32 %v6834_v23, %v5038_v30 }
  0xce   :  { %3534 = vmatpush.bf16.msrb.mxu3 %v5473_v4  ;;  %v6898_v37 = vld [vmem:[#allocation5 + $0x644] sm:$0xf]  ;;  %v5422_v42 = vld [vmem:[#allocation5 + $0x750] sm:$0xf0]  ;;  %v5169_v45 = vor.u32 %v6866_v33, %v5166_v35  ;;  %v3242_v59 = vpop.f32.mrf.mxu0 }
  0xcf   :  { %3496 = vmatpush.bf16.msrb.mxu0 %v5073_v10  ;;  %v6930_v41 = vld [vmem:[#allocation5 + $0x744] sm:$0xf]  ;;  %v5297_v46 = vor.u32 %v6898_v37, %v5294_v39  ;;  %v5022_v47 = vld [vmem:[#allocation5 + $0x430] sm:$0xf0]  ;;  %v3243_v1 = vadd.f32 %v3242_v59, %v629_v49 }
  0xd0   :  { %v6830_v44 = vld [vmem:[#allocation5 + $0x424] sm:$0xf]  ;;  %v5425_v50 = vor.u32 %v6930_v41, %v5422_v42  ;;  %v5150_v51 = vld [vmem:[#allocation5 + $0x530] sm:$0xf0]  ;;  %v3255_v2 = vpop.f32.mrf.mxu1 }
  0xd1   :  { %3509 = vmatpush.bf16.msrb.mxu1 %v5201_v11  ;;  %3522 = vmatpush.bf16.msrb.mxu2 %v5329_v12  ;;  %v6862_v48 = vld [vmem:[#allocation5 + $0x524] sm:$0xf]  ;;  %v5278_v53 = vld [vmem:[#allocation5 + $0x630] sm:$0xf0]  ;;  %v5025_v56 = vor.u32 %v6830_v44, %v5022_v47  ;;  %v3256_v10 = vadd.f32 %v3255_v2, %v3243_v1 }
  0xd2   :  { %3535 = vmatpush.bf16.msrb.mxu3 %v5457_v16  ;;  %v6894_v52 = vld [vmem:[#allocation5 + $0x624] sm:$0xf]  ;;  %v5406_v55 = vld [vmem:[#allocation5 + $0x730] sm:$0xf0]  ;;  %v5153_v60 = vor.u32 %v6862_v48, %v5150_v51 }
  0xd3   :  { %3497 = vmatpush.bf16.msrb.mxu0 %v5057_v22  ;;  %v6926_v54 = vld [vmem:[#allocation5 + $0x724] sm:$0xf]  ;;  %v5006_v58 = vld [vmem:[#allocation5 + $0x410] sm:$0xf0]  ;;  %v5281_v61 = vor.u32 %v6894_v52, %v5278_v53 }
  0xd4   :  { %v6826_v57 = vld [vmem:[#allocation5 + $0x404] sm:$0xf]  ;;  %v5134_v63 = vld [vmem:[#allocation5 + $0x510] sm:$0xf0]  ;;  %v5409_v3 = vor.u32 %v6926_v54, %v5406_v55 }
  0xd5   :  { %3510 = vmatpush.bf16.msrb.mxu1 %v5185_v24  ;;  %3523 = vmatpush.bf16.msrb.mxu2 %v5313_v26  ;;  %v6858_v62 = vld [vmem:[#allocation5 + $0x504] sm:$0xf]  ;;  %v5262_v4 = vld [vmem:[#allocation5 + $0x610] sm:$0xf0]  ;;  %v5009_v11 = vor.u32 %v6826_v57, %v5006_v58  ;;  %v3268_v19 = vpop.f32.mrf.mxu2  ;;  %v3281_v23 = vpop.f32.mrf.mxu3 }
  0xd6   :  { %3536 = vmatpush.bf16.msrb.mxu3 %v5441_v36  ;;  %v6890_v0 = vld [vmem:[#allocation5 + $0x604] sm:$0xf]  ;;  %v5390_v6 = vld [vmem:[#allocation5 + $0x710] sm:$0xf0]  ;;  %v5137_v15 = vor.u32 %v6858_v62, %v5134_v63  ;;  %v3269_v22 = vadd.f32 %v3268_v19, %v3256_v10  ;;  %v3244_v42 = vpop.f32.mrf.mxu0 }
  0xd7   :  { %3498 = vmatpush.bf16.msrb.mxu0 %v5041_v43  ;;  %v6922_v5 = vld [vmem:[#allocation5 + $0x704] sm:$0xf]  ;;  %v5630_v8 = vld [vmem:[#allocation5 + $0x8f0] sm:$0xf0]  ;;  %v5265_v16 = vor.u32 %v6890_v0, %v5262_v4 }
  0xd8   :  { %v6982_v7 = vld [vmem:[#allocation5 + $0x8e4] sm:$0xf]  ;;  %v5758_v12 = vld [vmem:[#allocation5 + $0x9f0] sm:$0xf0]  ;;  %v5393_v20 = vor.u32 %v6922_v5, %v5390_v6  ;;  %v3282_v41 = vadd.f32 %v3281_v23, %v3269_v22 }
  0xd9   :  { %3511 = vmatpush.bf16.msrb.mxu1 %v5169_v45  ;;  %3524 = vmatpush.bf16.msrb.mxu2 %v5297_v46  ;;  %v7014_v9 = vld [vmem:[#allocation5 + $0x9e4] sm:$0xf]  ;;  %v5886_v14 = vld [vmem:[#allocation5 + $0xaf0] sm:$0xf0]  ;;  %v5633_v21 = vor.u32 %v6982_v7, %v5630_v8  ;;  %v3257_v45 = vpop.f32.mrf.mxu1 }
  0xda   :  { %3537 = vmatpush.bf16.msrb.mxu3 %v5425_v50  ;;  %v7046_v13 = vld [vmem:[#allocation5 + $0xae4] sm:$0xf]  ;;  %v6014_v18 = vld [vmem:[#allocation5 + $0xbf0] sm:$0xf0]  ;;  %v5761_v24 = vor.u32 %v7014_v9, %v5758_v12 }
  0xdb   :  { %3499 = vmatpush.bf16.msrb.mxu0 %v5025_v56  ;;  %v7078_v17 = vld [vmem:[#allocation5 + $0xbe4] sm:$0xf]  ;;  %v5889_v26 = vor.u32 %v7046_v13, %v5886_v14  ;;  %v5614_v33 = vld [vmem:[#allocation5 + $0x8d0] sm:$0xf0] }
  0xdc   :  { %v6978_v30 = vld [vmem:[#allocation5 + $0x8c4] sm:$0xf]  ;;  %v6017_v36 = vor.u32 %v7078_v17, %v6014_v18  ;;  %v5742_v37 = vld [vmem:[#allocation5 + $0x9d0] sm:$0xf0] }
  0xdd   :  { %3512 = vmatpush.bf16.msrb.mxu1 %v5153_v60  ;;  %3525 = vmatpush.bf16.msrb.mxu2 %v5281_v61  ;;  %v7010_v35 = vld [vmem:[#allocation5 + $0x9c4] sm:$0xf]  ;;  %v5870_v40 = vld [vmem:[#allocation5 + $0xad0] sm:$0xf0]  ;;  %v5617_v46 = vor.u32 %v6978_v30, %v5614_v33  ;;  %v3270_v58 = vpop.f32.mrf.mxu2  ;;  %v3283_v60 = vpop.f32.mrf.mxu3 }
  0xde   :  { %3538 = vmatpush.bf16.msrb.mxu3 %v5409_v3  ;;  %v7042_v39 = vld [vmem:[#allocation5 + $0xac4] sm:$0xf]  ;;  %v5998_v44 = vld [vmem:[#allocation5 + $0xbd0] sm:$0xf0]  ;;  %v5745_v47 = vor.u32 %v7010_v35, %v5742_v37 }
  0xdf   :  { %3500 = vmatpush.bf16.msrb.mxu0 %v5009_v11  ;;  %v7074_v43 = vld [vmem:[#allocation5 + $0xbc4] sm:$0xf]  ;;  %v5873_v48 = vor.u32 %v7042_v39, %v5870_v40  ;;  %v5598_v50 = vld [vmem:[#allocation5 + $0x8b0] sm:$0xf0] }
  0xe0   :  { %v6974_v49 = vld [vmem:[#allocation5 + $0x8a4] sm:$0xf]  ;;  %v6001_v52 = vor.u32 %v7074_v43, %v5998_v44  ;;  %v5726_v53 = vld [vmem:[#allocation5 + $0x9b0] sm:$0xf0] }
  0xe1   :  { %3513 = vmatpush.bf16.msrb.mxu1 %v5137_v15  ;;  %3526 = vmatpush.bf16.msrb.mxu2 %v5265_v16  ;;  %v7006_v51 = vld [vmem:[#allocation5 + $0x9a4] sm:$0xf]  ;;  %v5854_v55 = vld [vmem:[#allocation5 + $0xab0] sm:$0xf0]  ;;  %v5601_v59 = vor.u32 %v6974_v49, %v5598_v50  ;;  %v3307_v16 = vpop.f32.mrf.mxu1 }
  0xe2   :  { %3539 = vmatpush.bf16.msrb.mxu3 %v5393_v20  ;;  %v7038_v54 = vld [vmem:[#allocation5 + $0xaa4] sm:$0xf]  ;;  %v5982_v57 = vld [vmem:[#allocation5 + $0xbb0] sm:$0xf0]  ;;  %3501 = vmatmul.bf16.vlgmr.msrb.gmra.mxu0 %v7550_v31  ;;  %v5729_v61 = vor.u32 %v7006_v51, %v5726_v53 }
  0xe3   :  { %3545 = vmatpush.bf16.msra.mxu0 %v5633_v21  ;;  %v7070_v56 = vld [vmem:[#allocation5 + $0xba4] sm:$0xf]  ;;  %v5857_v62 = vor.u32 %v7038_v54, %v5854_v55  ;;  %v5582_v0 = vld [vmem:[#allocation5 + $0x890] sm:$0xf0] }
  0xe4   :  { %3527 = vmatmul.bf16.vlgmr.msrb.gmra.mxu2 %v7548_v25  ;;  %3514 = vmatmul.bf16.vlgmr.msrb.gmra.mxu1 %v7554_v38  ;;  %v6970_v63 = vld [vmem:[#allocation5 + $0x884] sm:$0xf]  ;;  %v5985_v2 = vor.u32 %v7070_v56, %v5982_v57  ;;  %v5710_v3 = vld [vmem:[#allocation5 + $0x990] sm:$0xf0]  ;;  %v3294_v9 = vpop.f32.mrf.mxu0 }
  0xe5   :  { %3558 = vmatpush.bf16.msra.mxu1 %v5761_v24  ;;  %3571 = vmatpush.bf16.msra.mxu2 %v5889_v26  ;;  %v7002_v1 = vld [vmem:[#allocation5 + $0x984] sm:$0xf]  ;;  %v5838_v5 = vld [vmem:[#allocation5 + $0xa90] sm:$0xf0]  ;;  %v5585_v8 = vor.u32 %v6970_v63, %v5582_v0  ;;  %v3295_v15 = vadd.f32 %v3294_v9, %v3282_v41 }
  0xe6   :  { %3584 = vmatpush.bf16.msra.mxu3 %v6017_v36  ;;  %v7034_v4 = vld [vmem:[#allocation5 + $0xa84] sm:$0xf]  ;;  %v5966_v7 = vld [vmem:[#allocation5 + $0xb90] sm:$0xf0]  ;;  %v5713_v10 = vor.u32 %v7002_v1, %v5710_v3  ;;  %v3333_v44 = vpop.f32.mrf.mxu3 }
  0xe7   :  { %3540 = vmatmul.bf16.vlgmr.msrb.gmra.mxu3 %v7552_v32  ;;  %3546 = vmatpush.bf16.msra.mxu0 %v5617_v46  ;;  %v7066_v6 = vld [vmem:[#allocation5 + $0xb84] sm:$0xf]  ;;  %v5841_v11 = vor.u32 %v7034_v4, %v5838_v5  ;;  %v5566_v13 = vld [vmem:[#allocation5 + $0x870] sm:$0xf0]  ;;  %v3308_v23 = vadd.f32 %v3307_v16, %v3295_v15 }
  0xe8   :  { %v6966_v12 = vld [vmem:[#allocation5 + $0x864] sm:$0xf]  ;;  %v5969_v17 = vor.u32 %v7066_v6, %v5966_v7  ;;  %v5694_v18 = vld [vmem:[#allocation5 + $0x970] sm:$0xf0] }
  0xe9   :  { %3559 = vmatpush.bf16.msra.mxu1 %v5745_v47  ;;  %3572 = vmatpush.bf16.msra.mxu2 %v5873_v48  ;;  %v6998_v14 = vld [vmem:[#allocation5 + $0x964] sm:$0xf]  ;;  %v5822_v20 = vld [vmem:[#allocation5 + $0xa70] sm:$0xf0]  ;;  %v5569_v24 = vor.u32 %v6966_v12, %v5566_v13  ;;  %v3320_v37 = vpop.f32.mrf.mxu2  ;;  %v3309_v55 = vpop.f32.mrf.mxu1 }
  0xea   :  { %3585 = vmatpush.bf16.msra.mxu3 %v6001_v52  ;;  %v7030_v19 = vld [vmem:[#allocation5 + $0xa64] sm:$0xf]  ;;  %v5950_v22 = vld [vmem:[#allocation5 + $0xb70] sm:$0xf0]  ;;  %v5697_v26 = vor.u32 %v6998_v14, %v5694_v18  ;;  %v3321_v43 = vadd.f32 %v3320_v37, %v3308_v23 }
  0xeb   :  { %3547 = vmatpush.bf16.msra.mxu0 %v5601_v59  ;;  %v7062_v21 = vld [vmem:[#allocation5 + $0xb64] sm:$0xf]  ;;  %v5825_v30 = vor.u32 %v7030_v19, %v5822_v20  ;;  %v5550_v35 = vld [vmem:[#allocation5 + $0x850] sm:$0xf0] }
  0xec   :  { %v6962_v33 = vld [vmem:[#allocation5 + $0x844] sm:$0xf]  ;;  %v5953_v39 = vor.u32 %v7062_v21, %v5950_v22  ;;  %v5678_v40 = vld [vmem:[#allocation5 + $0x950] sm:$0xf0]  ;;  %v7568_v48 = vadd.f32 %v3333_v44, %v3321_v43  ;;  %v3296_v49 = vpop.f32.mrf.mxu0 }
  0xed   :  { %3560 = vmatpush.bf16.msra.mxu1 %v5729_v61  ;;  %3573 = vmatpush.bf16.msra.mxu2 %v5857_v62  ;;  %v6994_v36 = vld [vmem:[#allocation5 + $0x944] sm:$0xf]  ;;  %v5806_v42 = vld [vmem:[#allocation5 + $0xa50] sm:$0xf0]  ;;  %v5553_v47 = vor.u32 %v6962_v33, %v5550_v35 }
  0xee   :  { %3586 = vmatpush.bf16.msra.mxu3 %v5985_v2  ;;  %v7026_v41 = vld [vmem:[#allocation5 + $0xa44] sm:$0xf]  ;;  %v5934_v46 = vld [vmem:[#allocation5 + $0xb50] sm:$0xf0]  ;;  %v5681_v50 = vor.u32 %v6994_v36, %v5678_v40 }
  0xef   :  { %3548 = vmatpush.bf16.msra.mxu0 %v5585_v8  ;;  %v7058_v45 = vld [vmem:[#allocation5 + $0xb44] sm:$0xf]  ;;  %v5809_v51 = vor.u32 %v7026_v41, %v5806_v42  ;;  %v5534_v53 = vld [vmem:[#allocation5 + $0x830] sm:$0xf0] }
  0xf0   :  { %v6958_v52 = vld [vmem:[#allocation5 + $0x824] sm:$0xf]  ;;  %v5937_v56 = vor.u32 %v7058_v45, %v5934_v46  ;;  %v5662_v57 = vld [vmem:[#allocation5 + $0x930] sm:$0xf0] }
  0xf1   :  { %3561 = vmatpush.bf16.msra.mxu1 %v5713_v10  ;;  %3574 = vmatpush.bf16.msra.mxu2 %v5841_v11  ;;  %v6990_v54 = vld [vmem:[#allocation5 + $0x924] sm:$0xf]  ;;  %v5790_v59 = vld [vmem:[#allocation5 + $0xa30] sm:$0xf0]  ;;  %v5537_v62 = vor.u32 %v6958_v52, %v5534_v53  ;;  %v3322_v6 = vpop.f32.mrf.mxu2  ;;  %v3335_v11 = vpop.f32.mrf.mxu3 }
  0xf2   :  { %3587 = vmatpush.bf16.msra.mxu3 %v5969_v17  ;;  %v7022_v58 = vld [vmem:[#allocation5 + $0xa24] sm:$0xf]  ;;  %v5918_v61 = vld [vmem:[#allocation5 + $0xb30] sm:$0xf0]  ;;  %v5665_v1 = vor.u32 %v6990_v54, %v5662_v57 }
  0xf3   :  { %3549 = vmatpush.bf16.msra.mxu0 %v5569_v24  ;;  %v7054_v60 = vld [vmem:[#allocation5 + $0xb24] sm:$0xf]  ;;  %v5518_v0 = vld [vmem:[#allocation5 + $0x810] sm:$0xf0]  ;;  %v5793_v2 = vor.u32 %v7022_v58, %v5790_v59 }
  0xf4   :  { %v6954_v63 = vld [vmem:[#allocation5 + $0x804] sm:$0xf]  ;;  %v5646_v4 = vld [vmem:[#allocation5 + $0x910] sm:$0xf0]  ;;  %v5921_v7 = vor.u32 %v7054_v60, %v5918_v61 }
  0xf5   :  { %3562 = vmatpush.bf16.msra.mxu1 %v5697_v26  ;;  %3575 = vmatpush.bf16.msra.mxu2 %v5825_v30  ;;  %v6986_v3 = vld [vmem:[#allocation5 + $0x904] sm:$0xf]  ;;  %v5774_v8 = vld [vmem:[#allocation5 + $0xa10] sm:$0xf0]  ;;  %v5521_v15 = vor.u32 %v6954_v63, %v5518_v0 }
  0xf6   :  { %3588 = vmatpush.bf16.msra.mxu3 %v5953_v39  ;;  %v7018_v5 = vld [vmem:[#allocation5 + $0xa04] sm:$0xf]  ;;  %v5902_v10 = vld [vmem:[#allocation5 + $0xb10] sm:$0xf0]  ;;  %v5649_v19 = vor.u32 %v6986_v3, %v5646_v4 }
  0xf7   :  { %3550 = vmatpush.bf16.msra.mxu0 %v5553_v47  ;;  %v7050_v9 = vld [vmem:[#allocation5 + $0xb04] sm:$0xf]  ;;  %v6142_v13 = vld [vmem:[#allocation5 + $0xcf0] sm:$0xf0]  ;;  %v5777_v20 = vor.u32 %v7018_v5, %v5774_v8 }
  0xf8   :  { %v7110_v12 = vld [vmem:[#allocation5 + $0xce4] sm:$0xf]  ;;  %v6270_v16 = vld [vmem:[#allocation5 + $0xdf0] sm:$0xf0]  ;;  %v5905_v23 = vor.u32 %v7050_v9, %v5902_v10 }
  0xf9   :  { %3563 = vmatpush.bf16.msra.mxu1 %v5681_v50  ;;  %3576 = vmatpush.bf16.msra.mxu2 %v5809_v51  ;;  %v7142_v14 = vld [vmem:[#allocation5 + $0xde4] sm:$0xf]  ;;  %v6398_v18 = vld [vmem:[#allocation5 + $0xef0] sm:$0xf0]  ;;  %v6145_v24 = vor.u32 %v7110_v12, %v6142_v13  ;;  %v7263_v51 = vld [vmem:[#allocation1] sm:$0xff] }
  0xfa   :  { %3589 = vmatpush.bf16.msra.mxu3 %v5937_v56  ;;  %v7174_v17 = vld [vmem:[#allocation5 + $0xee4] sm:$0xf]  ;;  %v6526_v22 = vld [vmem:[#allocation5 + $0xff0] sm:$0xf0]  ;;  %v6273_v26 = vor.u32 %v7142_v14, %v6270_v16  ;;  %v7264_v56 = vld [vmem:[#allocation1 + $0x12] sm:$0xff] }
  0xfb   :  { %3551 = vmatpush.bf16.msra.mxu0 %v5537_v62  ;;  %v7206_v21 = vld [vmem:[#allocation5 + $0xfe4] sm:$0xf]  ;;  %v6401_v30 = vor.u32 %v7174_v17, %v6398_v18  ;;  %v6126_v35 = vld [vmem:[#allocation5 + $0xcd0] sm:$0xf0] }
  0xfc   :  { %v7106_v33 = vld [vmem:[#allocation5 + $0xcc4] sm:$0xf]  ;;  %v6529_v37 = vor.u32 %v7206_v21, %v6526_v22  ;;  %v6254_v39 = vld [vmem:[#allocation5 + $0xdd0] sm:$0xf0] }
  0xfd   :  { %3564 = vmatpush.bf16.msra.mxu1 %v5665_v1  ;;  %3577 = vmatpush.bf16.msra.mxu2 %v5793_v2  ;;  %v7138_v36 = vld [vmem:[#allocation5 + $0xdc4] sm:$0xf]  ;;  %v6382_v41 = vld [vmem:[#allocation5 + $0xed0] sm:$0xf0]  ;;  %v6129_v44 = vor.u32 %v7106_v33, %v6126_v35 }
  0xfe   :  { %3590 = vmatpush.bf16.msra.mxu3 %v5921_v7  ;;  %v7170_v40 = vld [vmem:[#allocation5 + $0xec4] sm:$0xf]  ;;  %v6510_v43 = vld [vmem:[#allocation5 + $0xfd0] sm:$0xf0]  ;;  %v6257_v45 = vor.u32 %v7138_v36, %v6254_v39  ;;  %v3346_v7 = vpop.f32.mrf.mxu0 }
  0xff   :  { %3552 = vmatpush.bf16.msra.mxu0 %v5521_v15  ;;  %v7202_v42 = vld [vmem:[#allocation5 + $0xfc4] sm:$0xf]  ;;  %v6385_v46 = vor.u32 %v7170_v40, %v6382_v41  ;;  %v6110_v49 = vld [vmem:[#allocation5 + $0xcb0] sm:$0xf0]  ;;  %v3347_v10 = vadd.f32 %v3346_v7, %v7568_v48 }
 0x100   :  { %v7102_v47 = vld [vmem:[#allocation5 + $0xca4] sm:$0xf]  ;;  %v6513_v52 = vor.u32 %v7202_v42, %v6510_v43  ;;  %v6238_v53 = vld [vmem:[#allocation5 + $0xdb0] sm:$0xf0] }
 0x101   :  { %3565 = vmatpush.bf16.msra.mxu1 %v5649_v19  ;;  %3578 = vmatpush.bf16.msra.mxu2 %v5777_v20  ;;  %v7134_v50 = vld [vmem:[#allocation5 + $0xda4] sm:$0xf]  ;;  %v6366_v55 = vld [vmem:[#allocation5 + $0xeb0] sm:$0xf0]  ;;  %v6113_v61 = vor.u32 %v7102_v47, %v6110_v49 }
 0x102   :  { %3591 = vmatpush.bf16.msra.mxu3 %v5905_v23  ;;  %3553 = vmatmul.bf16.vlgmr.msra.gmra.mxu0 %v7263_v51  ;;  %v7166_v54 = vld [vmem:[#allocation5 + $0xea4] sm:$0xf]  ;;  %v7265_v57 = vld [vmem:[#allocation1 + $0x9] sm:$0xff]  ;;  %v6241_v62 = vor.u32 %v7134_v50, %v6238_v53 }
 0x103   :  { %3597 = vmatpush.bf16.msrb.mxu0 %v6145_v24  ;;  %v7198_v58 = vld [vmem:[#allocation5 + $0xfa4] sm:$0xf]  ;;  %v6494_v59 = vld [vmem:[#allocation5 + $0xfb0] sm:$0xf0]  ;;  %v6369_v63 = vor.u32 %v7166_v54, %v6366_v55 }
 0x104   :  { %3579 = vmatmul.bf16.vlgmr.msra.gmra.mxu2 %v7264_v56  ;;  %3566 = vmatmul.bf16.vlgmr.msra.gmra.mxu1 %v7265_v57  ;;  %v7266_v60 = vld [vmem:[#allocation1 + $0x1b] sm:$0xff]  ;;  %v6094_v1 = vld [vmem:[#allocation5 + $0xc90] sm:$0xf0]  ;;  %v6497_v3 = vor.u32 %v7198_v58, %v6494_v59 }
 0x105   :  { %3610 = vmatpush.bf16.msrb.mxu1 %v6273_v26  ;;  %3623 = vmatpush.bf16.msrb.mxu2 %v6401_v30  ;;  %v7098_v0 = vld [vmem:[#allocation5 + $0xc84] sm:$0xf]  ;;  %v6222_v4 = vld [vmem:[#allocation5 + $0xd90] sm:$0xf0]  ;;  %v3359_v12 = vpop.f32.mrf.mxu1 }
 0x106   :  { %3636 = vmatpush.bf16.msrb.mxu3 %v6529_v37  ;;  %v7130_v2 = vld [vmem:[#allocation5 + $0xd84] sm:$0xf]  ;;  %v6350_v6 = vld [vmem:[#allocation5 + $0xe90] sm:$0xf0]  ;;  %v6097_v11 = vor.u32 %v7098_v0, %v6094_v1  ;;  %v3360_v19 = vadd.f32 %v3359_v12, %v3347_v10  ;;  %v3348_v47 = vpop.f32.mrf.mxu0  ;;  %v4612_v12 = vld [vmem:[#allocation5 + $0xe8] sm:$0xf] }
 0x107   :  { %3592 = vmatmul.bf16.vlgmr.msra.gmra.mxu3 %v7266_v60  ;;  %3598 = vmatpush.bf16.msrb.mxu0 %v6129_v44  ;;  %v7162_v5 = vld [vmem:[#allocation5 + $0xe84] sm:$0xf]  ;;  %v6478_v9 = vld [vmem:[#allocation5 + $0xf90] sm:$0xf0]  ;;  %v6225_v13 = vor.u32 %v7130_v2, %v6222_v4  ;;  %v4580_v47 = vld [vmem:[#allocation5 + $0xa8] sm:$0xf] }
 0x108   :  { %v7194_v8 = vld [vmem:[#allocation5 + $0xf84] sm:$0xf]  ;;  %v6353_v14 = vor.u32 %v7162_v5, %v6350_v6  ;;  %v6078_v16 = vld [vmem:[#allocation5 + $0xc70] sm:$0xf0] }
 0x109   :  { %3611 = vmatpush.bf16.msrb.mxu1 %v6257_v45  ;;  %3624 = vmatpush.bf16.msrb.mxu2 %v6385_v46  ;;  %v7094_v15 = vld [vmem:[#allocation5 + $0xc64] sm:$0xf]  ;;  %v6481_v18 = vor.u32 %v7194_v8, %v6478_v9  ;;  %v6206_v20 = vld [vmem:[#allocation5 + $0xd70] sm:$0xf0] }
 0x10a   :  { %3637 = vmatpush.bf16.msrb.mxu3 %v6513_v52  ;;  %v7126_v17 = vld [vmem:[#allocation5 + $0xd64] sm:$0xf]  ;;  %v6334_v22 = vld [vmem:[#allocation5 + $0xe70] sm:$0xf0]  ;;  %v6081_v26 = vor.u32 %v7094_v15, %v6078_v16  ;;  %v3372_v39 = vpop.f32.mrf.mxu2  ;;  %v3385_v44 = vpop.f32.mrf.mxu3 }
 0x10b   :  { %3599 = vmatpush.bf16.msrb.mxu0 %v6113_v61  ;;  %v7158_v21 = vld [vmem:[#allocation5 + $0xe64] sm:$0xf]  ;;  %v6462_v24 = vld [vmem:[#allocation5 + $0xf70] sm:$0xf0]  ;;  %v6209_v48 = vor.u32 %v7126_v17, %v6206_v20  ;;  %v3373_v43 = vadd.f32 %v3372_v39, %v3360_v19  ;;  %v6761_v17 = vld [vmem:[#allocation5 + $0x1f4] sm:$0xf0] }
 0x10c   :  { %v7190_v23 = vld [vmem:[#allocation5 + $0xf64] sm:$0xf]  ;;  %v6337_v30 = vor.u32 %v7158_v21, %v6334_v22  ;;  %v6062_v35 = vld [vmem:[#allocation5 + $0xc50] sm:$0xf0]  ;;  %v6793_v19 = vld [vmem:[#allocation5 + $0x2f4] sm:$0xf0] }
 0x10d   :  { %3612 = vmatpush.bf16.msrb.mxu1 %v6241_v62  ;;  %3625 = vmatpush.bf16.msrb.mxu2 %v6369_v63  ;;  %v7090_v33 = vld [vmem:[#allocation5 + $0xc44] sm:$0xf]  ;;  %v6465_v37 = vor.u32 %v7190_v23, %v6462_v24  ;;  %v6190_v40 = vld [vmem:[#allocation5 + $0xd50] sm:$0xf0]  ;;  %v3361_v50 = vpop.f32.mrf.mxu1  ;;  %v7571_v51 = vadd.f32 %v3385_v44, %v3373_v43  ;;  %v4996_v22 = vld [vmem:[#allocation5 + $0x3e8] sm:$0xf] }
 0x10e   :  { %3638 = vmatpush.bf16.msrb.mxu3 %v6497_v3  ;;  %v7122_v36 = vld [vmem:[#allocation5 + $0xd44] sm:$0xf]  ;;  %v6318_v42 = vld [vmem:[#allocation5 + $0xe50] sm:$0xf0]  ;;  %v6065_v49 = vor.u32 %v7090_v33, %v6062_v35  ;;  %v6825_v23 = vld [vmem:[#allocation5 + $0x3f4] sm:$0xf0] }
 0x10f   :  { %3600 = vmatpush.bf16.msrb.mxu0 %v6097_v11  ;;  %v7154_v41 = vld [vmem:[#allocation5 + $0xe44] sm:$0xf]  ;;  %v6446_v46 = vld [vmem:[#allocation5 + $0xf50] sm:$0xf0]  ;;  %v6193_v52 = vor.u32 %v7122_v36, %v6190_v40  ;;  %v4596_v33 = vld [vmem:[#allocation5 + $0xc8] sm:$0xf] }
 0x110   :  { %v7186_v45 = vld [vmem:[#allocation5 + $0xf44] sm:$0xf]  ;;  %v6321_v53 = vor.u32 %v7154_v41, %v6318_v42  ;;  %v6046_v55 = vld [vmem:[#allocation5 + $0xc30] sm:$0xf0]  ;;  %v6725_v35 = vld [vmem:[#allocation5 + $0xd4] sm:$0xf0] }
 0x111   :  { %3613 = vmatpush.bf16.msrb.mxu1 %v6225_v13  ;;  %3626 = vmatpush.bf16.msrb.mxu2 %v6353_v14  ;;  %v7086_v54 = vld [vmem:[#allocation5 + $0xc24] sm:$0xf]  ;;  %v6449_v57 = vor.u32 %v7186_v45, %v6446_v46  ;;  %v6174_v58 = vld [vmem:[#allocation5 + $0xd30] sm:$0xf0]  ;;  %v6729_v13 = vld [vmem:[#allocation5 + $0xf4] sm:$0xf0]  ;;  %v4597_v44 = vor.u32 %v6725_v35, %v4596_v33 }
 0x112   :  { %3639 = vmatpush.bf16.msrb.mxu3 %v6481_v18  ;;  %v7118_v56 = vld [vmem:[#allocation5 + $0xd24] sm:$0xf]  ;;  %v6302_v60 = vld [vmem:[#allocation5 + $0xe30] sm:$0xf0]  ;;  %v6049_v63 = vor.u32 %v7086_v54, %v6046_v55  ;;  %v3374_v11 = vpop.f32.mrf.mxu2  ;;  %v4740_v14 = vld [vmem:[#allocation5 + $0x1e8] sm:$0xf]  ;;  %v3387_v15 = vpop.f32.mrf.mxu3 }
 0x113   :  { %3601 = vmatpush.bf16.msrb.mxu0 %v6081_v26  ;;  %v7150_v59 = vld [vmem:[#allocation5 + $0xe24] sm:$0xf]  ;;  %v6430_v62 = vld [vmem:[#allocation5 + $0xf30] sm:$0xf0]  ;;  %v6177_v2 = vor.u32 %v7118_v56, %v6174_v58  ;;  %v4868_v18 = vld [vmem:[#allocation5 + $0x2e8] sm:$0xf]  ;;  %v4613_v26 = vor.u32 %v6729_v13, %v4612_v12 }
 0x114   :  { %v7182_v61 = vld [vmem:[#allocation5 + $0xf24] sm:$0xf]  ;;  %v6030_v1 = vld [vmem:[#allocation5 + $0xc10] sm:$0xf0]  ;;  %v6305_v3 = vor.u32 %v7150_v59, %v6302_v60  ;;  %v4724_v36 = vld [vmem:[#allocation5 + $0x1c8] sm:$0xf] }
 0x115   :  { %3614 = vmatpush.bf16.msrb.mxu1 %v6209_v48  ;;  %3627 = vmatpush.bf16.msrb.mxu2 %v6337_v30  ;;  %v7082_v0 = vld [vmem:[#allocation5 + $0xc04] sm:$0xf]  ;;  %v6158_v5 = vld [vmem:[#allocation5 + $0xd10] sm:$0xf0]  ;;  %v6433_v7 = vor.u32 %v7182_v61, %v6430_v62  ;;  %v4741_v48 = vor.u32 %v6761_v17, %v4740_v14  ;;  %v4869_v30 = vor.u32 %v6793_v19, %v4868_v18  ;;  %v6757_v39 = vld [vmem:[#allocation5 + $0x1d4] sm:$0xf0] }
 0x116   :  { %3640 = vmatpush.bf16.msrb.mxu3 %v6465_v37  ;;  %v7114_v4 = vld [vmem:[#allocation5 + $0xd04] sm:$0xf]  ;;  %v6286_v8 = vld [vmem:[#allocation5 + $0xe10] sm:$0xf0]  ;;  %v6033_v16 = vor.u32 %v7082_v0, %v6030_v1  ;;  %v4997_v37 = vor.u32 %v6825_v23, %v4996_v22  ;;  %v4852_v40 = vld [vmem:[#allocation5 + $0x2c8] sm:$0xf]  ;;  %v4725_v45 = vor.u32 %v6757_v39, %v4724_v36 }
 0x117   :  { %3602 = vmatpush.bf16.msrb.mxu0 %v6065_v49  ;;  %v7146_v6 = vld [vmem:[#allocation5 + $0xe04] sm:$0xf]  ;;  %v6414_v10 = vld [vmem:[#allocation5 + $0xf10] sm:$0xf0]  ;;  %v6161_v20 = vor.u32 %v7114_v4, %v6158_v5  ;;  %v6789_v41 = vld [vmem:[#allocation5 + $0x2d4] sm:$0xf0] }
 0x118   :  { %v7178_v9 = vld [vmem:[#allocation5 + $0xf04] sm:$0xf]  ;;  %v6289_v21 = vor.u32 %v7146_v6, %v6286_v8  ;;  %v4980_v42 = vld [vmem:[#allocation5 + $0x3c8] sm:$0xf]  ;;  %v6821_v43 = vld [vmem:[#allocation5 + $0x3d4] sm:$0xf0]  ;;  %v4853_v46 = vor.u32 %v6789_v41, %v4852_v40 }
 0x119   :  { %3615 = vmatpush.bf16.msrb.mxu1 %v6193_v52  ;;  %3628 = vmatpush.bf16.msrb.mxu2 %v6321_v53  ;;  %v6417_v24 = vor.u32 %v7178_v9, %v6414_v10  ;;  %v6721_v49 = vld [vmem:[#allocation5 + $0xb4] sm:$0xf0]  ;;  %v4708_v50 = vld [vmem:[#allocation5 + $0x1a8] sm:$0xf]  ;;  %v7267_v52 = vld [vmem:[#allocation1 + $0x24] sm:$0xff]  ;;  %v4981_v53 = vor.u32 %v6821_v43, %v4980_v42 }
 0x11a   :  { %3641 = vmatpush.bf16.msrb.mxu3 %v6449_v57  ;;  %v6753_v54 = vld [vmem:[#allocation5 + $0x1b4] sm:$0xf0]  ;;  %v4836_v55 = vld [vmem:[#allocation5 + $0x2a8] sm:$0xf]  ;;  %v7268_v57 = vld [vmem:[#allocation1 + $0x36] sm:$0xff]  ;;  %v4581_v62 = vor.u32 %v6721_v49, %v4580_v47 }
 0x11b   :  { %3603 = vmatpush.bf16.msrb.mxu0 %v6049_v63  ;;  %v6785_v56 = vld [vmem:[#allocation5 + $0x2b4] sm:$0xf0]  ;;  %v4964_v59 = vld [vmem:[#allocation5 + $0x3a8] sm:$0xf]  ;;  %v4709_v63 = vor.u32 %v6753_v54, %v4708_v50 }
 0x11c   :  { %v7269_v58 = vld [vmem:[#allocation1 + $0x2d] sm:$0xff]  ;;  %v7270_v61 = vld [vmem:[#allocation1 + $0x3f] sm:$0xff]  ;;  %v4837_v0 = vor.u32 %v6785_v56, %v4836_v55 }
 0x11d   :  { %3616 = vmatpush.bf16.msrb.mxu1 %v6177_v2  ;;  %3629 = vmatpush.bf16.msrb.mxu2 %v6305_v3  ;;  %v6817_v60 = vld [vmem:[#allocation5 + $0x3b4] sm:$0xf0]  ;;  %v4564_v1 = vld [vmem:[#allocation5 + $0x88] sm:$0xf] }
 0x11e   :  { %3642 = vmatpush.bf16.msrb.mxu3 %v6433_v7  ;;  %v6717_v2 = vld [vmem:[#allocation5 + $0x94] sm:$0xf0]  ;;  %v4692_v3 = vld [vmem:[#allocation5 + $0x188] sm:$0xf]  ;;  %v4965_v4 = vor.u32 %v6817_v60, %v4964_v59 }
 0x11f   :  { %3604 = vmatpush.bf16.msrb.mxu0 %v6033_v16  ;;  %v6749_v5 = vld [vmem:[#allocation5 + $0x194] sm:$0xf0]  ;;  %v4820_v6 = vld [vmem:[#allocation5 + $0x288] sm:$0xf]  ;;  %v3398_v8 = vpop.f32.mrf.mxu0  ;;  %v4565_v12 = vor.u32 %v6717_v2, %v4564_v1 }
 0x120   :  { %v6781_v7 = vld [vmem:[#allocation5 + $0x294] sm:$0xf0]  ;;  %v4948_v9 = vld [vmem:[#allocation5 + $0x388] sm:$0xf]  ;;  %v3399_v11 = vadd.f32 %v3398_v8, %v7571_v51  ;;  %v4693_v14 = vor.u32 %v6749_v5, %v4692_v3 }
 0x121   :  { %3617 = vmatpush.bf16.msrb.mxu1 %v6161_v20  ;;  %3630 = vmatpush.bf16.msrb.mxu2 %v6289_v21  ;;  %v6813_v10 = vld [vmem:[#allocation5 + $0x394] sm:$0xf0]  ;;  %v3411_v13 = vpop.f32.mrf.mxu1  ;;  %v4821_v15 = vor.u32 %v6781_v7, %v4820_v6  ;;  %v4548_v16 = vld [vmem:[#allocation5 + $0x68] sm:$0xf] }
 0x122   :  { %3643 = vmatpush.bf16.msrb.mxu3 %v6417_v24  ;;  %3605 = vmatmul.bf16.vlgmr.msrb.gmra.mxu0 %v7267_v52  ;;  %v6713_v17 = vld [vmem:[#allocation5 + $0x74] sm:$0xf0]  ;;  %v4676_v18 = vld [vmem:[#allocation5 + $0x168] sm:$0xf]  ;;  %v4949_v19 = vor.u32 %v6813_v10, %v4948_v9  ;;  %v3412_v20 = vadd.f32 %v3411_v13, %v3399_v11 }
 0x123   :  { %3649 = vmatpush.bf16.msra.mxu0 %v4613_v26  ;;  %v6745_v21 = vld [vmem:[#allocation5 + $0x174] sm:$0xf0]  ;;  %v4804_v22 = vld [vmem:[#allocation5 + $0x268] sm:$0xf] }
 0x124   :  { %3631 = vmatmul.bf16.vlgmr.msrb.gmra.mxu2 %v7268_v57  ;;  %3618 = vmatmul.bf16.vlgmr.msrb.gmra.mxu1 %v7269_v58  ;;  %v6777_v23 = vld [vmem:[#allocation5 + $0x274] sm:$0xf0]  ;;  %v4932_v24 = vld [vmem:[#allocation5 + $0x368] sm:$0xf]  ;;  %v4677_v51 = vor.u32 %v6745_v21, %v4676_v18 }
 0x125   :  { %3662 = vmatpush.bf16.msra.mxu1 %v4741_v48  ;;  %3675 = vmatpush.bf16.msra.mxu2 %v4869_v30  ;;  %v6809_v26 = vld [vmem:[#allocation5 + $0x374] sm:$0xf0]  ;;  %v4549_v48 = vor.u32 %v6713_v17, %v4548_v16  ;;  %v4805_v30 = vor.u32 %v6777_v23, %v4804_v22  ;;  %v4532_v33 = vld [vmem:[#allocation5 + $0x48] sm:$0xf] }
 0x126   :  { %3688 = vmatpush.bf16.msra.mxu3 %v4997_v37  ;;  %v6709_v35 = vld [vmem:[#allocation5 + $0x54] sm:$0xf0]  ;;  %v4660_v36 = vld [vmem:[#allocation5 + $0x148] sm:$0xf]  ;;  %v4933_v37 = vor.u32 %v6809_v26, %v4932_v24 }
 0x127   :  { %3644 = vmatmul.bf16.vlgmr.msrb.gmra.mxu3 %v7270_v61  ;;  %3650 = vmatpush.bf16.msra.mxu0 %v4597_v44  ;;  %v3424_v39 = vpop.f32.mrf.mxu2  ;;  %v6741_v40 = vld [vmem:[#allocation5 + $0x154] sm:$0xf0]  ;;  %v4788_v41 = vld [vmem:[#allocation5 + $0x248] sm:$0xf]  ;;  %v3400_v47 = vpop.f32.mrf.mxu0  ;;  %v4533_v49 = vor.u32 %v6709_v35, %v4532_v33 }
 0x128   :  { %v6773_v42 = vld [vmem:[#allocation5 + $0x254] sm:$0xf0]  ;;  %v3425_v43 = vadd.f32 %v3424_v39, %v3412_v20  ;;  %v4516_v55 = vld [vmem:[#allocation5 + $0x28] sm:$0xf] }
 0x129   :  { %3663 = vmatpush.bf16.msra.mxu1 %v4725_v45  ;;  %3676 = vmatpush.bf16.msra.mxu2 %v4853_v46  ;;  %v4916_v45 = vld [vmem:[#allocation5 + $0x348] sm:$0xf]  ;;  %v6805_v46 = vld [vmem:[#allocation5 + $0x354] sm:$0xf0]  ;;  %v3413_v50 = vpop.f32.mrf.mxu1  ;;  %v4789_v54 = vor.u32 %v6773_v42, %v4788_v41 }
 0x12a   :  { %3689 = vmatpush.bf16.msra.mxu3 %v4981_v53  ;;  %v3437_v44 = vpop.f32.mrf.mxu3  ;;  %v4661_v53 = vor.u32 %v6741_v40, %v4660_v36  ;;  %v6705_v56 = vld [vmem:[#allocation5 + $0x34] sm:$0xf0]  ;;  %v4644_v57 = vld [vmem:[#allocation5 + $0x128] sm:$0xf]  ;;  %v4917_v58 = vor.u32 %v6805_v46, %v4916_v45 }
 0x12b   :  { %3651 = vmatpush.bf16.msra.mxu0 %v4581_v62  ;;  %v7574_v52 = vadd.f32 %v3437_v44, %v3425_v43  ;;  %v6737_v59 = vld [vmem:[#allocation5 + $0x134] sm:$0xf0]  ;;  %v4772_v60 = vld [vmem:[#allocation5 + $0x228] sm:$0xf] }
 0x12c   :  { %v6769_v61 = vld [vmem:[#allocation5 + $0x234] sm:$0xf0]  ;;  %v4900_v62 = vld [vmem:[#allocation5 + $0x328] sm:$0xf]  ;;  %v4645_v3 = vor.u32 %v6737_v59, %v4644_v57 }
 0x12d   :  { %3664 = vmatpush.bf16.msra.mxu1 %v4709_v63  ;;  %3677 = vmatpush.bf16.msra.mxu2 %v4837_v0  ;;  %v6801_v63 = vld [vmem:[#allocation5 + $0x334] sm:$0xf0]  ;;  %v4517_v0 = vor.u32 %v6705_v56, %v4516_v55  ;;  %v4500_v1 = vld [vmem:[#allocation5 + $0x8] sm:$0xf] }
 0x12e   :  { %3690 = vmatpush.bf16.msra.mxu3 %v4965_v4  ;;  %v6701_v2 = vld [vmem:[#allocation5 + $0x14] sm:$0xf0]  ;;  %v4773_v4 = vor.u32 %v6769_v61, %v4772_v60  ;;  %v4628_v5 = vld [vmem:[#allocation5 + $0x108] sm:$0xf]  ;;  %v4901_v8 = vor.u32 %v6801_v63, %v4900_v62 }
 0x12f   :  { %3652 = vmatpush.bf16.msra.mxu0 %v4565_v12  ;;  %v6733_v6 = vld [vmem:[#allocation5 + $0x114] sm:$0xf0]  ;;  %v4756_v7 = vld [vmem:[#allocation5 + $0x208] sm:$0xf]  ;;  %v3426_v12 = vpop.f32.mrf.mxu2  ;;  %v4501_v17 = vor.u32 %v6701_v2, %v4500_v1  ;;  %v7271_v1 = vld [vmem:[#allocation7] sm:$0xf] }
 0x130   :  { %v6765_v9 = vld [vmem:[#allocation5 + $0x214] sm:$0xf0]  ;;  %v4884_v10 = vld [vmem:[#allocation5 + $0x308] sm:$0xf]  ;;  %v4629_v21 = vor.u32 %v6733_v6, %v4628_v5  ;;  %v630_v2 = vperm.slane %v7271_v1, 1 }
 0x131   :  { %3665 = vmatpush.bf16.msra.mxu1 %v4693_v14  ;;  %3678 = vmatpush.bf16.msra.mxu2 %v4821_v15  ;;  %v6797_v11 = vld [vmem:[#allocation5 + $0x314] sm:$0xf0]  ;;  %v5124_v13 = vld [vmem:[#allocation5 + $0x4e8] sm:$0xf]  ;;  %v4757_v22 = vor.u32 %v6765_v9, %v4756_v7 }
 0x132   :  { %3691 = vmatpush.bf16.msra.mxu3 %v4949_v19  ;;  %v6857_v14 = vld [vmem:[#allocation5 + $0x4f4] sm:$0xf0]  ;;  %v5252_v15 = vld [vmem:[#allocation5 + $0x5e8] sm:$0xf]  ;;  %v3439_v16 = vpop.f32.mrf.mxu3  ;;  %v4885_v26 = vor.u32 %v6797_v11, %v4884_v10 }
 0x133   :  { %3653 = vmatpush.bf16.msra.mxu0 %v4549_v48  ;;  %v6889_v18 = vld [vmem:[#allocation5 + $0x5f4] sm:$0xf0]  ;;  %v5380_v19 = vld [vmem:[#allocation5 + $0x6e8] sm:$0xf]  ;;  %v5125_v48 = vor.u32 %v6857_v14, %v5124_v13 }
 0x134   :  { %v6921_v20 = vld [vmem:[#allocation5 + $0x6f4] sm:$0xf0]  ;;  %v5508_v23 = vld [vmem:[#allocation5 + $0x7e8] sm:$0xf] }
 0x135   :  { %3666 = vmatpush.bf16.msra.mxu1 %v4677_v51  ;;  %3679 = vmatpush.bf16.msra.mxu2 %v4805_v30  ;;  %v6953_v24 = vld [vmem:[#allocation5 + $0x7f4] sm:$0xf0]  ;;  %v5253_v51 = vor.u32 %v6889_v18, %v5252_v15  ;;  %v5381_v30 = vor.u32 %v6921_v20, %v5380_v19  ;;  %v5108_v33 = vld [vmem:[#allocation5 + $0x4c8] sm:$0xf] }
 0x136   :  { %3692 = vmatpush.bf16.msra.mxu3 %v4933_v37  ;;  %v6853_v35 = vld [vmem:[#allocation5 + $0x4d4] sm:$0xf0]  ;;  %v5236_v36 = vld [vmem:[#allocation5 + $0x5c8] sm:$0xf]  ;;  %v5509_v37 = vor.u32 %v6953_v24, %v5508_v23 }
 0x137   :  { %3654 = vmatpush.bf16.msra.mxu0 %v4533_v49  ;;  %v6885_v39 = vld [vmem:[#allocation5 + $0x5d4] sm:$0xf0]  ;;  %v5364_v40 = vld [vmem:[#allocation5 + $0x6c8] sm:$0xf]  ;;  %v5109_v44 = vor.u32 %v6853_v35, %v5108_v33 }
 0x138   :  { %v6917_v41 = vld [vmem:[#allocation5 + $0x6d4] sm:$0xf0]  ;;  %v5492_v42 = vld [vmem:[#allocation5 + $0x7c8] sm:$0xf]  ;;  %v5237_v45 = vor.u32 %v6885_v39, %v5236_v36 }
 0x139   :  { %3667 = vmatpush.bf16.msra.mxu1 %v4661_v53  ;;  %3680 = vmatpush.bf16.msra.mxu2 %v4789_v54  ;;  %v6949_v43 = vld [vmem:[#allocation5 + $0x7d4] sm:$0xf0]  ;;  %v5365_v46 = vor.u32 %v6917_v41, %v5364_v40  ;;  %v5092_v47 = vld [vmem:[#allocation5 + $0x4a8] sm:$0xf] }
 0x13a   :  { %3693 = vmatpush.bf16.msra.mxu3 %v4917_v58  ;;  %v6849_v49 = vld [vmem:[#allocation5 + $0x4b4] sm:$0xf0]  ;;  %v5220_v50 = vld [vmem:[#allocation5 + $0x5a8] sm:$0xf]  ;;  %v5493_v53 = vor.u32 %v6949_v43, %v5492_v42 }
 0x13b   :  { %3655 = vmatpush.bf16.msra.mxu0 %v4517_v0  ;;  %v6881_v54 = vld [vmem:[#allocation5 + $0x5b4] sm:$0xf0]  ;;  %v5348_v55 = vld [vmem:[#allocation5 + $0x6a8] sm:$0xf]  ;;  %v5093_v59 = vor.u32 %v6849_v49, %v5092_v47 }
 0x13c   :  { %v6913_v56 = vld [vmem:[#allocation5 + $0x6b4] sm:$0xf0]  ;;  %v5476_v57 = vld [vmem:[#allocation5 + $0x7a8] sm:$0xf]  ;;  %v5221_v61 = vor.u32 %v6881_v54, %v5220_v50 }
 0x13d   :  { %3668 = vmatpush.bf16.msra.mxu1 %v4645_v3  ;;  %3681 = vmatpush.bf16.msra.mxu2 %v4773_v4  ;;  %v6945_v58 = vld [vmem:[#allocation5 + $0x7b4] sm:$0xf0]  ;;  %v5076_v60 = vld [vmem:[#allocation5 + $0x488] sm:$0xf]  ;;  %v5349_v62 = vor.u32 %v6913_v56, %v5348_v55 }
 0x13e   :  { %3694 = vmatpush.bf16.msra.mxu3 %v4901_v8  ;;  %v6845_v63 = vld [vmem:[#allocation5 + $0x494] sm:$0xf0]  ;;  %v5204_v0 = vld [vmem:[#allocation5 + $0x588] sm:$0xf]  ;;  %v5477_v3 = vor.u32 %v6945_v58, %v5476_v57 }
 0x13f   :  { %3656 = vmatpush.bf16.msra.mxu0 %v4501_v17  ;;  %v6877_v4 = vld [vmem:[#allocation5 + $0x594] sm:$0xf0]  ;;  %v5332_v5 = vld [vmem:[#allocation5 + $0x688] sm:$0xf]  ;;  %v5077_v9 = vor.u32 %v6845_v63, %v5076_v60  ;;  %v3450_v10 = vpop.f32.mrf.mxu0 }
 0x140   :  { %v6909_v6 = vld [vmem:[#allocation5 + $0x694] sm:$0xf0]  ;;  %v5460_v7 = vld [vmem:[#allocation5 + $0x788] sm:$0xf]  ;;  %v5205_v11 = vor.u32 %v6877_v4, %v5204_v0  ;;  %v3451_v16 = vadd.f32 %v3450_v10, %v630_v2 }
 0x141   :  { %3669 = vmatpush.bf16.msra.mxu1 %v4629_v21  ;;  %3682 = vmatpush.bf16.msra.mxu2 %v4757_v22  ;;  %v6941_v8 = vld [vmem:[#allocation5 + $0x794] sm:$0xf0]  ;;  %v5333_v12 = vor.u32 %v6909_v6, %v5332_v5  ;;  %v5060_v13 = vld [vmem:[#allocation5 + $0x468] sm:$0xf]  ;;  %v3463_v17 = vpop.f32.mrf.mxu1 }
 0x142   :  { %3695 = vmatpush.bf16.msra.mxu3 %v4885_v26  ;;  %3657 = vmatmul.bf16.vlgmr.msra.gmra.mxu0 %v7538_v28  ;;  %v6841_v14 = vld [vmem:[#allocation5 + $0x474] sm:$0xf0]  ;;  %v5188_v15 = vld [vmem:[#allocation5 + $0x568] sm:$0xf]  ;;  %v5461_v18 = vor.u32 %v6941_v8, %v5460_v7  ;;  %v3464_v24 = vadd.f32 %v3463_v17, %v3451_v16 }
 0x143   :  { %3701 = vmatpush.bf16.msrb.mxu0 %v5125_v48  ;;  %v6873_v19 = vld [vmem:[#allocation5 + $0x574] sm:$0xf0]  ;;  %v5316_v20 = vld [vmem:[#allocation5 + $0x668] sm:$0xf]  ;;  %v5061_v26 = vor.u32 %v6841_v14, %v5060_v13 }
 0x144   :  { %3683 = vmatmul.bf16.vlgmr.msra.gmra.mxu2 %v7536_v27  ;;  %3670 = vmatmul.bf16.vlgmr.msra.gmra.mxu1 %v7542_v34  ;;  %v6905_v21 = vld [vmem:[#allocation5 + $0x674] sm:$0xf0]  ;;  %v5444_v22 = vld [vmem:[#allocation5 + $0x768] sm:$0xf]  ;;  %v5189_v48 = vor.u32 %v6873_v19, %v5188_v15 }
 0x145   :  { %3714 = vmatpush.bf16.msrb.mxu1 %v5253_v51  ;;  %3727 = vmatpush.bf16.msrb.mxu2 %v5381_v30  ;;  %v6937_v23 = vld [vmem:[#allocation5 + $0x774] sm:$0xf0]  ;;  %v5317_v51 = vor.u32 %v6905_v21, %v5316_v20  ;;  %v5044_v30 = vld [vmem:[#allocation5 + $0x448] sm:$0xf] }
 0x146   :  { %3740 = vmatpush.bf16.msrb.mxu3 %v5509_v37  ;;  %v6837_v33 = vld [vmem:[#allocation5 + $0x454] sm:$0xf0]  ;;  %v5172_v35 = vld [vmem:[#allocation5 + $0x548] sm:$0xf]  ;;  %v5445_v37 = vor.u32 %v6937_v23, %v5444_v22 }
 0x147   :  { %3696 = vmatmul.bf16.vlgmr.msra.gmra.mxu3 %v7540_v29  ;;  %3702 = vmatpush.bf16.msrb.mxu0 %v5109_v44  ;;  %v3476_v36 = vpop.f32.mrf.mxu2  ;;  %v6869_v39 = vld [vmem:[#allocation5 + $0x554] sm:$0xf0]  ;;  %v5300_v40 = vld [vmem:[#allocation5 + $0x648] sm:$0xf]  ;;  %v3452_v49 = vpop.f32.mrf.mxu0 }
 0x148   :  { %v6901_v41 = vld [vmem:[#allocation5 + $0x654] sm:$0xf0]  ;;  %v3477_v42 = vadd.f32 %v3476_v36, %v3464_v24  ;;  %v5428_v44 = vld [vmem:[#allocation5 + $0x748] sm:$0xf]  ;;  %v5173_v50 = vor.u32 %v6869_v39, %v5172_v35 }
 0x149   :  { %3715 = vmatpush.bf16.msrb.mxu1 %v5237_v45  ;;  %3728 = vmatpush.bf16.msrb.mxu2 %v5365_v46  ;;  %v6933_v45 = vld [vmem:[#allocation5 + $0x754] sm:$0xf0]  ;;  %v5045_v46 = vor.u32 %v6837_v33, %v5044_v30  ;;  %v5028_v54 = vld [vmem:[#allocation5 + $0x428] sm:$0xf]  ;;  %v3465_v57 = vpop.f32.mrf.mxu1 }
 0x14a   :  { %3741 = vmatpush.bf16.msrb.mxu3 %v5493_v53  ;;  %v3489_v43 = vpop.f32.mrf.mxu3  ;;  %v5301_v53 = vor.u32 %v6901_v41, %v5300_v40  ;;  %v6833_v55 = vld [vmem:[#allocation5 + $0x434] sm:$0xf0]  ;;  %v5156_v56 = vld [vmem:[#allocation5 + $0x528] sm:$0xf]  ;;  %v5429_v58 = vor.u32 %v6933_v45, %v5428_v44 }
 0x14b   :  { %3703 = vmatpush.bf16.msrb.mxu0 %v5093_v59  ;;  %v7580_v47 = vadd.f32 %v3489_v43, %v3477_v42  ;;  %v6865_v59 = vld [vmem:[#allocation5 + $0x534] sm:$0xf0]  ;;  %v5284_v60 = vld [vmem:[#allocation5 + $0x628] sm:$0xf]  ;;  %v5029_v0 = vor.u32 %v6833_v55, %v5028_v54 }
 0x14c   :  { %v6929_v63 = vld [vmem:[#allocation5 + $0x734] sm:$0xf0]  ;;  %v5012_v1 = vld [vmem:[#allocation5 + $0x408] sm:$0xf] }
 0x14d   :  { %3716 = vmatpush.bf16.msrb.mxu1 %v5221_v61  ;;  %3729 = vmatpush.bf16.msrb.mxu2 %v5349_v62  ;;  %v6897_v61 = vld [vmem:[#allocation5 + $0x634] sm:$0xf0]  ;;  %v5412_v62 = vld [vmem:[#allocation5 + $0x728] sm:$0xf] }
 0x14e   :  { %3742 = vmatpush.bf16.msrb.mxu3 %v5477_v3  ;;  %v6829_v2 = vld [vmem:[#allocation5 + $0x414] sm:$0xf0]  ;;  %v5157_v3 = vor.u32 %v6865_v59, %v5156_v56  ;;  %v5285_v4 = vor.u32 %v6897_v61, %v5284_v60  ;;  %v5140_v5 = vld [vmem:[#allocation5 + $0x508] sm:$0xf] }
 0x14f   :  { %3704 = vmatpush.bf16.msrb.mxu0 %v5077_v9  ;;  %v6861_v6 = vld [vmem:[#allocation5 + $0x514] sm:$0xf0]  ;;  %v5268_v7 = vld [vmem:[#allocation5 + $0x608] sm:$0xf]  ;;  %v3478_v8 = vpop.f32.mrf.mxu2  ;;  %v5413_v9 = vor.u32 %v6929_v63, %v5412_v62  ;;  %v5013_v17 = vor.u32 %v6829_v2, %v5012_v1 }
 0x150   :  { %v6893_v10 = vld [vmem:[#allocation5 + $0x614] sm:$0xf0]  ;;  %v5636_v14 = vld [vmem:[#allocation5 + $0x8e8] sm:$0xf]  ;;  %v5141_v21 = vor.u32 %v6861_v6, %v5140_v5 }
 0x151   :  { %3717 = vmatpush.bf16.msrb.mxu1 %v5205_v11  ;;  %3730 = vmatpush.bf16.msrb.mxu2 %v5333_v12  ;;  %v5396_v11 = vld [vmem:[#allocation5 + $0x708] sm:$0xf]  ;;  %v6925_v12 = vld [vmem:[#allocation5 + $0x714] sm:$0xf0]  ;;  %v5269_v22 = vor.u32 %v6893_v10, %v5268_v7 }
 0x152   :  { %3743 = vmatpush.bf16.msrb.mxu3 %v5461_v18  ;;  %v3491_v13 = vpop.f32.mrf.mxu3  ;;  %v6985_v15 = vld [vmem:[#allocation5 + $0x8f4] sm:$0xf0]  ;;  %v5764_v16 = vld [vmem:[#allocation5 + $0x9e8] sm:$0xf] }
 0x153   :  { %3705 = vmatpush.bf16.msrb.mxu0 %v5061_v26  ;;  %v7017_v18 = vld [vmem:[#allocation5 + $0x9f4] sm:$0xf0]  ;;  %v5892_v19 = vld [vmem:[#allocation5 + $0xae8] sm:$0xf]  ;;  %v5397_v26 = vor.u32 %v6925_v12, %v5396_v11 }
 0x154   :  { %v7049_v20 = vld [vmem:[#allocation5 + $0xaf4] sm:$0xf0]  ;;  %v6020_v23 = vld [vmem:[#allocation5 + $0xbe8] sm:$0xf] }
 0x155   :  { %3718 = vmatpush.bf16.msrb.mxu1 %v5189_v48  ;;  %3731 = vmatpush.bf16.msrb.mxu2 %v5317_v51  ;;  %v7081_v24 = vld [vmem:[#allocation5 + $0xbf4] sm:$0xf0]  ;;  %v5637_v48 = vor.u32 %v6985_v15, %v5636_v14  ;;  %v5765_v51 = vor.u32 %v7017_v18, %v5764_v16  ;;  %v5893_v30 = vor.u32 %v7049_v20, %v5892_v19  ;;  %v5620_v33 = vld [vmem:[#allocation5 + $0x8c8] sm:$0xf] }
 0x156   :  { %3744 = vmatpush.bf16.msrb.mxu3 %v5445_v37  ;;  %v6981_v35 = vld [vmem:[#allocation5 + $0x8d4] sm:$0xf0]  ;;  %v5748_v36 = vld [vmem:[#allocation5 + $0x9c8] sm:$0xf]  ;;  %v6021_v37 = vor.u32 %v7081_v24, %v6020_v23 }
 0x157   :  { %3706 = vmatpush.bf16.msrb.mxu0 %v5045_v46  ;;  %v7013_v39 = vld [vmem:[#allocation5 + $0x9d4] sm:$0xf0]  ;;  %v5876_v40 = vld [vmem:[#allocation5 + $0xac8] sm:$0xf]  ;;  %v5621_v44 = vor.u32 %v6981_v35, %v5620_v33 }
 0x158   :  { %v7045_v41 = vld [vmem:[#allocation5 + $0xad4] sm:$0xf0]  ;;  %v6004_v42 = vld [vmem:[#allocation5 + $0xbc8] sm:$0xf]  ;;  %v5749_v45 = vor.u32 %v7013_v39, %v5748_v36 }
 0x159   :  { %3719 = vmatpush.bf16.msrb.mxu1 %v5173_v50  ;;  %3732 = vmatpush.bf16.msrb.mxu2 %v5301_v53  ;;  %v7077_v43 = vld [vmem:[#allocation5 + $0xbd4] sm:$0xf0]  ;;  %v5877_v46 = vor.u32 %v7045_v41, %v5876_v40  ;;  %v5604_v49 = vld [vmem:[#allocation5 + $0x8a8] sm:$0xf] }
 0x15a   :  { %3745 = vmatpush.bf16.msrb.mxu3 %v5429_v58  ;;  %v6977_v50 = vld [vmem:[#allocation5 + $0x8b4] sm:$0xf0]  ;;  %v5732_v53 = vld [vmem:[#allocation5 + $0x9a8] sm:$0xf]  ;;  %v6005_v54 = vor.u32 %v7077_v43, %v6004_v42 }
 0x15b   :  { %3707 = vmatpush.bf16.msrb.mxu0 %v5029_v0  ;;  %v7009_v55 = vld [vmem:[#allocation5 + $0x9b4] sm:$0xf0]  ;;  %v5860_v56 = vld [vmem:[#allocation5 + $0xaa8] sm:$0xf]  ;;  %v5605_v60 = vor.u32 %v6977_v50, %v5604_v49 }
 0x15c   :  { %v7041_v57 = vld [vmem:[#allocation5 + $0xab4] sm:$0xf0]  ;;  %v5988_v58 = vld [vmem:[#allocation5 + $0xba8] sm:$0xf]  ;;  %v5733_v61 = vor.u32 %v7009_v55, %v5732_v53 }
 0x15d   :  { %3720 = vmatpush.bf16.msrb.mxu1 %v5157_v3  ;;  %3733 = vmatpush.bf16.msrb.mxu2 %v5285_v4  ;;  %v7073_v59 = vld [vmem:[#allocation5 + $0xbb4] sm:$0xf0]  ;;  %v5861_v62 = vor.u32 %v7041_v57, %v5860_v56  ;;  %v5588_v63 = vld [vmem:[#allocation5 + $0x888] sm:$0xf] }
 0x15e   :  { %3746 = vmatpush.bf16.msrb.mxu3 %v5413_v9  ;;  %v6973_v0 = vld [vmem:[#allocation5 + $0x894] sm:$0xf0]  ;;  %v5716_v1 = vld [vmem:[#allocation5 + $0x988] sm:$0xf]  ;;  %v5989_v2 = vor.u32 %v7073_v59, %v5988_v58 }
 0x15f   :  { %3708 = vmatpush.bf16.msrb.mxu0 %v5013_v17  ;;  %v7005_v3 = vld [vmem:[#allocation5 + $0x994] sm:$0xf0]  ;;  %v5844_v4 = vld [vmem:[#allocation5 + $0xa88] sm:$0xf]  ;;  %v5589_v8 = vor.u32 %v6973_v0, %v5588_v63  ;;  %v3502_v9 = vpop.f32.mrf.mxu0 }
 0x160   :  { %v7037_v5 = vld [vmem:[#allocation5 + $0xa94] sm:$0xf0]  ;;  %v5972_v6 = vld [vmem:[#allocation5 + $0xb88] sm:$0xf]  ;;  %v5717_v10 = vor.u32 %v7005_v3, %v5716_v1  ;;  %v3503_v15 = vadd.f32 %v3502_v9, %v7580_v47 }
 0x161   :  { %3721 = vmatpush.bf16.msrb.mxu1 %v5141_v21  ;;  %3734 = vmatpush.bf16.msrb.mxu2 %v5269_v22  ;;  %v7069_v7 = vld [vmem:[#allocation5 + $0xb94] sm:$0xf0]  ;;  %v5845_v11 = vor.u32 %v7037_v5, %v5844_v4  ;;  %v5572_v12 = vld [vmem:[#allocation5 + $0x868] sm:$0xf]  ;;  %v3515_v16 = vpop.f32.mrf.mxu1 }
 0x162   :  { %3747 = vmatpush.bf16.msrb.mxu3 %v5397_v26  ;;  %3709 = vmatmul.bf16.vlgmr.msrb.gmra.mxu0 %v7550_v31  ;;  %v6969_v13 = vld [vmem:[#allocation5 + $0x874] sm:$0xf0]  ;;  %v5700_v14 = vld [vmem:[#allocation5 + $0x968] sm:$0xf]  ;;  %v5973_v17 = vor.u32 %v7069_v7, %v5972_v6  ;;  %v3516_v23 = vadd.f32 %v3515_v16, %v3503_v15 }
 0x163   :  { %3753 = vmatpush.bf16.msra.mxu0 %v5637_v48  ;;  %v7001_v18 = vld [vmem:[#allocation5 + $0x974] sm:$0xf0]  ;;  %v5828_v19 = vld [vmem:[#allocation5 + $0xa68] sm:$0xf]  ;;  %v5573_v24 = vor.u32 %v6969_v13, %v5572_v12 }
 0x164   :  { %3735 = vmatmul.bf16.vlgmr.msrb.gmra.mxu2 %v7548_v25  ;;  %3722 = vmatmul.bf16.vlgmr.msrb.gmra.mxu1 %v7554_v38  ;;  %v7033_v20 = vld [vmem:[#allocation5 + $0xa74] sm:$0xf0]  ;;  %v5956_v21 = vld [vmem:[#allocation5 + $0xb68] sm:$0xf]  ;;  %v5701_v26 = vor.u32 %v7001_v18, %v5700_v14 }
 0x165   :  { %3766 = vmatpush.bf16.msra.mxu1 %v5765_v51  ;;  %3779 = vmatpush.bf16.msra.mxu2 %v5893_v30  ;;  %v7065_v22 = vld [vmem:[#allocation5 + $0xb74] sm:$0xf0]  ;;  %v5829_v48 = vor.u32 %v7033_v20, %v5828_v19  ;;  %v5556_v51 = vld [vmem:[#allocation5 + $0x848] sm:$0xf] }
 0x166   :  { %3792 = vmatpush.bf16.msra.mxu3 %v6021_v37  ;;  %v6965_v30 = vld [vmem:[#allocation5 + $0x854] sm:$0xf0]  ;;  %v5684_v33 = vld [vmem:[#allocation5 + $0x948] sm:$0xf]  ;;  %v5957_v47 = vor.u32 %v7065_v22, %v5956_v21 }
 0x167   :  { %3748 = vmatmul.bf16.vlgmr.msrb.gmra.mxu3 %v7552_v32  ;;  %3754 = vmatpush.bf16.msra.mxu0 %v5621_v44  ;;  %v3528_v35 = vpop.f32.mrf.mxu2  ;;  %v6997_v36 = vld [vmem:[#allocation5 + $0x954] sm:$0xf0]  ;;  %v5812_v37 = vld [vmem:[#allocation5 + $0xa48] sm:$0xf]  ;;  %v5557_v44 = vor.u32 %v6965_v30, %v5556_v51 }
 0x168   :  { %v7029_v39 = vld [vmem:[#allocation5 + $0xa54] sm:$0xf0]  ;;  %v3529_v40 = vadd.f32 %v3528_v35, %v3516_v23  ;;  %v5940_v42 = vld [vmem:[#allocation5 + $0xb48] sm:$0xf]  ;;  %v5685_v49 = vor.u32 %v6997_v36, %v5684_v33 }
 0x169   :  { %3767 = vmatpush.bf16.msra.mxu1 %v5749_v45  ;;  %3780 = vmatpush.bf16.msra.mxu2 %v5877_v46  ;;  %v7061_v43 = vld [vmem:[#allocation5 + $0xb54] sm:$0xf0]  ;;  %v3504_v46 = vpop.f32.mrf.mxu0  ;;  %v5813_v50 = vor.u32 %v7029_v39, %v5812_v37  ;;  %v5540_v53 = vld [vmem:[#allocation5 + $0x828] sm:$0xf]  ;;  %v3517_v56 = vpop.f32.mrf.mxu1 }
 0x16a   :  { %3793 = vmatpush.bf16.msra.mxu3 %v6005_v54  ;;  %v3541_v41 = vpop.f32.mrf.mxu3  ;;  %v6961_v54 = vld [vmem:[#allocation5 + $0x834] sm:$0xf0]  ;;  %v5668_v55 = vld [vmem:[#allocation5 + $0x928] sm:$0xf]  ;;  %v5941_v57 = vor.u32 %v7061_v43, %v5940_v42 }
 0x16b   :  { %3755 = vmatpush.bf16.msra.mxu0 %v5605_v60  ;;  %v7587_v45 = vadd.f32 %v3541_v41, %v3529_v40  ;;  %v6993_v58 = vld [vmem:[#allocation5 + $0x934] sm:$0xf0]  ;;  %v5796_v59 = vld [vmem:[#allocation5 + $0xa28] sm:$0xf]  ;;  %v5541_v63 = vor.u32 %v6961_v54, %v5540_v53 }
 0x16c   :  { %v7025_v60 = vld [vmem:[#allocation5 + $0xa34] sm:$0xf0]  ;;  %v5524_v0 = vld [vmem:[#allocation5 + $0x808] sm:$0xf] }
 0x16d   :  { %3768 = vmatpush.bf16.msra.mxu1 %v5733_v61  ;;  %3781 = vmatpush.bf16.msra.mxu2 %v5861_v62  ;;  %v5924_v61 = vld [vmem:[#allocation5 + $0xb28] sm:$0xf]  ;;  %v7057_v62 = vld [vmem:[#allocation5 + $0xb34] sm:$0xf0]  ;;  %v5797_v3 = vor.u32 %v7025_v60, %v5796_v59 }
 0x16e   :  { %3794 = vmatpush.bf16.msra.mxu3 %v5989_v2  ;;  %v6957_v1 = vld [vmem:[#allocation5 + $0x814] sm:$0xf0]  ;;  %v5669_v2 = vor.u32 %v6993_v58, %v5668_v55  ;;  %v5652_v4 = vld [vmem:[#allocation5 + $0x908] sm:$0xf] }
 0x16f   :  { %3756 = vmatpush.bf16.msra.mxu0 %v5589_v8  ;;  %v6989_v5 = vld [vmem:[#allocation5 + $0x914] sm:$0xf0]  ;;  %v5780_v6 = vld [vmem:[#allocation5 + $0xa08] sm:$0xf]  ;;  %v3530_v7 = vpop.f32.mrf.mxu2  ;;  %v5925_v8 = vor.u32 %v7057_v62, %v5924_v61  ;;  %v5525_v16 = vor.u32 %v6957_v1, %v5524_v0 }
 0x170   :  { %v7021_v9 = vld [vmem:[#allocation5 + $0xa14] sm:$0xf0]  ;;  %v6148_v13 = vld [vmem:[#allocation5 + $0xce8] sm:$0xf]  ;;  %v5653_v20 = vor.u32 %v6989_v5, %v5652_v4 }
 0x171   :  { %3769 = vmatpush.bf16.msra.mxu1 %v5717_v10  ;;  %3782 = vmatpush.bf16.msra.mxu2 %v5845_v11  ;;  %v5908_v10 = vld [vmem:[#allocation5 + $0xb08] sm:$0xf]  ;;  %v7053_v11 = vld [vmem:[#allocation5 + $0xb14] sm:$0xf0]  ;;  %v5781_v21 = vor.u32 %v7021_v9, %v5780_v6 }
 0x172   :  { %3795 = vmatpush.bf16.msra.mxu3 %v5973_v17  ;;  %v3543_v12 = vpop.f32.mrf.mxu3  ;;  %v7113_v14 = vld [vmem:[#allocation5 + $0xcf4] sm:$0xf0]  ;;  %v6276_v15 = vld [vmem:[#allocation5 + $0xde8] sm:$0xf] }
 0x173   :  { %3757 = vmatpush.bf16.msra.mxu0 %v5573_v24  ;;  %v7145_v17 = vld [vmem:[#allocation5 + $0xdf4] sm:$0xf0]  ;;  %v6404_v18 = vld [vmem:[#allocation5 + $0xee8] sm:$0xf]  ;;  %v5909_v24 = vor.u32 %v7053_v11, %v5908_v10 }
 0x174   :  { %v7177_v19 = vld [vmem:[#allocation5 + $0xef4] sm:$0xf0]  ;;  %v6532_v22 = vld [vmem:[#allocation5 + $0xfe8] sm:$0xf] }
 0x175   :  { %3770 = vmatpush.bf16.msra.mxu1 %v5701_v26  ;;  %3783 = vmatpush.bf16.msra.mxu2 %v5829_v48  ;;  %v7209_v23 = vld [vmem:[#allocation5 + $0xff4] sm:$0xf0]  ;;  %v6149_v26 = vor.u32 %v7113_v14, %v6148_v13  ;;  %v6277_v48 = vor.u32 %v7145_v17, %v6276_v15  ;;  %v6405_v51 = vor.u32 %v7177_v19, %v6404_v18  ;;  %v6132_v30 = vld [vmem:[#allocation5 + $0xcc8] sm:$0xf] }
 0x176   :  { %3796 = vmatpush.bf16.msra.mxu3 %v5957_v47  ;;  %v7109_v33 = vld [vmem:[#allocation5 + $0xcd4] sm:$0xf0]  ;;  %v6260_v35 = vld [vmem:[#allocation5 + $0xdc8] sm:$0xf]  ;;  %v6533_v47 = vor.u32 %v7209_v23, %v6532_v22 }
 0x177   :  { %3758 = vmatpush.bf16.msra.mxu0 %v5557_v44  ;;  %v7141_v36 = vld [vmem:[#allocation5 + $0xdd4] sm:$0xf0]  ;;  %v6388_v37 = vld [vmem:[#allocation5 + $0xec8] sm:$0xf]  ;;  %v6133_v42 = vor.u32 %v7109_v33, %v6132_v30 }
 0x178   :  { %v7173_v39 = vld [vmem:[#allocation5 + $0xed4] sm:$0xf0]  ;;  %v6516_v40 = vld [vmem:[#allocation5 + $0xfc8] sm:$0xf]  ;;  %v6261_v43 = vor.u32 %v7141_v36, %v6260_v35 }
 0x179   :  { %3771 = vmatpush.bf16.msra.mxu1 %v5685_v49  ;;  %3784 = vmatpush.bf16.msra.mxu2 %v5813_v50  ;;  %v7205_v41 = vld [vmem:[#allocation5 + $0xfd4] sm:$0xf0]  ;;  %v6389_v44 = vor.u32 %v7173_v39, %v6388_v37  ;;  %v6116_v46 = vld [vmem:[#allocation5 + $0xca8] sm:$0xf] }
 0x17a   :  { %3797 = vmatpush.bf16.msra.mxu3 %v5941_v57  ;;  %v7105_v49 = vld [vmem:[#allocation5 + $0xcb4] sm:$0xf0]  ;;  %v6244_v50 = vld [vmem:[#allocation5 + $0xda8] sm:$0xf]  ;;  %v6517_v54 = vor.u32 %v7205_v41, %v6516_v40 }
 0x17b   :  { %3759 = vmatpush.bf16.msra.mxu0 %v5541_v63  ;;  %v7272_v53 = vld [vmem:[#allocation1] sm:$0xff]  ;;  %v7137_v55 = vld [vmem:[#allocation5 + $0xdb4] sm:$0xf0]  ;;  %v6117_v63 = vor.u32 %v7105_v49, %v6116_v46 }
 0x17c   :  { %v6372_v56 = vld [vmem:[#allocation5 + $0xea8] sm:$0xf]  ;;  %v7169_v57 = vld [vmem:[#allocation5 + $0xeb4] sm:$0xf0]  ;;  %v6245_v0 = vor.u32 %v7137_v55, %v6244_v50 }
 0x17d   :  { %3772 = vmatpush.bf16.msra.mxu1 %v5669_v2  ;;  %3785 = vmatpush.bf16.msra.mxu2 %v5797_v3  ;;  %v7273_v58 = vld [vmem:[#allocation1 + $0x12] sm:$0xff]  ;;  %v7274_v59 = vld [vmem:[#allocation1 + $0x9] sm:$0xff]  ;;  %v6500_v60 = vld [vmem:[#allocation5 + $0xfa8] sm:$0xf]  ;;  %v6373_v1 = vor.u32 %v7169_v57, %v6372_v56 }
 0x17e   :  { %3798 = vmatpush.bf16.msra.mxu3 %v5925_v8  ;;  %v7201_v61 = vld [vmem:[#allocation5 + $0xfb4] sm:$0xf0]  ;;  %v7275_v62 = vld [vmem:[#allocation1 + $0x1b] sm:$0xff] }
 0x17f   :  { %3760 = vmatpush.bf16.msra.mxu0 %v5525_v16  ;;  %v6100_v2 = vld [vmem:[#allocation5 + $0xc88] sm:$0xf]  ;;  %v7101_v3 = vld [vmem:[#allocation5 + $0xc94] sm:$0xf0]  ;;  %v6501_v5 = vor.u32 %v7201_v61, %v6500_v60  ;;  %v3554_v9 = vpop.f32.mrf.mxu0 }
 0x180   :  { %v6228_v4 = vld [vmem:[#allocation5 + $0xd88] sm:$0xf]  ;;  %v7133_v6 = vld [vmem:[#allocation5 + $0xd94] sm:$0xf0]  ;;  %v3555_v12 = vadd.f32 %v3554_v9, %v7587_v45  ;;  %v6101_v13 = vor.u32 %v7101_v3, %v6100_v2 }
 0x181   :  { %3773 = vmatpush.bf16.msra.mxu1 %v5653_v20  ;;  %3786 = vmatpush.bf16.msra.mxu2 %v5781_v21  ;;  %v6356_v7 = vld [vmem:[#allocation5 + $0xe88] sm:$0xf]  ;;  %v7165_v8 = vld [vmem:[#allocation5 + $0xe94] sm:$0xf0]  ;;  %v3567_v14 = vpop.f32.mrf.mxu1  ;;  %v6229_v15 = vor.u32 %v7133_v6, %v6228_v4 }
 0x182   :  { %3799 = vmatpush.bf16.msra.mxu3 %v5909_v24  ;;  %3761 = vmatmul.bf16.vlgmr.msra.gmra.mxu0 %v7272_v53  ;;  %v6484_v10 = vld [vmem:[#allocation5 + $0xf88] sm:$0xf]  ;;  %v7197_v11 = vld [vmem:[#allocation5 + $0xf94] sm:$0xf0]  ;;  %v6357_v16 = vor.u32 %v7165_v8, %v6356_v7  ;;  %v3568_v21 = vadd.f32 %v3567_v14, %v3555_v12 }
 0x183   :  { %3805 = vmatpush.bf16.msrb.mxu0 %v6149_v26  ;;  %v6084_v17 = vld [vmem:[#allocation5 + $0xc68] sm:$0xf]  ;;  %v7097_v18 = vld [vmem:[#allocation5 + $0xc74] sm:$0xf0]  ;;  %v6485_v20 = vor.u32 %v7197_v11, %v6484_v10 }
 0x184   :  { %3787 = vmatmul.bf16.vlgmr.msra.gmra.mxu2 %v7273_v58  ;;  %3774 = vmatmul.bf16.vlgmr.msra.gmra.mxu1 %v7274_v59  ;;  %v6212_v19 = vld [vmem:[#allocation5 + $0xd68] sm:$0xf]  ;;  %v7129_v22 = vld [vmem:[#allocation5 + $0xd74] sm:$0xf0] }
 0x185   :  { %3818 = vmatpush.bf16.msrb.mxu1 %v6277_v48  ;;  %3831 = vmatpush.bf16.msrb.mxu2 %v6405_v51  ;;  %v6340_v23 = vld [vmem:[#allocation5 + $0xe68] sm:$0xf]  ;;  %v7161_v24 = vld [vmem:[#allocation5 + $0xe74] sm:$0xf0]  ;;  %v6085_v51 = vor.u32 %v7097_v18, %v6084_v17  ;;  %v6213_v45 = vor.u32 %v7129_v22, %v6212_v19  ;;  %v6759_v17 = vld [vmem:[#allocation5 + $0x1ec] sm:$0xf] }
 0x186   :  { %3844 = vmatpush.bf16.msrb.mxu3 %v6533_v47  ;;  %v6468_v26 = vld [vmem:[#allocation5 + $0xf68] sm:$0xf]  ;;  %v7193_v48 = vld [vmem:[#allocation5 + $0xf74] sm:$0xf0]  ;;  %v6341_v30 = vor.u32 %v7161_v24, %v6340_v23  ;;  %v4870_v22 = vld [vmem:[#allocation5 + $0x2f8] sm:$0xf0] }
 0x187   :  { %3800 = vmatmul.bf16.vlgmr.msra.gmra.mxu3 %v7275_v62  ;;  %3806 = vmatpush.bf16.msrb.mxu0 %v6133_v42  ;;  %v6068_v33 = vld [vmem:[#allocation5 + $0xc48] sm:$0xf]  ;;  %v7093_v35 = vld [vmem:[#allocation5 + $0xc54] sm:$0xf0]  ;;  %v6469_v36 = vor.u32 %v7193_v48, %v6468_v26  ;;  %v3580_v37 = vpop.f32.mrf.mxu2  ;;  %v3556_v49 = vpop.f32.mrf.mxu0  ;;  %v6823_v26 = vld [vmem:[#allocation5 + $0x3ec] sm:$0xf] }
 0x188   :  { %v6196_v47 = vld [vmem:[#allocation5 + $0xd48] sm:$0xf]  ;;  %v7125_v39 = vld [vmem:[#allocation5 + $0xd54] sm:$0xf0]  ;;  %v3581_v42 = vadd.f32 %v3580_v37, %v3568_v21  ;;  %v6069_v50 = vor.u32 %v7093_v35, %v6068_v33  ;;  %v6791_v21 = vld [vmem:[#allocation5 + $0x2ec] sm:$0xf] }
 0x189   :  { %3819 = vmatpush.bf16.msrb.mxu1 %v6261_v43  ;;  %3832 = vmatpush.bf16.msrb.mxu2 %v6389_v44  ;;  %v6324_v40 = vld [vmem:[#allocation5 + $0xe48] sm:$0xf]  ;;  %v7157_v41 = vld [vmem:[#allocation5 + $0xe54] sm:$0xf0]  ;;  %v3569_v53 = vpop.f32.mrf.mxu1  ;;  %v6197_v55 = vor.u32 %v7125_v39, %v6196_v47  ;;  %v4998_v48 = vld [vmem:[#allocation5 + $0x3f8] sm:$0xf0]  ;;  %v4873_v33 = vor.u32 %v6791_v21, %v4870_v22 }
 0x18a   :  { %3845 = vmatpush.bf16.msrb.mxu3 %v6517_v54  ;;  %v3593_v43 = vpop.f32.mrf.mxu3  ;;  %v6452_v44 = vld [vmem:[#allocation5 + $0xf48] sm:$0xf]  ;;  %v7189_v46 = vld [vmem:[#allocation5 + $0xf54] sm:$0xf0]  ;;  %v6325_v56 = vor.u32 %v7157_v41, %v6324_v40  ;;  %v6723_v35 = vld [vmem:[#allocation5 + $0xcc] sm:$0xf]  ;;  %v5001_v37 = vor.u32 %v6823_v26, %v4998_v48 }
 0x18b   :  { %3807 = vmatpush.bf16.msrb.mxu0 %v6117_v63  ;;  %v7590_v54 = vadd.f32 %v3593_v43, %v3581_v42  ;;  %v6052_v57 = vld [vmem:[#allocation5 + $0xc28] sm:$0xf]  ;;  %v7089_v58 = vld [vmem:[#allocation5 + $0xc34] sm:$0xf0]  ;;  %v6453_v60 = vor.u32 %v7189_v46, %v6452_v44  ;;  %v4598_v47 = vld [vmem:[#allocation5 + $0xd8] sm:$0xf0] }
 0x18c   :  { %v6180_v59 = vld [vmem:[#allocation5 + $0xd28] sm:$0xf]  ;;  %v7121_v61 = vld [vmem:[#allocation5 + $0xd34] sm:$0xf0]  ;;  %v6053_v2 = vor.u32 %v7089_v58, %v6052_v57  ;;  %v4726_v39 = vld [vmem:[#allocation5 + $0x1d8] sm:$0xf0]  ;;  %v4601_v44 = vor.u32 %v6723_v35, %v4598_v47 }
 0x18d   :  { %3820 = vmatpush.bf16.msrb.mxu1 %v6245_v0  ;;  %3833 = vmatpush.bf16.msrb.mxu2 %v6373_v1  ;;  %v6308_v62 = vld [vmem:[#allocation5 + $0xe28] sm:$0xf]  ;;  %v7153_v63 = vld [vmem:[#allocation5 + $0xe34] sm:$0xf0]  ;;  %v6787_v40 = vld [vmem:[#allocation5 + $0x2cc] sm:$0xf] }
 0x18e   :  { %3846 = vmatpush.bf16.msrb.mxu3 %v6501_v5  ;;  %v6436_v0 = vld [vmem:[#allocation5 + $0xf28] sm:$0xf]  ;;  %v7185_v1 = vld [vmem:[#allocation5 + $0xf34] sm:$0xf0]  ;;  %v6181_v5 = vor.u32 %v7121_v61, %v6180_v59  ;;  %v6309_v6 = vor.u32 %v7153_v63, %v6308_v62  ;;  %v4854_v41 = vld [vmem:[#allocation5 + $0x2d8] sm:$0xf0] }
 0x18f   :  { %3808 = vmatpush.bf16.msrb.mxu0 %v6101_v13  ;;  %v6036_v3 = vld [vmem:[#allocation5 + $0xc08] sm:$0xf]  ;;  %v7085_v4 = vld [vmem:[#allocation5 + $0xc14] sm:$0xf0]  ;;  %v6437_v10 = vor.u32 %v7185_v1, %v6436_v0  ;;  %v3582_v14 = vpop.f32.mrf.mxu2  ;;  %v6819_v42 = vld [vmem:[#allocation5 + $0x3cc] sm:$0xf]  ;;  %v4857_v49 = vor.u32 %v6787_v40, %v4854_v41 }
 0x190   :  { %v6164_v7 = vld [vmem:[#allocation5 + $0xd08] sm:$0xf]  ;;  %v7117_v8 = vld [vmem:[#allocation5 + $0xd14] sm:$0xf0]  ;;  %v6037_v19 = vor.u32 %v7085_v4, %v6036_v3  ;;  %v4982_v43 = vld [vmem:[#allocation5 + $0x3d8] sm:$0xf0] }
 0x191   :  { %3821 = vmatpush.bf16.msrb.mxu1 %v6229_v15  ;;  %3834 = vmatpush.bf16.msrb.mxu2 %v6357_v16  ;;  %v6292_v9 = vld [vmem:[#allocation5 + $0xe08] sm:$0xf]  ;;  %v7149_v11 = vld [vmem:[#allocation5 + $0xe14] sm:$0xf0]  ;;  %v6727_v15 = vld [vmem:[#allocation5 + $0xec] sm:$0xf]  ;;  %v6165_v23 = vor.u32 %v7117_v8, %v6164_v7  ;;  %v4985_v57 = vor.u32 %v6819_v42, %v4982_v43 }
 0x192   :  { %3847 = vmatpush.bf16.msrb.mxu3 %v6485_v20  ;;  %v6420_v12 = vld [vmem:[#allocation5 + $0xf08] sm:$0xf]  ;;  %v7181_v13 = vld [vmem:[#allocation5 + $0xf14] sm:$0xf0]  ;;  %v4614_v16 = vld [vmem:[#allocation5 + $0xf8] sm:$0xf0]  ;;  %v3595_v18 = vpop.f32.mrf.mxu3  ;;  %v6293_v24 = vor.u32 %v7149_v11, %v6292_v9 }
 0x193   :  { %3809 = vmatpush.bf16.msrb.mxu0 %v6085_v51  ;;  %v4742_v20 = vld [vmem:[#allocation5 + $0x1f8] sm:$0xf0]  ;;  %v6421_v51 = vor.u32 %v7181_v13, %v6420_v12  ;;  %v6783_v59 = vld [vmem:[#allocation5 + $0x2ac] sm:$0xf] }
 0x194   :  { %v4582_v53 = vld [vmem:[#allocation5 + $0xb8] sm:$0xf0]  ;;  %v6815_v63 = vld [vmem:[#allocation5 + $0x3ac] sm:$0xf] }
 0x195   :  { %3822 = vmatpush.bf16.msrb.mxu1 %v6213_v45  ;;  %3835 = vmatpush.bf16.msrb.mxu2 %v6341_v30  ;;  %v4617_v45 = vor.u32 %v6727_v15, %v4614_v16  ;;  %v4745_v30 = vor.u32 %v6759_v17, %v4742_v20  ;;  %v4710_v58 = vld [vmem:[#allocation5 + $0x1b8] sm:$0xf0]  ;;  %v7279_v1 = vld [vmem:[#allocation1 + $0x3f] sm:$0xff] }
 0x196   :  { %3848 = vmatpush.bf16.msrb.mxu3 %v6469_v36  ;;  %v6755_v36 = vld [vmem:[#allocation5 + $0x1cc] sm:$0xf]  ;;  %v7277_v61 = vld [vmem:[#allocation1 + $0x36] sm:$0xff]  ;;  %v7278_v62 = vld [vmem:[#allocation1 + $0x2d] sm:$0xff] }
 0x197   :  { %3810 = vmatpush.bf16.msrb.mxu0 %v6069_v50  ;;  %v4729_v46 = vor.u32 %v6755_v36, %v4726_v39  ;;  %v6719_v50 = vld [vmem:[#allocation5 + $0xac] sm:$0xf]  ;;  %v4966_v0 = vld [vmem:[#allocation5 + $0x3b8] sm:$0xf0] }
 0x198   :  { %v6747_v7 = vld [vmem:[#allocation5 + $0x18c] sm:$0xf]  ;;  %v4969_v8 = vor.u32 %v6815_v63, %v4966_v0  ;;  %v4694_v9 = vld [vmem:[#allocation5 + $0x198] sm:$0xf0] }
 0x199   :  { %3823 = vmatpush.bf16.msrb.mxu1 %v6197_v55  ;;  %3836 = vmatpush.bf16.msrb.mxu2 %v6325_v56  ;;  %v6751_v55 = vld [vmem:[#allocation5 + $0x1ac] sm:$0xf]  ;;  %v4822_v11 = vld [vmem:[#allocation5 + $0x298] sm:$0xf0]  ;;  %v4697_v18 = vor.u32 %v6747_v7, %v4694_v9 }
 0x19a   :  { %3849 = vmatpush.bf16.msrb.mxu3 %v6453_v60  ;;  %v7276_v56 = vld [vmem:[#allocation1 + $0x24] sm:$0xff]  ;;  %v4838_v60 = vld [vmem:[#allocation5 + $0x2b8] sm:$0xf0]  ;;  %v4713_v3 = vor.u32 %v6751_v55, %v4710_v58 }
 0x19b   :  { %3811 = vmatpush.bf16.msrb.mxu0 %v6053_v2  ;;  %v4585_v2 = vor.u32 %v6719_v50, %v4582_v53  ;;  %v4841_v4 = vor.u32 %v6783_v59, %v4838_v60  ;;  %v6811_v13 = vld [vmem:[#allocation5 + $0x38c] sm:$0xf]  ;;  %v4950_v14 = vld [vmem:[#allocation5 + $0x398] sm:$0xf0] }
 0x19c   :  { %v6711_v20 = vld [vmem:[#allocation5 + $0x6c] sm:$0xf]  ;;  %v4550_v21 = vld [vmem:[#allocation5 + $0x78] sm:$0xf0] }
 0x19d   :  { %3824 = vmatpush.bf16.msrb.mxu1 %v6181_v5  ;;  %3837 = vmatpush.bf16.msrb.mxu2 %v6309_v6  ;;  %v6715_v5 = vld [vmem:[#allocation5 + $0x8c] sm:$0xf]  ;;  %v4566_v6 = vld [vmem:[#allocation5 + $0x98] sm:$0xf0] }
 0x19e   :  { %3850 = vmatpush.bf16.msrb.mxu3 %v6437_v10  ;;  %v6779_v10 = vld [vmem:[#allocation5 + $0x28c] sm:$0xf]  ;;  %v4569_v16 = vor.u32 %v6715_v5, %v4566_v6  ;;  %v4678_v26 = vld [vmem:[#allocation5 + $0x178] sm:$0xf0] }
 0x19f   :  { %3812 = vmatpush.bf16.msrb.mxu0 %v6037_v19  ;;  %v3606_v12 = vpop.f32.mrf.mxu0  ;;  %v4825_v19 = vor.u32 %v6779_v10, %v4822_v11  ;;  %v6743_v22 = vld [vmem:[#allocation5 + $0x16c] sm:$0xf]  ;;  %v4534_v36 = vld [vmem:[#allocation5 + $0x58] sm:$0xf0] }
 0x1a0   :  { %v3607_v15 = vadd.f32 %v3606_v12, %v7590_v54  ;;  %v6775_v48 = vld [vmem:[#allocation5 + $0x26c] sm:$0xf]  ;;  %v4681_v54 = vor.u32 %v6743_v22, %v4678_v26  ;;  %v4662_v41 = vld [vmem:[#allocation5 + $0x158] sm:$0xf0] }
 0x1a1   :  { %3825 = vmatpush.bf16.msrb.mxu1 %v6165_v23  ;;  %3838 = vmatpush.bf16.msrb.mxu2 %v6293_v24  ;;  %v3619_v17 = vpop.f32.mrf.mxu1  ;;  %v4953_v23 = vor.u32 %v6811_v13, %v4950_v14  ;;  %v6707_v47 = vld [vmem:[#allocation5 + $0x4c] sm:$0xf]  ;;  %v4790_v43 = vld [vmem:[#allocation5 + $0x258] sm:$0xf0] }
 0x1a2   :  { %3851 = vmatpush.bf16.msrb.mxu3 %v6421_v51  ;;  %3813 = vmatmul.bf16.vlgmr.msrb.gmra.mxu0 %v7276_v56  ;;  %v3620_v24 = vadd.f32 %v3619_v17, %v3607_v15  ;;  %v4806_v51 = vld [vmem:[#allocation5 + $0x278] sm:$0xf0]  ;;  %v6771_v42 = vld [vmem:[#allocation5 + $0x24c] sm:$0xf]  ;;  %v4537_v55 = vor.u32 %v6707_v47, %v4534_v36 }
 0x1a3   :  { %3857 = vmatpush.bf16.msra.mxu0 %v4617_v45  ;;  %v6807_v45 = vld [vmem:[#allocation5 + $0x36c] sm:$0xf]  ;;  %v4809_v35 = vor.u32 %v6775_v48, %v4806_v51  ;;  %v4918_v50 = vld [vmem:[#allocation5 + $0x358] sm:$0xf0]  ;;  %v4793_v59 = vor.u32 %v6771_v42, %v4790_v43 }
 0x1a4   :  { %3839 = vmatmul.bf16.vlgmr.msrb.gmra.mxu2 %v7277_v61  ;;  %3826 = vmatmul.bf16.vlgmr.msrb.gmra.mxu1 %v7278_v62  ;;  %v6703_v60 = vld [vmem:[#allocation5 + $0x2c] sm:$0xf]  ;;  %v4518_v61 = vld [vmem:[#allocation5 + $0x38] sm:$0xf0] }
 0x1a5   :  { %3870 = vmatpush.bf16.msra.mxu1 %v4745_v30  ;;  %3883 = vmatpush.bf16.msra.mxu2 %v4873_v33  ;;  %v4934_v30 = vld [vmem:[#allocation5 + $0x378] sm:$0xf0]  ;;  %v4553_v33 = vor.u32 %v6711_v20, %v4550_v21  ;;  %v6735_v62 = vld [vmem:[#allocation5 + $0x12c] sm:$0xf]  ;;  %v4521_v5 = vor.u32 %v6703_v60, %v4518_v61 }
 0x1a6   :  { %3896 = vmatpush.bf16.msra.mxu3 %v5001_v37  ;;  %v6739_v37 = vld [vmem:[#allocation5 + $0x14c] sm:$0xf]  ;;  %v4937_v39 = vor.u32 %v6807_v45, %v4934_v30  ;;  %v4646_v0 = vld [vmem:[#allocation5 + $0x138] sm:$0xf0] }
 0x1a7   :  { %3852 = vmatmul.bf16.vlgmr.msrb.gmra.mxu3 %v7279_v1  ;;  %3858 = vmatpush.bf16.msra.mxu0 %v4601_v44  ;;  %v3632_v40 = vpop.f32.mrf.mxu2  ;;  %v3608_v53 = vpop.f32.mrf.mxu0  ;;  %v4665_v58 = vor.u32 %v6739_v37, %v4662_v41  ;;  %v6767_v1 = vld [vmem:[#allocation5 + $0x22c] sm:$0xf]  ;;  %v4502_v7 = vld [vmem:[#allocation5 + $0x18] sm:$0xf0] }
 0x1a8   :  { %v3633_v44 = vadd.f32 %v3632_v40, %v3620_v24  ;;  %v6699_v6 = vld [vmem:[#allocation5 + $0xc] sm:$0xf]  ;;  %v4630_v11 = vld [vmem:[#allocation5 + $0x118] sm:$0xf0] }
 0x1a9   :  { %3871 = vmatpush.bf16.msra.mxu1 %v4729_v46  ;;  %3884 = vmatpush.bf16.msra.mxu2 %v4857_v49  ;;  %v6803_v49 = vld [vmem:[#allocation5 + $0x34c] sm:$0xf]  ;;  %v3621_v56 = vpop.f32.mrf.mxu1  ;;  %v4758_v14 = vld [vmem:[#allocation5 + $0x218] sm:$0xf0]  ;;  %v4505_v22 = vor.u32 %v6699_v6, %v4502_v7  ;;  %v7599_v7 = vld [vmem:[#allocation7] sm:$0xf] }
 0x1aa   :  { %3897 = vmatpush.bf16.msra.mxu3 %v4985_v57  ;;  %v3645_v46 = vpop.f32.mrf.mxu3  ;;  %v4921_v63 = vor.u32 %v6803_v49, %v4918_v50  ;;  %v6731_v10 = vld [vmem:[#allocation5 + $0x10c] sm:$0xf]  ;;  %v5382_v26 = vld [vmem:[#allocation5 + $0x6f8] sm:$0xf0] }
 0x1ab   :  { %3859 = vmatpush.bf16.msra.mxu0 %v4585_v2  ;;  %v7593_v57 = vadd.f32 %v3645_v46, %v3633_v44  ;;  %v4774_v2 = vld [vmem:[#allocation5 + $0x238] sm:$0xf0]  ;;  %v6763_v12 = vld [vmem:[#allocation5 + $0x20c] sm:$0xf]  ;;  %v4633_v48 = vor.u32 %v6731_v10, %v4630_v11 }
 0x1ac   :  { %v4777_v9 = vor.u32 %v6767_v1, %v4774_v2  ;;  %v6795_v15 = vld [vmem:[#allocation5 + $0x30c] sm:$0xf]  ;;  %v4761_v51 = vor.u32 %v6763_v12, %v4758_v14  ;;  %v5510_v30 = vld [vmem:[#allocation5 + $0x7f8] sm:$0xf0] }
 0x1ad   :  { %3872 = vmatpush.bf16.msra.mxu1 %v4713_v3  ;;  %3885 = vmatpush.bf16.msra.mxu2 %v4841_v4  ;;  %v6799_v3 = vld [vmem:[#allocation5 + $0x32c] sm:$0xf]  ;;  %v4902_v4 = vld [vmem:[#allocation5 + $0x338] sm:$0xf0] }
 0x1ae   :  { %3898 = vmatpush.bf16.msra.mxu3 %v4969_v8  ;;  %v4649_v8 = vor.u32 %v6735_v62, %v4646_v0  ;;  %v4905_v13 = vor.u32 %v6799_v3, %v4902_v4  ;;  %v6887_v20 = vld [vmem:[#allocation5 + $0x5ec] sm:$0xf]  ;;  %v5110_v37 = vld [vmem:[#allocation5 + $0x4d8] sm:$0xf0] }
 0x1af   :  { %3860 = vmatpush.bf16.msra.mxu0 %v4569_v16  ;;  %v4886_v16 = vld [vmem:[#allocation5 + $0x318] sm:$0xf0]  ;;  %v3634_v17 = vpop.f32.mrf.mxu2  ;;  %v6919_v24 = vld [vmem:[#allocation5 + $0x6ec] sm:$0xf] }
 0x1b0   :  { %v6951_v45 = vld [vmem:[#allocation5 + $0x7ec] sm:$0xf]  ;;  %v5385_v47 = vor.u32 %v6919_v24, %v5382_v26  ;;  %v5238_v41 = vld [vmem:[#allocation5 + $0x5d8] sm:$0xf0] }
 0x1b1   :  { %3873 = vmatpush.bf16.msra.mxu1 %v4697_v18  ;;  %3886 = vmatpush.bf16.msra.mxu2 %v4825_v19  ;;  %v6855_v18 = vld [vmem:[#allocation5 + $0x4ec] sm:$0xf]  ;;  %v5126_v19 = vld [vmem:[#allocation5 + $0x4f8] sm:$0xf0]  ;;  %v5513_v40 = vor.u32 %v6951_v45, %v5510_v30 }
 0x1b2   :  { %3899 = vmatpush.bf16.msra.mxu3 %v4953_v23  ;;  %v3647_v21 = vpop.f32.mrf.mxu3  ;;  %v5254_v23 = vld [vmem:[#allocation5 + $0x5f8] sm:$0xf0]  ;;  %v6851_v36 = vld [vmem:[#allocation5 + $0x4cc] sm:$0xf] }
 0x1b3   :  { %3861 = vmatpush.bf16.msra.mxu0 %v4553_v33  ;;  %v4889_v33 = vor.u32 %v6795_v15, %v4886_v16  ;;  %v6915_v42 = vld [vmem:[#allocation5 + $0x6cc] sm:$0xf]  ;;  %v5366_v43 = vld [vmem:[#allocation5 + $0x6d8] sm:$0xf0]  ;;  %v5113_v49 = vor.u32 %v6851_v36, %v5110_v37 }
 0x1b4   :  { %v6947_v44 = vld [vmem:[#allocation5 + $0x7cc] sm:$0xf]  ;;  %v5494_v46 = vld [vmem:[#allocation5 + $0x7d8] sm:$0xf0]  ;;  %v5369_v53 = vor.u32 %v6915_v42, %v5366_v43 }
 0x1b5   :  { %3874 = vmatpush.bf16.msra.mxu1 %v4681_v54  ;;  %3887 = vmatpush.bf16.msra.mxu2 %v4809_v35  ;;  %v5129_v54 = vor.u32 %v6855_v18, %v5126_v19  ;;  %v5257_v35 = vor.u32 %v6887_v20, %v5254_v23  ;;  %v5094_v56 = vld [vmem:[#allocation5 + $0x4b8] sm:$0xf0]  ;;  %v6911_v61 = vld [vmem:[#allocation5 + $0x6ac] sm:$0xf] }
 0x1b6   :  { %3900 = vmatpush.bf16.msra.mxu3 %v4937_v39  ;;  %v6883_v39 = vld [vmem:[#allocation5 + $0x5cc] sm:$0xf]  ;;  %v5222_v60 = vld [vmem:[#allocation5 + $0x5b8] sm:$0xf0] }
 0x1b7   :  { %3862 = vmatpush.bf16.msra.mxu0 %v4537_v55  ;;  %v5241_v50 = vor.u32 %v6883_v39, %v5238_v41  ;;  %v6847_v55 = vld [vmem:[#allocation5 + $0x4ac] sm:$0xf]  ;;  %v5350_v62 = vld [vmem:[#allocation5 + $0x6b8] sm:$0xf0] }
 0x1b8   :  { %v5478_v0 = vld [vmem:[#allocation5 + $0x7b8] sm:$0xf0]  ;;  %v5097_v1 = vor.u32 %v6847_v55, %v5094_v56  ;;  %v6843_v2 = vld [vmem:[#allocation5 + $0x48c] sm:$0xf]  ;;  %v5353_v4 = vor.u32 %v6911_v61, %v5350_v62 }
 0x1b9   :  { %3875 = vmatpush.bf16.msra.mxu1 %v4665_v58  ;;  %3888 = vmatpush.bf16.msra.mxu2 %v4793_v59  ;;  %v6879_v58 = vld [vmem:[#allocation5 + $0x5ac] sm:$0xf]  ;;  %v5497_v59 = vor.u32 %v6947_v44, %v5494_v46  ;;  %v5462_v11 = vld [vmem:[#allocation5 + $0x798] sm:$0xf0] }
 0x1ba   :  { %3901 = vmatpush.bf16.msra.mxu3 %v4921_v63  ;;  %v6943_v63 = vld [vmem:[#allocation5 + $0x7ac] sm:$0xf]  ;;  %v5225_v3 = vor.u32 %v6879_v58, %v5222_v60  ;;  %v5062_v16 = vld [vmem:[#allocation5 + $0x478] sm:$0xf0] }
 0x1bb   :  { %3863 = vmatpush.bf16.msra.mxu0 %v4521_v5  ;;  %v5078_v5 = vld [vmem:[#allocation5 + $0x498] sm:$0xf0]  ;;  %v6875_v6 = vld [vmem:[#allocation5 + $0x58c] sm:$0xf] }
 0x1bc   :  { %v6939_v10 = vld [vmem:[#allocation5 + $0x78c] sm:$0xf]  ;;  %v5081_v12 = vor.u32 %v6843_v2, %v5078_v5  ;;  %v5190_v21 = vld [vmem:[#allocation5 + $0x578] sm:$0xf0] }
 0x1bd   :  { %3876 = vmatpush.bf16.msra.mxu1 %v4649_v8  ;;  %3889 = vmatpush.bf16.msra.mxu2 %v4777_v9  ;;  %v5481_v8 = vor.u32 %v6943_v63, %v5478_v0  ;;  %v6907_v9 = vld [vmem:[#allocation5 + $0x68c] sm:$0xf]  ;;  %v5465_v20 = vor.u32 %v6939_v10, %v5462_v11  ;;  %v5318_v23 = vld [vmem:[#allocation5 + $0x678] sm:$0xf0] }
 0x1be   :  { %3902 = vmatpush.bf16.msra.mxu3 %v4905_v13  ;;  %v6839_v15 = vld [vmem:[#allocation5 + $0x46c] sm:$0xf]  ;;  %v5446_v26 = vld [vmem:[#allocation5 + $0x778] sm:$0xf0] }
 0x1bf   :  { %3864 = vmatpush.bf16.msra.mxu0 %v4505_v22  ;;  %v6871_v17 = vld [vmem:[#allocation5 + $0x56c] sm:$0xf]  ;;  %v5174_v37 = vld [vmem:[#allocation5 + $0x558] sm:$0xf0] }
 0x1c0   :  { %v6903_v22 = vld [vmem:[#allocation5 + $0x66c] sm:$0xf]  ;;  %v5193_v45 = vor.u32 %v6871_v17, %v5190_v21  ;;  %v5430_v44 = vld [vmem:[#allocation5 + $0x758] sm:$0xf0] }
 0x1c1   :  { %3877 = vmatpush.bf16.msra.mxu1 %v4633_v48  ;;  %3890 = vmatpush.bf16.msra.mxu2 %v4761_v51  ;;  %v3671_v19 = vpop.f32.mrf.mxu1  ;;  %v6935_v24 = vld [vmem:[#allocation5 + $0x76c] sm:$0xf]  ;;  %v5065_v51 = vor.u32 %v6839_v15, %v5062_v16  ;;  %v5321_v30 = vor.u32 %v6903_v22, %v5318_v23  ;;  %v5030_v58 = vld [vmem:[#allocation5 + $0x438] sm:$0xf0] }
 0x1c2   :  { %3903 = vmatpush.bf16.msra.mxu3 %v4889_v33  ;;  %3865 = vmatmul.bf16.vlgmr.msra.gmra.mxu0 %v7538_v28  ;;  %v5206_v28 = vld [vmem:[#allocation5 + $0x598] sm:$0xf0]  ;;  %v6835_v33 = vld [vmem:[#allocation5 + $0x44c] sm:$0xf]  ;;  %v5449_v36 = vor.u32 %v6935_v24, %v5446_v26 }
 0x1c3   :  { %3909 = vmatpush.bf16.msrb.mxu0 %v5129_v54  ;;  %v5209_v13 = vor.u32 %v6875_v6, %v5206_v28  ;;  %v5046_v54 = vld [vmem:[#allocation5 + $0x458] sm:$0xf0]  ;;  %v6899_v39 = vld [vmem:[#allocation5 + $0x64c] sm:$0xf] }
 0x1c4   :  { %3891 = vmatmul.bf16.vlgmr.msra.gmra.mxu2 %v7536_v27  ;;  %3878 = vmatmul.bf16.vlgmr.msra.gmra.mxu1 %v7542_v34  ;;  %v631_v27 = vperm.slane %v7599_v7, 2  ;;  %v3658_v34 = vpop.f32.mrf.mxu0  ;;  %v6931_v43 = vld [vmem:[#allocation5 + $0x74c] sm:$0xf]  ;;  %v5049_v46 = vor.u32 %v6835_v33, %v5046_v54  ;;  %v5158_v62 = vld [vmem:[#allocation5 + $0x538] sm:$0xf0] }
 0x1c5   :  { %3922 = vmatpush.bf16.msrb.mxu1 %v5257_v35  ;;  %3935 = vmatpush.bf16.msrb.mxu2 %v5385_v47  ;;  %v6867_v35 = vld [vmem:[#allocation5 + $0x54c] sm:$0xf]  ;;  %v5433_v61 = vor.u32 %v6931_v43, %v5430_v44  ;;  %v5286_v0 = vld [vmem:[#allocation5 + $0x638] sm:$0xf0] }
 0x1c6   :  { %3948 = vmatpush.bf16.msrb.mxu3 %v5513_v40  ;;  %v3659_v18 = vadd.f32 %v3658_v34, %v631_v27  ;;  %v5302_v40 = vld [vmem:[#allocation5 + $0x658] sm:$0xf0]  ;;  %v6831_v56 = vld [vmem:[#allocation5 + $0x42c] sm:$0xf] }
 0x1c7   :  { %3904 = vmatmul.bf16.vlgmr.msra.gmra.mxu3 %v7540_v29  ;;  %3910 = vmatpush.bf16.msrb.mxu0 %v5113_v49  ;;  %v5334_v29 = vld [vmem:[#allocation5 + $0x698] sm:$0xf0]  ;;  %v3684_v47 = vpop.f32.mrf.mxu2  ;;  %v5305_v55 = vor.u32 %v6899_v39, %v5302_v40  ;;  %v6895_v63 = vld [vmem:[#allocation5 + $0x62c] sm:$0xf] }
 0x1c8   :  { %v5337_v14 = vor.u32 %v6907_v9, %v5334_v29  ;;  %v3672_v48 = vadd.f32 %v3671_v19, %v3659_v18  ;;  %v5414_v2 = vld [vmem:[#allocation5 + $0x738] sm:$0xf0]  ;;  %v5289_v27 = vor.u32 %v6895_v63, %v5286_v0  ;;  %v6891_v9 = vld [vmem:[#allocation5 + $0x60c] sm:$0xf] }
 0x1c9   :  { %3923 = vmatpush.bf16.msrb.mxu1 %v5241_v50  ;;  %3936 = vmatpush.bf16.msrb.mxu2 %v5369_v53  ;;  %v5177_v53 = vor.u32 %v6867_v35, %v5174_v37  ;;  %v3673_v60 = vpop.f32.mrf.mxu1  ;;  %v5014_v5 = vld [vmem:[#allocation5 + $0x418] sm:$0xf0]  ;;  %v7015_v16 = vld [vmem:[#allocation5 + $0x9ec] sm:$0xf] }
 0x1ca   :  { %3949 = vmatpush.bf16.msrb.mxu3 %v5497_v59  ;;  %v3685_v41 = vadd.f32 %v3684_v47, %v3672_v48  ;;  %v3697_v42 = vpop.f32.mrf.mxu3  ;;  %v6863_v59 = vld [vmem:[#allocation5 + $0x52c] sm:$0xf]  ;;  %v5142_v28 = vld [vmem:[#allocation5 + $0x518] sm:$0xf0] }
 0x1cb   :  { %3911 = vmatpush.bf16.msrb.mxu0 %v5097_v1  ;;  %v6927_v1 = vld [vmem:[#allocation5 + $0x72c] sm:$0xf]  ;;  %v5161_v6 = vor.u32 %v6863_v59, %v5158_v62  ;;  %v5270_v11 = vld [vmem:[#allocation5 + $0x618] sm:$0xf0] }
 0x1cc   :  { %v7602_v49 = vadd.f32 %v3697_v42, %v3685_v41  ;;  %v3660_v50 = vpop.f32.mrf.mxu0  ;;  %v5417_v10 = vor.u32 %v6927_v1, %v5414_v2  ;;  %v5398_v34 = vld [vmem:[#allocation5 + $0x718] sm:$0xf0]  ;;  %v7047_v19 = vld [vmem:[#allocation5 + $0xaec] sm:$0xf]  ;;  %v5273_v22 = vor.u32 %v6891_v9, %v5270_v11 }
 0x1cd   :  { %3924 = vmatpush.bf16.msrb.mxu1 %v5225_v3  ;;  %3937 = vmatpush.bf16.msrb.mxu2 %v5353_v4  ;;  %v5033_v3 = vor.u32 %v6831_v56, %v5030_v58  ;;  %v6827_v4 = vld [vmem:[#allocation5 + $0x40c] sm:$0xf]  ;;  %v5638_v15 = vld [vmem:[#allocation5 + $0x8f8] sm:$0xf0] }
 0x1ce   :  { %3950 = vmatpush.bf16.msrb.mxu3 %v5481_v8  ;;  %v6859_v8 = vld [vmem:[#allocation5 + $0x50c] sm:$0xf]  ;;  %v5017_v17 = vor.u32 %v6827_v4, %v5014_v5  ;;  %v5766_v18 = vld [vmem:[#allocation5 + $0x9f8] sm:$0xf0] }
 0x1cf   :  { %3912 = vmatpush.bf16.msrb.mxu0 %v5081_v12  ;;  %v3686_v29 = vpop.f32.mrf.mxu2  ;;  %v6923_v12 = vld [vmem:[#allocation5 + $0x70c] sm:$0xf]  ;;  %v5145_v21 = vor.u32 %v6859_v8, %v5142_v28  ;;  %v6022_v24 = vld [vmem:[#allocation5 + $0xbf8] sm:$0xf0] }
 0x1d0   :  { %v7079_v23 = vld [vmem:[#allocation5 + $0xbec] sm:$0xf]  ;;  %v5401_v26 = vor.u32 %v6923_v12, %v5398_v34  ;;  %v5622_v33 = vld [vmem:[#allocation5 + $0x8d8] sm:$0xf0] }
 0x1d1   :  { %3925 = vmatpush.bf16.msrb.mxu1 %v5209_v13  ;;  %3938 = vmatpush.bf16.msrb.mxu2 %v5337_v14  ;;  %v6983_v14 = vld [vmem:[#allocation5 + $0x8ec] sm:$0xf]  ;;  %v6025_v35 = vor.u32 %v7079_v23, %v6022_v24  ;;  %v5750_v47 = vld [vmem:[#allocation5 + $0x9d8] sm:$0xf0] }
 0x1d2   :  { %3951 = vmatpush.bf16.msrb.mxu3 %v5465_v20  ;;  %v3699_v13 = vpop.f32.mrf.mxu3  ;;  %v5894_v20 = vld [vmem:[#allocation5 + $0xaf8] sm:$0xf0]  ;;  %v5641_v48 = vor.u32 %v6983_v14, %v5638_v15  ;;  %v7011_v54 = vld [vmem:[#allocation5 + $0x9cc] sm:$0xf] }
 0x1d3   :  { %3913 = vmatpush.bf16.msrb.mxu0 %v5065_v51  ;;  %v5769_v51 = vor.u32 %v7015_v16, %v5766_v18  ;;  %v5878_v37 = vld [vmem:[#allocation5 + $0xad8] sm:$0xf0]  ;;  %v7075_v39 = vld [vmem:[#allocation5 + $0xbcc] sm:$0xf]  ;;  %v5753_v42 = vor.u32 %v7011_v54, %v5750_v47 }
 0x1d4   :  { %v6006_v40 = vld [vmem:[#allocation5 + $0xbd8] sm:$0xf0]  ;;  %v6975_v44 = vld [vmem:[#allocation5 + $0x8ac] sm:$0xf] }
 0x1d5   :  { %3926 = vmatpush.bf16.msrb.mxu1 %v5193_v45  ;;  %3939 = vmatpush.bf16.msrb.mxu2 %v5321_v30  ;;  %v5897_v45 = vor.u32 %v7047_v19, %v5894_v20  ;;  %v6979_v30 = vld [vmem:[#allocation5 + $0x8cc] sm:$0xf]  ;;  %v5862_v58 = vld [vmem:[#allocation5 + $0xab8] sm:$0xf0] }
 0x1d6   :  { %3952 = vmatpush.bf16.msrb.mxu3 %v5449_v36  ;;  %v7043_v36 = vld [vmem:[#allocation5 + $0xacc] sm:$0xf]  ;;  %v5625_v41 = vor.u32 %v6979_v30, %v5622_v33  ;;  %v5990_v60 = vld [vmem:[#allocation5 + $0xbb8] sm:$0xf0] }
 0x1d7   :  { %3914 = vmatpush.bf16.msrb.mxu0 %v5049_v46  ;;  %v5881_v43 = vor.u32 %v7043_v36, %v5878_v37  ;;  %v5606_v46 = vld [vmem:[#allocation5 + $0x8b8] sm:$0xf0]  ;;  %v7007_v50 = vld [vmem:[#allocation5 + $0x9ac] sm:$0xf] }
 0x1d8   :  { %v7039_v56 = vld [vmem:[#allocation5 + $0xaac] sm:$0xf]  ;;  %v5590_v1 = vld [vmem:[#allocation5 + $0x898] sm:$0xf0] }
 0x1d9   :  { %3927 = vmatpush.bf16.msrb.mxu1 %v5177_v53  ;;  %3940 = vmatpush.bf16.msrb.mxu2 %v5305_v55  ;;  %v6009_v53 = vor.u32 %v7075_v39, %v6006_v40  ;;  %v5734_v55 = vld [vmem:[#allocation5 + $0x9b8] sm:$0xf0]  ;;  %v7071_v59 = vld [vmem:[#allocation5 + $0xbac] sm:$0xf]  ;;  %v5865_v63 = vor.u32 %v7039_v56, %v5862_v58 }
 0x1da   :  { %3953 = vmatpush.bf16.msrb.mxu3 %v5433_v61  ;;  %v5609_v61 = vor.u32 %v6975_v44, %v5606_v46  ;;  %v5737_v62 = vor.u32 %v7007_v50, %v5734_v55  ;;  %v6971_v0 = vld [vmem:[#allocation5 + $0x88c] sm:$0xf]  ;;  %v5993_v2 = vor.u32 %v7071_v59, %v5990_v60  ;;  %v5846_v5 = vld [vmem:[#allocation5 + $0xa98] sm:$0xf0] }
 0x1db   :  { %3915 = vmatpush.bf16.msrb.mxu0 %v5033_v3  ;;  %v5718_v3 = vld [vmem:[#allocation5 + $0x998] sm:$0xf0]  ;;  %v7035_v4 = vld [vmem:[#allocation5 + $0xa8c] sm:$0xf] }
 0x1dc   :  { %v5849_v8 = vor.u32 %v7035_v4, %v5846_v5  ;;  %v6967_v28 = vld [vmem:[#allocation5 + $0x86c] sm:$0xf]  ;;  %v5574_v9 = vld [vmem:[#allocation5 + $0x878] sm:$0xf0] }
 0x1dd   :  { %3928 = vmatpush.bf16.msrb.mxu1 %v5161_v6  ;;  %3941 = vmatpush.bf16.msrb.mxu2 %v5289_v27  ;;  %v7067_v6 = vld [vmem:[#allocation5 + $0xb8c] sm:$0xf]  ;;  %v5702_v12 = vld [vmem:[#allocation5 + $0x978] sm:$0xf0]  ;;  %v5577_v16 = vor.u32 %v6967_v28, %v5574_v9 }
 0x1de   :  { %3954 = vmatpush.bf16.msrb.mxu3 %v5417_v10  ;;  %v6999_v29 = vld [vmem:[#allocation5 + $0x96c] sm:$0xf]  ;;  %v5830_v13 = vld [vmem:[#allocation5 + $0xa78] sm:$0xf0] }
 0x1df   :  { %3916 = vmatpush.bf16.msrb.mxu0 %v5017_v17  ;;  %v7608_v27 = vpop.f32.mrf.mxu0  ;;  %v7031_v34 = vld [vmem:[#allocation5 + $0xa6c] sm:$0xf]  ;;  %v5958_v15 = vld [vmem:[#allocation5 + $0xb78] sm:$0xf0]  ;;  %v5705_v17 = vor.u32 %v6999_v29, %v5702_v12 }
 0x1e0   :  { %v7063_v14 = vld [vmem:[#allocation5 + $0xb6c] sm:$0xf]  ;;  %v5833_v18 = vor.u32 %v7031_v34, %v5830_v13  ;;  %v5558_v20 = vld [vmem:[#allocation5 + $0x858] sm:$0xf0] }
 0x1e1   :  { %3929 = vmatpush.bf16.msrb.mxu1 %v5145_v21  ;;  %3942 = vmatpush.bf16.msrb.mxu2 %v5273_v22  ;;  %v7610_v10 = vpop.f32.mrf.mxu1  ;;  %v6963_v19 = vld [vmem:[#allocation5 + $0x84c] sm:$0xf]  ;;  %v5961_v23 = vor.u32 %v7063_v14, %v5958_v15  ;;  %v5686_v24 = vld [vmem:[#allocation5 + $0x958] sm:$0xf0] }
 0x1e2   :  { %3955 = vmatpush.bf16.msrb.mxu3 %v5401_v26  ;;  %3917 = vmatmul.bf16.vlgmr.msrb.gmra.mxu0 %v7550_v31  ;;  %v5974_v31 = vld [vmem:[#allocation5 + $0xb98] sm:$0xf0]  ;;  %v6995_v21 = vld [vmem:[#allocation5 + $0x94c] sm:$0xf]  ;;  %v5561_v33 = vor.u32 %v6963_v19, %v5558_v20 }
 0x1e3   :  { %3961 = vmatpush.bf16.msra.mxu0 %v5641_v48  ;;  %v5977_v11 = vor.u32 %v7067_v6, %v5974_v31  ;;  %v7027_v26 = vld [vmem:[#allocation5 + $0xa4c] sm:$0xf]  ;;  %v5814_v48 = vld [vmem:[#allocation5 + $0xa58] sm:$0xf0] }
 0x1e4   :  { %3943 = vmatmul.bf16.vlgmr.msrb.gmra.mxu2 %v7548_v25  ;;  %3930 = vmatmul.bf16.vlgmr.msrb.gmra.mxu1 %v7554_v38  ;;  %v7003_v25 = vld [vmem:[#allocation5 + $0x98c] sm:$0xf]  ;;  %v5942_v30 = vld [vmem:[#allocation5 + $0xb58] sm:$0xf0]  ;;  %v5817_v47 = vor.u32 %v7027_v26, %v5814_v48 }
 0x1e5   :  { %3974 = vmatpush.bf16.msra.mxu1 %v5769_v51  ;;  %3987 = vmatpush.bf16.msra.mxu2 %v5897_v45  ;;  %v5721_v38 = vor.u32 %v7003_v25, %v5718_v3  ;;  %v7059_v45 = vld [vmem:[#allocation5 + $0xb4c] sm:$0xf]  ;;  %v5542_v37 = vld [vmem:[#allocation5 + $0x838] sm:$0xf0] }
 0x1e6   :  { %4000 = vmatpush.bf16.msra.mxu3 %v6025_v35  ;;  %v5689_v35 = vor.u32 %v6995_v21, %v5686_v24  ;;  %v6959_v36 = vld [vmem:[#allocation5 + $0x82c] sm:$0xf]  ;;  %v5798_v44 = vld [vmem:[#allocation5 + $0xa38] sm:$0xf0] }
 0x1e7   :  { %3956 = vmatmul.bf16.vlgmr.msrb.gmra.mxu3 %v7552_v32  ;;  %3962 = vmatpush.bf16.msra.mxu0 %v5625_v41  ;;  %v5593_v32 = vor.u32 %v6971_v0, %v5590_v1  ;;  %v7612_v22 = vpop.f32.mrf.mxu2  ;;  %v3712_v54 = vpop.f32.mrf.mxu0  ;;  %v6991_v39 = vld [vmem:[#allocation5 + $0x92c] sm:$0xf]  ;;  %v5945_v41 = vor.u32 %v7059_v45, %v5942_v30  ;;  %v5926_v50 = vld [vmem:[#allocation5 + $0xb38] sm:$0xf0] }
 0x1e8   :  { %v7055_v46 = vld [vmem:[#allocation5 + $0xb2c] sm:$0xf]  ;;  %v5526_v56 = vld [vmem:[#allocation5 + $0x818] sm:$0xf0] }
 0x1e9   :  { %3975 = vmatpush.bf16.msra.mxu1 %v5753_v42  ;;  %3988 = vmatpush.bf16.msra.mxu2 %v5881_v43  ;;  %v3725_v40 = vpop.f32.mrf.mxu1  ;;  %v5670_v42 = vld [vmem:[#allocation5 + $0x938] sm:$0xf0]  ;;  %v7023_v43 = vld [vmem:[#allocation5 + $0xa2c] sm:$0xf]  ;;  %v5929_v0 = vor.u32 %v7055_v46, %v5926_v50 }
 0x1ea   :  { %4001 = vmatpush.bf16.msra.mxu3 %v6009_v53  ;;  %v7614_v51 = vpop.f32.mrf.mxu3  ;;  %v5545_v53 = vor.u32 %v6959_v36, %v5542_v37  ;;  %v6955_v55 = vld [vmem:[#allocation5 + $0x80c] sm:$0xf]  ;;  %v5673_v58 = vor.u32 %v6991_v39, %v5670_v42  ;;  %v5801_v59 = vor.u32 %v7023_v43, %v5798_v44  ;;  %v5782_v1 = vld [vmem:[#allocation5 + $0xa18] sm:$0xf0]  ;;  %v7284_v44 = vld [vmem:[#allocation1 + $0x1b] sm:$0xff] }
 0x1eb   :  { %3963 = vmatpush.bf16.msra.mxu0 %v5609_v61  ;;  %v6987_v60 = vld [vmem:[#allocation5 + $0x90c] sm:$0xf]  ;;  %v5654_v61 = vld [vmem:[#allocation5 + $0x918] sm:$0xf0]  ;;  %v5529_v31 = vor.u32 %v6955_v55, %v5526_v56 }
 0x1ec   :  { %v7051_v25 = vld [vmem:[#allocation5 + $0xb0c] sm:$0xf]  ;;  %v6150_v5 = vld [vmem:[#allocation5 + $0xcf8] sm:$0xf0]  ;;  %v5657_v28 = vor.u32 %v6987_v60, %v5654_v61 }
 0x1ed   :  { %3976 = vmatpush.bf16.msra.mxu1 %v5737_v62  ;;  %3989 = vmatpush.bf16.msra.mxu2 %v5865_v63  ;;  %v7019_v62 = vld [vmem:[#allocation5 + $0xa0c] sm:$0xf]  ;;  %v6262_v19 = vld [vmem:[#allocation5 + $0xdd8] sm:$0xf0] }
 0x1ee   :  { %4002 = vmatpush.bf16.msra.mxu3 %v5993_v2  ;;  %v5910_v2 = vld [vmem:[#allocation5 + $0xb18] sm:$0xf0]  ;;  %v7111_v4 = vld [vmem:[#allocation5 + $0xcec] sm:$0xf]  ;;  %v5785_v9 = vor.u32 %v7019_v62, %v5782_v1 }
 0x1ef   :  { %3964 = vmatpush.bf16.msra.mxu0 %v5593_v32  ;;  %v3738_v63 = vpop.f32.mrf.mxu2  ;;  %v7143_v6 = vld [vmem:[#allocation5 + $0xdec] sm:$0xf]  ;;  %v6278_v32 = vld [vmem:[#allocation5 + $0xdf8] sm:$0xf0]  ;;  %v5913_v12 = vor.u32 %v7051_v25, %v5910_v2  ;;  %v6153_v34 = vor.u32 %v7111_v4, %v6150_v5 }
 0x1f0   :  { %v7207_v29 = vld [vmem:[#allocation5 + $0xfec] sm:$0xf]  ;;  %v6281_v13 = vor.u32 %v7143_v6, %v6278_v32  ;;  %v6390_v21 = vld [vmem:[#allocation5 + $0xed8] sm:$0xf0] }
 0x1f1   :  { %3977 = vmatpush.bf16.msra.mxu1 %v5721_v38  ;;  %3990 = vmatpush.bf16.msra.mxu2 %v5849_v8  ;;  %v7175_v38 = vld [vmem:[#allocation5 + $0xeec] sm:$0xf]  ;;  %v6406_v8 = vld [vmem:[#allocation5 + $0xef8] sm:$0xf0] }
 0x1f2   :  { %4003 = vmatpush.bf16.msra.mxu3 %v5977_v11  ;;  %v3751_v3 = vpop.f32.mrf.mxu3  ;;  %v6534_v11 = vld [vmem:[#allocation5 + $0xff8] sm:$0xf0]  ;;  %v6409_v14 = vor.u32 %v7175_v38, %v6406_v8  ;;  %v7107_v15 = vld [vmem:[#allocation5 + $0xccc] sm:$0xf] }
 0x1f3   :  { %3965 = vmatpush.bf16.msra.mxu0 %v5577_v16  ;;  %v6134_v16 = vld [vmem:[#allocation5 + $0xcd8] sm:$0xf0]  ;;  %v7171_v20 = vld [vmem:[#allocation5 + $0xecc] sm:$0xf] }
 0x1f4   :  { %v6518_v24 = vld [vmem:[#allocation5 + $0xfd8] sm:$0xf0]  ;;  %v6137_v26 = vor.u32 %v7107_v15, %v6134_v16  ;;  %v6393_v45 = vor.u32 %v7171_v20, %v6390_v21  ;;  %v7103_v30 = vld [vmem:[#allocation5 + $0xcac] sm:$0xf] }
 0x1f5   :  { %3978 = vmatpush.bf16.msra.mxu1 %v5705_v17  ;;  %3991 = vmatpush.bf16.msra.mxu2 %v5833_v18  ;;  %v7139_v17 = vld [vmem:[#allocation5 + $0xdcc] sm:$0xf]  ;;  %v6537_v18 = vor.u32 %v7207_v29, %v6534_v11  ;;  %v6246_v36 = vld [vmem:[#allocation5 + $0xdb8] sm:$0xf0] }
 0x1f6   :  { %4004 = vmatpush.bf16.msra.mxu3 %v5961_v23  ;;  %v7203_v23 = vld [vmem:[#allocation5 + $0xfcc] sm:$0xf]  ;;  %v6265_v48 = vor.u32 %v7139_v17, %v6262_v19  ;;  %v6374_v39 = vld [vmem:[#allocation5 + $0xeb8] sm:$0xf0] }
 0x1f7   :  { %3966 = vmatpush.bf16.msra.mxu0 %v5561_v33  ;;  %v6118_v33 = vld [vmem:[#allocation5 + $0xcb8] sm:$0xf0]  ;;  %v7135_v54 = vld [vmem:[#allocation5 + $0xdac] sm:$0xf] }
 0x1f8   :  { %v7167_v37 = vld [vmem:[#allocation5 + $0xeac] sm:$0xf]  ;;  %v7282_v40 = vld [vmem:[#allocation1 + $0x12] sm:$0xff]  ;;  %v6121_v46 = vor.u32 %v7103_v30, %v6118_v33  ;;  %v6249_v50 = vor.u32 %v7135_v54, %v6246_v36 }
 0x1f9   :  { %3979 = vmatpush.bf16.msra.mxu1 %v5689_v35  ;;  %3992 = vmatpush.bf16.msra.mxu2 %v5817_v47  ;;  %v7281_v35 = vld [vmem:[#allocation1] sm:$0xff]  ;;  %v6521_v47 = vor.u32 %v7203_v23, %v6518_v24  ;;  %v6502_v43 = vld [vmem:[#allocation5 + $0xfb8] sm:$0xf0] }
 0x1fa   :  { %4005 = vmatpush.bf16.msra.mxu3 %v5945_v41  ;;  %v7283_v41 = vld [vmem:[#allocation1 + $0x9] sm:$0xff]  ;;  %v7199_v42 = vld [vmem:[#allocation5 + $0xfac] sm:$0xf]  ;;  %v6102_v56 = vld [vmem:[#allocation5 + $0xc98] sm:$0xf0] }
 0x1fb   :  { %3967 = vmatpush.bf16.msra.mxu0 %v5545_v53  ;;  %v6377_v53 = vor.u32 %v7167_v37, %v6374_v39  ;;  %v7099_v55 = vld [vmem:[#allocation5 + $0xc8c] sm:$0xf]  ;;  %v6230_v60 = vld [vmem:[#allocation5 + $0xd98] sm:$0xf0] }
 0x1fc   :  { %v7163_v61 = vld [vmem:[#allocation5 + $0xe8c] sm:$0xf]  ;;  %v6358_v62 = vld [vmem:[#allocation5 + $0xe98] sm:$0xf0]  ;;  %v6105_v25 = vor.u32 %v7099_v55, %v6102_v56 }
 0x1fd   :  { %3980 = vmatpush.bf16.msra.mxu1 %v5673_v58  ;;  %3993 = vmatpush.bf16.msra.mxu2 %v5801_v59  ;;  %v7131_v58 = vld [vmem:[#allocation5 + $0xd8c] sm:$0xf]  ;;  %v6505_v59 = vor.u32 %v7199_v42, %v6502_v43  ;;  %v6486_v1 = vld [vmem:[#allocation5 + $0xf98] sm:$0xf0]  ;;  %v6361_v4 = vor.u32 %v7163_v61, %v6358_v62 }
 0x1fe   :  { %4006 = vmatpush.bf16.msra.mxu3 %v5929_v0  ;;  %v7195_v0 = vld [vmem:[#allocation5 + $0xf8c] sm:$0xf]  ;;  %v6233_v3 = vor.u32 %v7131_v58, %v6230_v60  ;;  %v6086_v6 = vld [vmem:[#allocation5 + $0xc78] sm:$0xf0] }
 0x1ff   :  { %3968 = vmatpush.bf16.msra.mxu0 %v5529_v31  ;;  %v7616_v63 = vpop.f32.mrf.mxu0  ;;  %v7095_v5 = vld [vmem:[#allocation5 + $0xc6c] sm:$0xf]  ;;  %v6489_v32 = vor.u32 %v7195_v0, %v6486_v1  ;;  %v6214_v38 = vld [vmem:[#allocation5 + $0xd78] sm:$0xf0] }
 0x200   :  { %v7127_v31 = vld [vmem:[#allocation5 + $0xd6c] sm:$0xf]  ;;  %v6470_v29 = vld [vmem:[#allocation5 + $0xf78] sm:$0xf0]  ;;  %v6089_v11 = vor.u32 %v7095_v5, %v6086_v6 }
 0x201   :  { %3981 = vmatpush.bf16.msra.mxu1 %v5657_v28  ;;  %3994 = vmatpush.bf16.msra.mxu2 %v5785_v9  ;;  %v7618_v2 = vpop.f32.mrf.mxu1  ;;  %v7159_v8 = vld [vmem:[#allocation5 + $0xe6c] sm:$0xf]  ;;  %v6342_v28 = vld [vmem:[#allocation5 + $0xe78] sm:$0xf0] }
 0x202   :  { %4007 = vmatpush.bf16.msra.mxu3 %v5913_v12  ;;  %3969 = vmatmul.bf16.vlgmr.msra.gmra.mxu0 %v7281_v35  ;;  %v7191_v9 = vld [vmem:[#allocation5 + $0xf6c] sm:$0xf]  ;;  %v6217_v12 = vor.u32 %v7127_v31, %v6214_v38  ;;  %v6326_v20 = vld [vmem:[#allocation5 + $0xe58] sm:$0xf0] }
 0x203   :  { %4013 = vmatpush.bf16.msrb.mxu0 %v6153_v34  ;;  %v6345_v34 = vor.u32 %v7159_v8, %v6342_v28  ;;  %v7123_v15 = vld [vmem:[#allocation5 + $0xd4c] sm:$0xf]  ;;  %v6473_v16 = vor.u32 %v7191_v9, %v6470_v29  ;;  %v6454_v24 = vld [vmem:[#allocation5 + $0xf58] sm:$0xf0]  ;;  %v7224_v28 = vld [vmem:[#allocation8 + $0x70] sm:$0xff] }
 0x204   :  { %3995 = vmatmul.bf16.vlgmr.msra.gmra.mxu2 %v7282_v40  ;;  %3982 = vmatmul.bf16.vlgmr.msra.gmra.mxu1 %v7283_v41  ;;  %v7155_v19 = vld [vmem:[#allocation5 + $0xe4c] sm:$0xf]  ;;  %v6182_v39 = vld [vmem:[#allocation5 + $0xd38] sm:$0xf0]  ;;  %v7232_v9 = vld [vmem:[#allocation8 + $0xb0] sm:$0xff] }
 0x205   :  { %4026 = vmatpush.bf16.msrb.mxu1 %v6281_v13  ;;  %4039 = vmatpush.bf16.msrb.mxu2 %v6409_v14  ;;  %v7091_v13 = vld [vmem:[#allocation5 + $0xc4c] sm:$0xf]  ;;  %v6070_v14 = vld [vmem:[#allocation5 + $0xc58] sm:$0xf0]  ;;  %v6329_v54 = vor.u32 %v7155_v19, %v6326_v20  ;;  %v7222_v20 = vld [vmem:[#allocation8 + $0x60] sm:$0xff] }
 0x206   :  { %4052 = vmatpush.bf16.msrb.mxu3 %v6537_v18  ;;  %v6198_v18 = vld [vmem:[#allocation5 + $0xd58] sm:$0xf0]  ;;  %v7187_v23 = vld [vmem:[#allocation5 + $0xf4c] sm:$0xf] }
 0x207   :  { %4008 = vmatmul.bf16.vlgmr.msra.gmra.mxu3 %v7284_v44  ;;  %4014 = vmatpush.bf16.msrb.mxu0 %v6137_v26  ;;  %v7620_v17 = vpop.f32.mrf.mxu2  ;;  %v3764_v26 = vpop.f32.mrf.mxu0  ;;  %v6201_v33 = vor.u32 %v7123_v15, %v6198_v18  ;;  %v7087_v35 = vld [vmem:[#allocation5 + $0xc2c] sm:$0xf]  ;;  %v6457_v37 = vor.u32 %v7187_v23, %v6454_v24  ;;  %v6310_v41 = vld [vmem:[#allocation5 + $0xe38] sm:$0xf0]  ;;  %v7214_v18 = vld [vmem:[#allocation8 + $0x20] sm:$0xff] }
 0x208   :  { %v7119_v36 = vld [vmem:[#allocation5 + $0xd2c] sm:$0xf]  ;;  %v6438_v43 = vld [vmem:[#allocation5 + $0xf38] sm:$0xf0]  ;;  %v7230_v23 = vld [vmem:[#allocation8 + $0xa0] sm:$0xff] }
 0x209   :  { %4027 = vmatpush.bf16.msrb.mxu1 %v6265_v48  ;;  %4040 = vmatpush.bf16.msrb.mxu2 %v6393_v45  ;;  %v3711_v48 = vadd.f32 %v7608_v27, %v7602_v49  ;;  %v6073_v45 = vor.u32 %v7091_v13, %v6070_v14  ;;  %v3777_v30 = vpop.f32.mrf.mxu1  ;;  %v7151_v40 = vld [vmem:[#allocation5 + $0xe2c] sm:$0xf]  ;;  %v6185_v27 = vor.u32 %v7119_v36, %v6182_v39  ;;  %v6166_v58 = vld [vmem:[#allocation5 + $0xd18] sm:$0xf0]  ;;  %v7220_v36 = vld [vmem:[#allocation8 + $0x50] sm:$0xff] }
 0x20a   :  { %4053 = vmatpush.bf16.msrb.mxu3 %v6521_v47  ;;  %v7622_v21 = vpop.f32.mrf.mxu3  ;;  %v6054_v47 = vld [vmem:[#allocation5 + $0xc38] sm:$0xf0]  ;;  %v7183_v42 = vld [vmem:[#allocation5 + $0xf2c] sm:$0xf] }
 0x20b   :  { %4015 = vmatpush.bf16.msrb.mxu0 %v6121_v46  ;;  %v3724_v44 = vadd.f32 %v7610_v10, %v3711_v48  ;;  %v6057_v49 = vor.u32 %v7087_v35, %v6054_v47  ;;  %v6313_v46 = vor.u32 %v7151_v40, %v6310_v41  ;;  %v7115_v55 = vld [vmem:[#allocation5 + $0xd0c] sm:$0xf]  ;;  %v6441_v56 = vor.u32 %v7183_v42, %v6438_v43  ;;  %v6294_v60 = vld [vmem:[#allocation5 + $0xe18] sm:$0xf0]  ;;  %v7212_v35 = vld [vmem:[#allocation8 + $0x10] sm:$0xff] }
 0x20c   :  { %v7179_v62 = vld [vmem:[#allocation5 + $0xf0c] sm:$0xf]  ;;  %v6422_v0 = vld [vmem:[#allocation5 + $0xf18] sm:$0xf0] }
 0x20d   :  { %4028 = vmatpush.bf16.msrb.mxu1 %v6249_v50  ;;  %4041 = vmatpush.bf16.msrb.mxu2 %v6377_v53  ;;  %v7083_v50 = vld [vmem:[#allocation5 + $0xc0c] sm:$0xf]  ;;  %v6038_v53 = vld [vmem:[#allocation5 + $0xc18] sm:$0xf0]  ;;  %v3737_v10 = vadd.f32 %v7612_v22, %v3724_v44  ;;  %v6425_v5 = vor.u32 %v7179_v62, %v6422_v0  ;;  %v7216_v22 = vld [vmem:[#allocation8 + $0x30] sm:$0xff] }
 0x20e   :  { %4054 = vmatpush.bf16.msrb.mxu3 %v6505_v59  ;;  %v7147_v59 = vld [vmem:[#allocation5 + $0xe0c] sm:$0xf]  ;;  %v7217_v6 = vld [vmem:[#allocation8 + $0x38] sm:$0xff] }
 0x20f   :  { %4016 = vmatpush.bf16.msrb.mxu0 %v6105_v25  ;;  %v3790_v61 = vpop.f32.mrf.mxu2  ;;  %v6041_v25 = vor.u32 %v7083_v50, %v6038_v53  ;;  %v7225_v31 = vld [vmem:[#allocation8 + $0x78] sm:$0xff]  ;;  %v3750_v38 = vadd.f32 %v7614_v51, %v3737_v10  ;;  %v7285_v29 = vld [vmem:[#allocation1 + $0x24] sm:$0xff]  ;;  %v7226_v50 = vld [vmem:[#allocation8 + $0x80] sm:$0xff]  ;;  %v4066_v53 = vmax.f32 %v7593_v57, 0.0 }
 0x210   :  { %v7215_v13 = vld [vmem:[#allocation8 + $0x28] sm:$0xff]  ;;  %v7221_v48 = vld [vmem:[#allocation8 + $0x58] sm:$0xff] }
 0x211   :  { %4029 = vmatpush.bf16.msrb.mxu1 %v6233_v3  ;;  %4042 = vmatpush.bf16.msrb.mxu2 %v6361_v4  ;;  %v6169_v3 = vor.u32 %v7115_v55, %v6166_v58  ;;  %v6297_v4 = vor.u32 %v7147_v59, %v6294_v60  ;;  %v3763_v8 = vadd.f32 %v7616_v63, %v3750_v38  ;;  %v7223_v63 = vld [vmem:[#allocation8 + $0x68] sm:$0xff]  ;;  %v632_v60 = vperm.slane %v7599_v7, 3  ;;  %v7240_v7 = vld [vmem:[#allocation8 + $0xf0] sm:$0xff] }
 0x212   :  { %4055 = vmatpush.bf16.msrb.mxu3 %v6489_v32  ;;  %v3803_v1 = vpop.f32.mrf.mxu3  ;;  %v7233_v32 = vld [vmem:[#allocation8 + $0xb8] sm:$0xff]  ;;  %v7231_v14 = vld [vmem:[#allocation8 + $0xa8] sm:$0xff]  ;;  %v4070_v58 = vpack.c.bf16 %v4066_v53, %v4066_v53 }
 0x213   :  { %4017 = vmatpush.bf16.msrb.mxu0 %v6089_v11  ;;  %v7286_v11 = vld [vmem:[#allocation1 + $0x2d] sm:$0xff]  ;;  %v3776_v51 = vadd.f32 %v7618_v2, %v3763_v8  ;;  %v7219_v40 = vld [vmem:[#allocation8 + $0x48] sm:$0xff] }
 0x214   :  { %v7213_v2 = vld [vmem:[#allocation8 + $0x18] sm:$0xff]  ;;  %v7227_v41 = vld [vmem:[#allocation8 + $0x88] sm:$0xff] }
 0x215   :  { %4030 = vmatpush.bf16.msrb.mxu1 %v6217_v12  ;;  %4043 = vmatpush.bf16.msrb.mxu2 %v6345_v34  ;;  %v7287_v12 = vld [vmem:[#allocation1 + $0x36] sm:$0xff]  ;;  %v7288_v34 = vld [vmem:[#allocation1 + $0x3f] sm:$0xff]  ;;  %v3789_v15 = vadd.f32 %v7620_v17, %v3776_v51 }
 0x216   :  { %4056 = vmatpush.bf16.msrb.mxu3 %v6473_v16  ;;  %v7237_v51 = vld [vmem:[#allocation8 + $0xd8] sm:$0xff] }
 0x217   :  { %4018 = vmatpush.bf16.msrb.mxu0 %v6073_v45  ;;  %v3802_v24 = vadd.f32 %v7622_v21, %v3789_v15  ;;  %v7229_v45 = vld [vmem:[#allocation8 + $0x98] sm:$0xff]  ;;  %v7211_v21 = vld [vmem:[#allocation8 + $0x8] sm:$0xff] }
 0x218   :  { %v7235_v15 = vld [vmem:[#allocation8 + $0xc8] sm:$0xff] }
 0x219   :  { %4031 = vmatpush.bf16.msrb.mxu1 %v6201_v33  ;;  %4044 = vmatpush.bf16.msrb.mxu2 %v6329_v54 }
 0x21a   :  { %4057 = vmatpush.bf16.msrb.mxu3 %v6457_v37  ;;  %v7228_v37 = vld [vmem:[#allocation8 + $0x90] sm:$0xff] }
 0x21b   :  { %4019 = vmatpush.bf16.msrb.mxu0 %v6057_v49  ;;  %v7210_v49 = vld [vmem:[#allocation8] sm:$0xff] }
 0x21d   :  { %4032 = vmatpush.bf16.msrb.mxu1 %v6185_v27  ;;  %4045 = vmatpush.bf16.msrb.mxu2 %v6313_v46  ;;  %v4065_v27 = vmax.f32 %v7574_v52, 0.0  ;;  %v7218_v46 = vld [vmem:[#allocation8 + $0x40] sm:$0xff] }
 0x21e   :  { %4058 = vmatpush.bf16.msrb.mxu3 %v6441_v56 }
 0x21f   :  { %4020 = vmatpush.bf16.msrb.mxu0 %v6041_v25  ;;  %v3814_v16 = vpop.f32.mrf.mxu0  ;;  %v4069_v56 = vpack.c.bf16 %v4065_v27, %v4065_v27  ;;  %v7249_v27 = vld [vmem:[%s7668_s5 + $0x38] sm:$0xff] }
 0x220   :  { %v3815_v26 = vadd.f32 %v3814_v16, %v3802_v24  ;;  %v7234_v24 = vld [vmem:[#allocation8 + $0xc0] sm:$0xff] }
 0x221   :  { %4033 = vmatpush.bf16.msrb.mxu1 %v6169_v3  ;;  %4046 = vmatpush.bf16.msrb.mxu2 %v6297_v4  ;;  %v3827_v19 = vpop.f32.mrf.mxu1 }
 0x222   :  { %4059 = vmatpush.bf16.msrb.mxu3 %v6425_v5  ;;  %4021 = vmatmul.bf16.vlgmr.msrb.gmra.mxu0 %v7285_v29  ;;  %v3828_v54 = vadd.f32 %v3827_v19, %v3815_v26 }
 0x223   :  { %4333 = vmatpush.bf16.msra.mxu0 %v7217_v6 }
 0x224   :  { %4034 = vmatmul.bf16.vlgmr.msrb.gmra.mxu1 %v7286_v11  ;;  %4047 = vmatmul.bf16.vlgmr.msrb.gmra.mxu2 %v7287_v12  ;;  %v7239_v11 = vld [vmem:[#allocation8 + $0xe8] sm:$0xff] }
 0x225   :  { %4346 = vmatpush.bf16.msra.mxu1 %v7225_v31  ;;  %4359 = vmatpush.bf16.msra.mxu2 %v7233_v32 }
 0x226   :  { %4060 = vmatmul.bf16.vlgmr.msrb.gmra.mxu3 %v7288_v34  ;;  %v7238_v34 = vld [vmem:[#allocation8 + $0xe0] sm:$0xff] }
 0x227   :  { %4334 = vmatpush.bf16.msra.mxu0 %v7216_v22  ;;  %v3840_v30 = vpop.f32.mrf.mxu2  ;;  %v3816_v17 = vpop.f32.mrf.mxu0  ;;  %v7241_v22 = vld [vmem:[#allocation8 + $0xf8] sm:$0xff] }
 0x228   :  { %v3841_v39 = vadd.f32 %v3840_v30, %v3828_v54  ;;  %4372 = vmatpush.bf16.msra.mxu3 %v7241_v22 }
 0x229   :  { %4347 = vmatpush.bf16.msra.mxu1 %v7224_v28  ;;  %4360 = vmatpush.bf16.msra.mxu2 %v7232_v9  ;;  %v3829_v47 = vpop.f32.mrf.mxu1 }
 0x22a   :  { %v3853_v33 = vpop.f32.mrf.mxu3 }
 0x22b   :  { %4335 = vmatpush.bf16.msra.mxu0 %v7215_v13  ;;  %v3854_v42 = vadd.f32 %v3853_v33, %v3841_v39 }
 0x22c   :  { %4373 = vmatpush.bf16.msra.mxu3 %v7240_v7 }
 0x22d   :  { %4348 = vmatpush.bf16.msra.mxu1 %v7223_v63  ;;  %4361 = vmatpush.bf16.msra.mxu2 %v7231_v14  ;;  %v4067_v55 = vmax.f32 %v3854_v42, 0.0  ;;  %v7236_v14 = vld [vmem:[#allocation8 + $0xd0] sm:$0xff] }
 0x22f   :  { %4336 = vmatpush.bf16.msra.mxu0 %v7214_v18  ;;  %v3842_v43 = vpop.f32.mrf.mxu2  ;;  %v4071_v59 = vpack.c.bf16 %v4067_v55, %v4067_v55 }
 0x230   :  { %4374 = vmatpush.bf16.msra.mxu3 %v7239_v11 }
 0x231   :  { %4349 = vmatpush.bf16.msra.mxu1 %v7222_v20  ;;  %4362 = vmatpush.bf16.msra.mxu2 %v7230_v23 }
 0x232   :  { %v3855_v44 = vpop.f32.mrf.mxu3 }
 0x233   :  { %4337 = vmatpush.bf16.msra.mxu0 %v7213_v2 }
 0x234   :  { %4375 = vmatpush.bf16.msra.mxu3 %v7238_v34 }
 0x235   :  { %4350 = vmatpush.bf16.msra.mxu1 %v7221_v48  ;;  %4363 = vmatpush.bf16.msra.mxu2 %v7229_v45 }
 0x237   :  { %4338 = vmatpush.bf16.msra.mxu0 %v7212_v35 }
 0x238   :  { %4376 = vmatpush.bf16.msra.mxu3 %v7237_v51 }
 0x239   :  { %4351 = vmatpush.bf16.msra.mxu1 %v7220_v36  ;;  %4364 = vmatpush.bf16.msra.mxu2 %v7228_v37 }
 0x23b   :  { %4339 = vmatpush.bf16.msra.mxu0 %v7211_v21 }
 0x23c   :  { %4377 = vmatpush.bf16.msra.mxu3 %v7236_v14 }
 0x23d   :  { %4352 = vmatpush.bf16.msra.mxu1 %v7219_v40  ;;  %4365 = vmatpush.bf16.msra.mxu2 %v7227_v41 }
 0x23f   :  { %4340 = vmatpush.bf16.msra.mxu0 %v7210_v49  ;;  %v3866_v61 = vpop.f32.mrf.mxu0 }
 0x240   :  { %v3867_v52 = vadd.f32 %v3866_v61, %v632_v60  ;;  %4378 = vmatpush.bf16.msra.mxu3 %v7235_v15  ;;  %v7245_v60 = vld [vmem:[%s7668_s5 + $0x18] sm:$0xff] }
 0x241   :  { %4353 = vmatpush.bf16.msra.mxu1 %v7218_v46  ;;  %4366 = vmatpush.bf16.msra.mxu2 %v7226_v50  ;;  %v3879_v62 = vpop.f32.mrf.mxu1  ;;  %v7248_v50 = vld [vmem:[%s7668_s5 + $0x30] sm:$0xff] }
 0x242   :  { %4341 = vmatmul.bf16.vlgmr.msra.gmra.mxu0 %v4069_v56  ;;  %v3880_v0 = vadd.f32 %v3879_v62, %v3867_v52  ;;  %v7247_v56 = vld [vmem:[%s7668_s5 + $0x28] sm:$0xff] }
 0x243   :  { %4455 = vmatpush.bf16.msrb.mxu0 %v7249_v27 }
 0x244   :  { %4354 = vmatmul.bf16.vlgmr.msra.gmra.mxu1 %v4070_v58  ;;  %4367 = vmatmul.bf16.vlgmr.msra.gmra.mxu2 %v4071_v59  ;;  %v7246_v58 = vld [vmem:[%s7668_s5 + $0x20] sm:$0xff]  ;;  %v7261_v59 = vld [vmem:[#allocation10] ss:$0 sm:$0xff] }
 0x245   :  { %4379 = vmatpush.bf16.msra.mxu3 %v7234_v24 }
 0x247   :  { %v3892_v1 = vpop.f32.mrf.mxu2  ;;  %v3868_v3 = vpop.f32.mrf.mxu0  ;;  %4456 = vmatpush.bf16.msrb.mxu0 %v7248_v50 }
 0x248   :  { %v3893_v10 = vadd.f32 %v3892_v1, %v3880_v0  ;;  %v7244_v0 = vld [vmem:[%s7668_s5 + $0x10] sm:$0xff] }
 0x249   :  { %v3881_v4 = vpop.f32.mrf.mxu1 }
 0x24a   :  { %v3905_v25 = vpop.f32.mrf.mxu3 }
 0x24b   :  { %v3906_v57 = vadd.f32 %v3905_v25, %v3893_v10  ;;  %4457 = vmatpush.bf16.msrb.mxu0 %v7247_v56 }
 0x24f   :  { %v3894_v5 = vpop.f32.mrf.mxu2  ;;  %4458 = vmatpush.bf16.msrb.mxu0 %v7246_v58 }
 0x250   :  { %v7243_v5 = vld [vmem:[%s7668_s5 + $0x8] sm:$0xff] }
 0x252   :  { %v3907_v6 = vpop.f32.mrf.mxu3 }
 0x253   :  { %4459 = vmatpush.bf16.msrb.mxu0 %v7245_v60  ;;  %v7242_v6 = vld [vmem:[%s7668_s5] sm:$0xff] }
 0x257   :  { %4460 = vmatpush.bf16.msrb.mxu0 %v7244_v0 }
 0x25b   :  { %4461 = vmatpush.bf16.msrb.mxu0 %v7243_v5 }
 0x25f   :  { %v3918_v31 = vpop.f32.mrf.mxu0  ;;  %4462 = vmatpush.bf16.msrb.mxu0 %v7242_v6 }
 0x260   :  { %v3919_v16 = vadd.f32 %v3918_v31, %v3906_v57 }
 0x261   :  { %v3931_v32 = vpop.f32.mrf.mxu1 }
 0x262   :  { %v3932_v26 = vadd.f32 %v3931_v32, %v3919_v16 }
 0x267   :  { %v3944_v38 = vpop.f32.mrf.mxu2  ;;  %v3920_v28 = vpop.f32.mrf.mxu0 }
 0x268   :  { %v3945_v2 = vadd.f32 %v3944_v38, %v3932_v26  ;;  %v7262_v28 = vld [vmem:[#allocation11] ss:$0 sm:$0xff] }
 0x269   :  { %v3933_v9 = vpop.f32.mrf.mxu1 }
 0x26a   :  { %v3957_v8 = vpop.f32.mrf.mxu3 }
 0x26b   :  { %v3958_v30 = vadd.f32 %v3957_v8, %v3945_v2 }
 0x26f   :  { %v3946_v29 = vpop.f32.mrf.mxu2 }
 0x272   :  { %v3959_v12 = vpop.f32.mrf.mxu3 }
 0x27f   :  { %v3970_v13 = vpop.f32.mrf.mxu0 }
 0x280   :  { %v3971_v33 = vadd.f32 %v3970_v13, %v3958_v30 }
 0x281   :  { %v3983_v63 = vpop.f32.mrf.mxu1 }
 0x282   :  { %v3984_v17 = vadd.f32 %v3983_v63, %v3971_v33 }
 0x287   :  { %v3996_v18 = vpop.f32.mrf.mxu2  ;;  %v3972_v20 = vpop.f32.mrf.mxu0 }
 0x288   :  { %v3997_v54 = vadd.f32 %v3996_v18, %v3984_v17 }
 0x289   :  { %v3985_v23 = vpop.f32.mrf.mxu1 }
 0x28a   :  { %v4009_v19 = vpop.f32.mrf.mxu3 }
 0x28b   :  { %v4010_v35 = vadd.f32 %v4009_v19, %v3997_v54 }
 0x28f   :  { %v3998_v48 = vpop.f32.mrf.mxu2 }
 0x292   :  { %v4011_v45 = vpop.f32.mrf.mxu3 }
 0x29f   :  { %v4022_v47 = vpop.f32.mrf.mxu0 }
 0x2a0   :  { %v4023_v37 = vadd.f32 %v4022_v47, %v4010_v35 }
 0x2a1   :  { %v4035_v36 = vpop.f32.mrf.mxu1 }
 0x2a2   :  { %v4036_v39 = vadd.f32 %v4035_v36, %v4023_v37 }
 0x2a7   :  { %v4048_v21 = vpop.f32.mrf.mxu2  ;;  %v4024_v42 = vpop.f32.mrf.mxu0 }
 0x2a8   :  { %v4049_v41 = vadd.f32 %v4048_v21, %v4036_v39 }
 0x2a9   :  { %v4061_v40 = vpop.f32.mrf.mxu3  ;;  %v4037_v43 = vpop.f32.mrf.mxu1 }
 0x2aa   :  { %v4062_v44 = vadd.f32 %v4061_v40, %v4049_v41 }
 0x2ac   :  { %v4068_v49 = vmax.f32 %v4062_v44, 0.0 }
 0x2ae   :  { %v4072_v46 = vpack.c.bf16 %v4068_v49, %v4068_v49 }
 0x2af   :  { %v4050_v53 = vpop.f32.mrf.mxu2 }
 0x2b0   :  { %4380 = vmatmul.bf16.vlgmr.msra.gmra.mxu3 %v4072_v46 }
 0x2b1   :  { %v4063_v55 = vpop.f32.mrf.mxu3 }
 0x2bf   :  { %v4342_v61 = vpop.f32.mrf.mxu0 }
 0x2c0   :  { %v4343_v52 = vadd.f32 %v7261_v59, %v4342_v61 }
 0x2c1   :  { %v4355_v62 = vpop.f32.mrf.mxu1 }
 0x2c2   :  { %v4356_v1 = vadd.f32 %v4355_v62, %v4343_v52 }
 0x2c7   :  { %v4368_v10 = vpop.f32.mrf.mxu2  ;;  %v4344_v57 = vpop.f32.mrf.mxu0 }
 0x2c8   :  { %v4369_v25 = vadd.f32 %v4368_v10, %v4356_v1 }
 0x2c9   :  { %v4357_v3 = vpop.f32.mrf.mxu1 }
 0x2cf   :  { %v4370_v4 = vpop.f32.mrf.mxu2 }
 0x333   :  { %v4381_v31 = vpop.f32.mrf.mxu3 }
 0x334   :  { %v4382_v32 = vadd.f32 %v4381_v31, %v4369_v25 }
 0x336   :  { %v4385_v38 = vmax.f32 %v4382_v32, 0.0 }
 0x338   :  { %v4386_v8 = vpack.c.bf16 %v4385_v38, %v4385_v38 }
 0x33a   :  { %4463 = vmatmul.bf16.vlgmr.msrb.gmra.mxu0 %v4386_v8 }
 0x33b   :  { %v4383_v22 = vpop.f32.mrf.mxu3 }
 0x3b7   :  { %v4464_v9 = vpop.f32.mrf.mxu0 }
 0x3b8   :  { %v4465_v7 = vadd.f32 %v7262_v28, %v4464_v9 }
 0x3ba   :  { %4469 = vst.msk [vmem:[#allocation13] sm:$0x3] %vm4468_vm0, %v4465_v7 }
 0x3bb   :  { %4480 = dma.vmem_to_hbm [thread:$0]  %s4476_s21, 32, %s4478_s24, [#allocation4]  }
 0x3bf   :  { %v4466_v29 = vpop.f32.mrf.mxu0 }
 0x3c0   :  { %7465 = dma.done.wait [#allocation4], 32  }
 0x3c1   :  { %7466 = vsyncadd [#allocation4], 4294967264 }
 0x3c2   :  { %4485 = vsyncpa [#allocation3], 1 }
 0x3c3   :  { %4486 = vsyncpa [#allocation6], 1 }
 0x3c4   :  { %4487 = vsyncpa [#allocation9], 1 }
 0x3c5   :  { %4488 = vsyncpa [#allocation12], 1 }
 0x3c6   :  { %4489 = vsyncpa [#allocation4], 1 }

</bundles_post_ra>
